<compile_context>
chip_gen: v6e
topology: v6e:2x2x1
jax: 0.10.0
libtpu: 0.0.40
codegen_flags: <defaults>
</compile_context>

<pallas_src>
import functools
import math
from itertools import combinations

import jax
import jax.numpy as jnp
from jax import lax
from jax.experimental import pallas as pl
from jax.experimental.pallas import tpu as pltpu


def _round_up(x, m):
    return ((x + m - 1) // m) * m


# --------------------------- fused SLC LSTM kernel ----------------------------

def _slc_lstm_kernel(x_ref, wx_ref, wh_ref, b_ref, hT_ref, seq_sc, xproj_sc,
                     *, num_layers, seq_len):
    """Fused stacked LSTM for one modality (grid axis = modality, 'parallel').

    x_ref:   (1, T, Bp, Hp)     zero-padded time-major input sequence (f32)
    wx_ref:  (1, L, Hp, 4*Hp)   per-layer input-projection weights (bf16, transposed, padded)
    wh_ref:  (1, L, Hp, 4*Hp)   per-layer recurrent weights (bf16, transposed, padded)
    b_ref:   (1, L, 1, 4*Hp)    per-layer fused b_ih + b_hh (f32, zero-padded)
    hT_ref:  (1, Bp, Hp)        final hidden state of the last layer (f32)
    seq_sc:  (T, Bp, Hp)        VMEM scratch carrying the inter-layer sequence
    xproj_sc:(T, Bp, 4*Hp)      VMEM scratch holding the hoisted input projection
    """
    Bp = hT_ref.shape[1]
    Hp = hT_ref.shape[2]
    T = seq_len

    h = jnp.zeros((Bp, Hp), jnp.float32)
    for layer in range(num_layers):               # layers unrolled (small, static)
        # ---- hoisted input projection (+ bias) for the whole sequence -------
        # One (T*Bp, Hp) @ (Hp, 4Hp) matmul instead of T tiny (Bp, Hp) matmuls
        # on the serial recurrence path.
        if layer == 0:
            seq_in = x_ref[0]                     # (T, Bp, Hp) raw (padded) features
        else:
            seq_in = seq_sc[...]                  # previous layer's full sequence
        xin = seq_in.reshape(T * Bp, Hp).astype(jnp.bfloat16)
        xproj = jnp.dot(xin, wx_ref[0, layer],
                        preferred_element_type=jnp.float32)      # (T*Bp, 4Hp) f32
        xproj = xproj + b_ref[0, layer]           # bias folded in ONCE per layer
        xproj_sc[...] = xproj.reshape(T, Bp, 4 * Hp)

        # ---- serial recurrence: only h_prev @ W_h remains per step ----------
        h = jnp.zeros((Bp, Hp), jnp.float32)
        c = jnp.zeros((Bp, Hp), jnp.float32)
        for t in range(T):                        # fully unrolled, static indices
            gates = xproj_sc[t] + jnp.dot(h.astype(jnp.bfloat16), wh_ref[0, layer],
                                          preferred_element_type=jnp.float32)
            # gate layout (i, f, o, g): one contiguous sigmoid, one tanh
            sig = jax.nn.sigmoid(gates[:, 0:3 * Hp])
            i_g = sig[:, 0 * Hp:1 * Hp]
            f_g = sig[:, 1 * Hp:2 * Hp]
            o_g = sig[:, 2 * Hp:3 * Hp]
            g_g = jnp.tanh(gates[:, 3 * Hp:4 * Hp])
            c = f_g * c + i_g * g_g
            h = o_g * jnp.tanh(c)
            if layer < num_layers - 1:            # last layer's sequence is never read
                seq_sc[t] = h

    # single store of the final hidden state (no per-step dead stores)
    hT_ref[0] = h


def slc_lstm_fused(x_all, wx_all, wh_all, b_all):
    """x_all: (M, T, Bp, Hp) f32; wx/wh_all: (M, L, Hp, 4Hp) bf16; b_all: (M, L, 1, 4Hp) f32."""
    M, T, Bp, Hp = x_all.shape
    L = wx_all.shape[1]
    return pl.pallas_call(
        functools.partial(_slc_lstm_kernel, num_layers=L, seq_len=T),
        out_shape=jax.ShapeDtypeStruct((M, Bp, Hp), jnp.float32),
        grid_spec=pltpu.PrefetchScalarGridSpec(
            num_scalar_prefetch=0,
            grid=(M,),
            in_specs=[
                pl.BlockSpec((1, T, Bp, Hp), lambda m: (m, 0, 0, 0)),
                pl.BlockSpec((1, L, Hp, 4 * Hp), lambda m: (m, 0, 0, 0)),
                pl.BlockSpec((1, L, Hp, 4 * Hp), lambda m: (m, 0, 0, 0)),
                pl.BlockSpec((1, L, 1, 4 * Hp), lambda m: (m, 0, 0, 0)),
            ],
            out_specs=pl.BlockSpec((1, Bp, Hp), lambda m: (m, 0, 0)),
            scratch_shapes=[
                pltpu.VMEM((T, Bp, Hp), jnp.float32),       # inter-layer sequence
                pltpu.VMEM((T, Bp, 4 * Hp), jnp.float32),   # hoisted x-projection
            ],
        ),
        compiler_params=pltpu.CompilerParams(
            dimension_semantics=("parallel",)),
    )(x_all, wx_all, wh_all, b_all)


# ------------------------------ parameter setup --------------------------------

def init_slc_params(key, modalities, hidden_dims, output_dim):
    """Deterministic PyTorch-style LSTM init: U(-1/sqrt(H), 1/sqrt(H)).

    Returns raw PyTorch-shaped weights per modality/layer:
    (w_ih (4H, Din), w_hh (4H, H), b_ih (4H,), b_hh (4H,)).
    """
    H = output_dim
    k = 1.0 / math.sqrt(H)
    params = {}
    for name in modalities:
        layers = []
        in_dim = len(modalities[name])
        for layer in range(hidden_dims):
            d_in = in_dim if layer == 0 else H
            key, k1, k2, k3, k4 = jax.random.split(key, 5)
            w_ih = jax.random.uniform(k1, (4 * H, d_in), jnp.float32, -k, k)
            w_hh = jax.random.uniform(k2, (4 * H, H), jnp.float32, -k, k)
            b_ih = jax.random.uniform(k3, (4 * H,), jnp.float32, -k, k)
            b_hh = jax.random.uniform(k4, (4 * H,), jnp.float32, -k, k)
            layers.append((w_ih, w_hh, b_ih, b_hh))
        params[name] = layers
    return params


# PyTorch gate order is (i, f, g, o); the kernel wants (i, f, o, g) so sigmoid
# covers one contiguous 3*Hp slice and tanh the last Hp slice.
_GATE_SLOT = (0, 1, 3, 2)


def pack_params(params, modalities, H, Hp):
    """Split + transpose + zero-pad weights for the kernel.

    wx_all: (M, L, Hp, 4*Hp) bf16   input-projection weights (W_ih^T)
    wh_all: (M, L, Hp, 4*Hp) bf16   recurrent weights (W_hh^T)
    b_all:  (M, L, 1, 4*Hp)  f32    b_ih + b_hh
    Padded gate columns have zero weight & bias, so padded hidden units stay 0.
    """
    wx_mods, wh_mods, b_mods = [], [], []
    for name in modalities:
        wx_layers, wh_layers, b_layers = [], [], []
        for (w_ih, w_hh, b_ih, b_hh) in params[name]:
            d_in = w_ih.shape[1]
            wx = jnp.zeros((Hp, 4 * Hp), jnp.float32)
            wh = jnp.zeros((Hp, 4 * Hp), jnp.float32)
            bb = jnp.zeros((1, 4 * Hp), jnp.float32)
            for g in range(4):                      # g indexes PyTorch (i, f, g, o)
                s = _GATE_SLOT[g]
                wx = wx.at[:d_in, s * Hp:s * Hp + H].set(
                    w_ih[g * H:(g + 1) * H, :].T)
                wh = wh.at[:H, s * Hp:s * Hp + H].set(
                    w_hh[g * H:(g + 1) * H, :].T)
                bb = bb.at[0, s * Hp:s * Hp + H].set(
                    b_ih[g * H:(g + 1) * H] + b_hh[g * H:(g + 1) * H])
            wx_layers.append(wx.astype(jnp.bfloat16))
            wh_layers.append(wh.astype(jnp.bfloat16))
            b_layers.append(bb)
        wx_mods.append(jnp.stack(wx_layers, axis=0))
        wh_mods.append(jnp.stack(wh_layers, axis=0))
        b_mods.append(jnp.stack(b_layers, axis=0))
    return (jnp.stack(wx_mods, axis=0),
            jnp.stack(wh_mods, axis=0),
            jnp.stack(b_mods, axis=0))


def gather_pad_inputs(x, modalities, Bp, Hp):
    """x: (B, T, F) -> (M, T, Bp, Hp) time-major, zero-padded, static slices only."""
    B, T, F = x.shape
    mats = []
    for name in modalities:
        idx = modalities[name]
        Xm = jnp.concatenate([x[:, :, i:i + 1] for i in idx], axis=-1)  # (B,T,Din)
        Xm = jnp.transpose(Xm, (1, 0, 2))                               # (T,B,Din)
        Xm = jnp.pad(Xm, ((0, 0), (0, Bp - B), (0, Hp - len(idx))))
        mats.append(Xm)
    return jnp.stack(mats, axis=0)


# ------------------------------ SLC forward glue --------------------------------

def slc_forward(x, params, modalities, penalty, output_dim):
    """x: (B, T, F) f32. Returns (h, h_list) exactly like the PyTorch module."""
    B, T, F = x.shape
    H = output_dim
    max_din = max(len(v) for v in modalities.values())
    Hp = _round_up(max(H, max_din), 128)
    Bp = _round_up(B, 8)

    x_all = gather_pad_inputs(x, modalities, Bp, Hp)            # (M, T, Bp, Hp)
    wx_all, wh_all, b_all = pack_params(params, modalities, H, Hp)

    hT = slc_lstm_fused(x_all, wx_all, wh_all, b_all)           # (M, Bp, Hp)
    h_stack = hT[:, :B, :H]                                     # strip padding
    h_list = [h_stack[m] for m in range(h_stack.shape[0])]

    # combine (mean + pairwise |diff| penalty): tiny, plain jnp (XLA fuses it)
    h = jnp.sum(h_stack, axis=0) / float(len(h_list))
    if penalty:
        pen = jnp.zeros_like(h)
        for a, b in combinations(range(len(h_list)), 2):
            pen = pen + jnp.abs(h_stack[a] - h_stack[b])
        h = h - pen
    return h, h_list


# --------------------------- pure-JAX reference check ---------------------------

def _reference_slc(x, params, modalities, penalty, H):
    def lstm_layer_ref(X, w_ih, w_hh, b_ih, b_hh):
        B, T, _ = X.shape
        h = jnp.zeros((B, H), jnp.float32)
        c = jnp.zeros((B, H), jnp.float32)
        ys = []
        for t in range(T):
            g = X[:, t, :] @ w_ih.T + h @ w_hh.T + b_ih + b_hh
            i = jax.nn.sigmoid(g[:, 0 * H:1 * H])
            f = jax.nn.sigmoid(g[:, 1 * H:2 * H])
            gg = jnp.tanh(g[:, 2 * H:3 * H])
            o = jax.nn.sigmoid(g[:, 3 * H:4 * H])
            c = f * c + i * gg
            h = o * jnp.tanh(c)
            ys.append(h)
        return jnp.stack(ys, axis=1), h

    h_list = []
    for name in modalities:
        idx = modalities[name]
        X = jnp.concatenate([x[:, :, i:i + 1] for i in idx], axis=-1)
        hT = None
        for (w_ih, w_hh, b_ih, b_hh) in params[name]:
            X, hT = lstm_layer_ref(X, w_ih, w_hh, b_ih, b_hh)
        h_list.append(hT)
    h = sum(h_list) / float(len(h_list))
    if penalty:
        pen = jnp.zeros_like(h)
        for a, b in combinations(range(len(h_list)), 2):
            pen = pen + jnp.abs(h_list[a] - h_list[b])
        h = h - pen
    return h, h_list


# ------------------------------------ main ---------------------------------------

if __name__ == "__main__":
    modalities = {"m1": [0, 1, 2], "m2": [3, 4], "m3": [5, 6, 7]}
    hidden_dims = 2          # num_layers per LSTM
    output_dim = 8           # LSTM hidden size
    penalty = True
    B, T, F = 2, 8, 8

    root = jax.random.PRNGKey(0)
    kx, kp = jax.random.split(root)
    x = jax.random.normal(kx, (B, T, F), dtype=jnp.float32)
    params = init_slc_params(kp, modalities, hidden_dims, output_dim)

    h, h_list = slc_forward(x, params, modalities, penalty, output_dim)
    h = jax.block_until_ready(h)
    for hn in h_list:
        jax.block_until_ready(hn)

    assert h.shape == (B, output_dim)
    assert len(h_list) == len(modalities)

    # correctness check against a plain-JAX f32 LSTM reference.
    # tolerance reflects bf16 MXU matmul operands (gate math stays f32).
    h_ref, h_list_ref = _reference_slc(x, params, modalities, penalty, output_dim)
    assert float(jnp.max(jnp.abs(h - h_ref))) < 5e-2
    for a, b in zip(h_list, h_list_ref):
        assert float(jnp.max(jnp.abs(a - b))) < 5e-2

    print("KERNEL_OK")
</pallas_src>

<mosaic_0001>
module attributes {stable_mosaic.version = 11 : i64} {
  func.func @_slc_lstm_kernel(%arg0: i32, %arg1: memref<1x8x8x128xf32, #tpu.memory_space<vmem>>, %arg2: memref<1x2x128x512xbf16, #tpu.memory_space<vmem>>, %arg3: memref<1x2x128x512xbf16, #tpu.memory_space<vmem>>, %arg4: memref<1x2x1x512xf32, #tpu.memory_space<vmem>>, %arg5: memref<1x8x128xf32, #tpu.memory_space<vmem>>, %arg6: memref<8x8x128xf32, #tpu.memory_space<vmem>>, %arg7: memref<8x8x512xf32, #tpu.memory_space<vmem>>) attributes {dimension_semantics = [#tpu.dimension_semantics<parallel>], iteration_bounds = array<i64: 3>, scalar_prefetch = 0 : i64, scratch_operands = 2 : i64, tpu.core_type = #tpu.core_type<tc>, window_params = [{transform_indices = @transform_0, window_bounds = array<i64: 1, 8, 8, 128>}, {transform_indices = @transform_1, window_bounds = array<i64: 1, 2, 128, 512>}, {transform_indices = @transform_2, window_bounds = array<i64: 1, 2, 128, 512>}, {transform_indices = @transform_3, window_bounds = array<i64: 1, 2, 1, 512>}, {transform_indices = @transform_4, window_bounds = array<i64: 1, 8, 128>}]} {
    %c0 = arith.constant 0 : index
    %c0_0 = arith.constant 0 : index
    %c0_1 = arith.constant 0 : index
    %c0_2 = arith.constant 0 : index
    %0 = vector.load %arg1[%c0, %c0_0, %c0_1, %c0_2] : memref<1x8x8x128xf32, #tpu.memory_space<vmem>>, vector<1x8x8x128xf32>
    %1 = vector.shape_cast %0 : vector<1x8x8x128xf32> to vector<8x8x128xf32>
    %2 = vector.shape_cast %1 : vector<8x8x128xf32> to vector<64x128xf32>
    %3 = arith.truncf %2 : vector<64x128xf32> to vector<64x128xbf16>
    %c0_3 = arith.constant 0 : index
    %c0_4 = arith.constant 0 : index
    %c0_5 = arith.constant 0 : index
    %c0_6 = arith.constant 0 : index
    %4 = vector.load %arg2[%c0_3, %c0_4, %c0_5, %c0_6] : memref<1x2x128x512xbf16, #tpu.memory_space<vmem>>, vector<1x1x128x512xbf16>
    %5 = vector.shape_cast %4 : vector<1x1x128x512xbf16> to vector<128x512xbf16>
    %cst = arith.constant dense<0.000000e+00> : vector<64x512xf32>
    %6 = tpu.matmul %3, %5, %cst {dimension_numbers = #tpu.dot_dimension_numbers<[1], [0], [0], [1], [0, 0, 1, 1], [], []>} : vector<64x128xbf16>, vector<128x512xbf16>, vector<64x512xf32> -> vector<64x512xf32>
    %c0_7 = arith.constant 0 : index
    %c0_8 = arith.constant 0 : index
    %c0_9 = arith.constant 0 : index
    %c0_10 = arith.constant 0 : index
    %7 = vector.load %arg4[%c0_7, %c0_8, %c0_9, %c0_10] : memref<1x2x1x512xf32, #tpu.memory_space<vmem>>, vector<1x1x1x512xf32>
    %8 = vector.shape_cast %7 : vector<1x1x1x512xf32> to vector<1x512xf32>
    %9 = vector.broadcast %8 : vector<1x512xf32> to vector<64x512xf32>
    %10 = arith.addf %6, %9 : vector<64x512xf32>
    %11 = vector.shape_cast %10 : vector<64x512xf32> to vector<8x8x512xf32>
    %c0_11 = arith.constant 0 : index
    %c0_12 = arith.constant 0 : index
    %c0_13 = arith.constant 0 : index
    %12 = vector.load %arg7[%c0_11, %c0_12, %c0_13] : memref<8x8x512xf32, #tpu.memory_space<vmem>>, vector<8x8x512xf32>
    tpu.vector_store %arg7[%c0_11, %c0_12, %c0_13], %11 {strides = array<i32>} : memref<8x8x512xf32, #tpu.memory_space<vmem>>, vector<8x8x512xf32>,
    %cst_14 = arith.constant 0.000000e+00 : f32
    %13 = vector.broadcast %cst_14 : f32 to vector<8x128xf32>
    %cst_15 = arith.constant 0.000000e+00 : f32
    %14 = vector.broadcast %cst_15 : f32 to vector<8x128xf32>
    %c0_16 = arith.constant 0 : index
    %c0_17 = arith.constant 0 : index
    %c0_18 = arith.constant 0 : index
    %15 = vector.load %arg7[%c0_16, %c0_17, %c0_18] : memref<8x8x512xf32, #tpu.memory_space<vmem>>, vector<1x8x512xf32>
    %16 = vector.shape_cast %15 : vector<1x8x512xf32> to vector<8x512xf32>
    %17 = arith.truncf %13 : vector<8x128xf32> to vector<8x128xbf16>
    %c0_19 = arith.constant 0 : index
    %c0_20 = arith.constant 0 : index
    %c0_21 = arith.constant 0 : index
    %c0_22 = arith.constant 0 : index
    %18 = vector.load %arg3[%c0_19, %c0_20, %c0_21, %c0_22] : memref<1x2x128x512xbf16, #tpu.memory_space<vmem>>, vector<1x1x128x512xbf16>
    %19 = vector.shape_cast %18 : vector<1x1x128x512xbf16> to vector<128x512xbf16>
    %cst_23 = arith.constant dense<0.000000e+00> : vector<8x512xf32>
    %20 = tpu.matmul %17, %19, %cst_23 {dimension_numbers = #tpu.dot_dimension_numbers<[1], [0], [0], [1], [0, 0, 1, 1], [], []>} : vector<8x128xbf16>, vector<128x512xbf16>, vector<8x512xf32> -> vector<8x512xf32>
    %21 = arith.addf %16, %20 : vector<8x512xf32>
    %22 = vector.extract_strided_slice %21 {offsets = [0, 0], sizes = [8, 384], strides = [1, 1]} : vector<8x512xf32> to vector<8x384xf32>
    %23 = arith.negf %22 : vector<8x384xf32>
    %24 = math.exp %23 : vector<8x384xf32>
    %cst_24 = arith.constant 1.000000e+00 : f32
    %25 = vector.broadcast %cst_24 : f32 to vector<8x384xf32>
    %26 = arith.addf %25, %24 : vector<8x384xf32>
    %27 = arith.divf %25, %26 : vector<8x384xf32>
    %28 = vector.extract_strided_slice %27 {offsets = [0, 0], sizes = [8, 128], strides = [1, 1]} : vector<8x384xf32> to vector<8x128xf32>
    %29 = vector.extract_strided_slice %27 {offsets = [0, 128], sizes = [8, 128], strides = [1, 1]} : vector<8x384xf32> to vector<8x128xf32>
    %30 = vector.extract_strided_slice %27 {offsets = [0, 256], sizes = [8, 128], strides = [1, 1]} : vector<8x384xf32> to vector<8x128xf32>
    %31 = vector.extract_strided_slice %21 {offsets = [0, 384], sizes = [8, 128], strides = [1, 1]} : vector<8x512xf32> to vector<8x128xf32>
    %32 = math.tanh %31 : vector<8x128xf32>
    %33 = arith.mulf %29, %14 : vector<8x128xf32>
    %34 = arith.mulf %28, %32 : vector<8x128xf32>
    %35 = arith.addf %33, %34 : vector<8x128xf32>
    %36 = math.tanh %35 : vector<8x128xf32>
    %37 = arith.mulf %30, %36 : vector<8x128xf32>
    %c0_25 = arith.constant 0 : index
    %c0_26 = arith.constant 0 : index
    %c0_27 = arith.constant 0 : index
    %38 = vector.load %arg6[%c0_25, %c0_26, %c0_27] : memref<8x8x128xf32, #tpu.memory_space<vmem>>, vector<1x8x128xf32>
    %39 = vector.shape_cast %38 : vector<1x8x128xf32> to vector<8x128xf32>
    %40 = vector.shape_cast %37 : vector<8x128xf32> to vector<1x8x128xf32>
    tpu.vector_store %arg6[%c0_25, %c0_26, %c0_27], %40 {strides = array<i32>} : memref<8x8x128xf32, #tpu.memory_space<vmem>>, vector<1x8x128xf32>,
    %c1 = arith.constant 1 : index
    %c0_28 = arith.constant 0 : index
    %c0_29 = arith.constant 0 : index
    %41 = vector.load %arg7[%c1, %c0_28, %c0_29] : memref<8x8x512xf32, #tpu.memory_space<vmem>>, vector<1x8x512xf32>
    %42 = vector.shape_cast %41 : vector<1x8x512xf32> to vector<8x512xf32>
    %43 = arith.truncf %37 : vector<8x128xf32> to vector<8x128xbf16>
    %c0_30 = arith.constant 0 : index
    %c0_31 = arith.constant 0 : index
    %c0_32 = arith.constant 0 : index
    %c0_33 = arith.constant 0 : index
    %44 = vector.load %arg3[%c0_30, %c0_31, %c0_32, %c0_33] : memref<1x2x128x512xbf16, #tpu.memory_space<vmem>>, vector<1x1x128x512xbf16>
    %45 = vector.shape_cast %44 : vector<1x1x128x512xbf16> to vector<128x512xbf16>
    %cst_34 = arith.constant dense<0.000000e+00> : vector<8x512xf32>
    %46 = tpu.matmul %43, %45, %cst_34 {dimension_numbers = #tpu.dot_dimension_numbers<[1], [0], [0], [1], [0, 0, 1, 1], [], []>} : vector<8x128xbf16>, vector<128x512xbf16>, vector<8x512xf32> -> vector<8x512xf32>
    %47 = arith.addf %42, %46 : vector<8x512xf32>
    %48 = vector.extract_strided_slice %47 {offsets = [0, 0], sizes = [8, 384], strides = [1, 1]} : vector<8x512xf32> to vector<8x384xf32>
    %49 = arith.negf %48 : vector<8x384xf32>
    %50 = math.exp %49 : vector<8x384xf32>
    %cst_35 = arith.constant 1.000000e+00 : f32
    %51 = vector.broadcast %cst_35 : f32 to vector<8x384xf32>
    %52 = arith.addf %51, %50 : vector<8x384xf32>
    %53 = arith.divf %51, %52 : vector<8x384xf32>
    %54 = vector.extract_strided_slice %53 {offsets = [0, 0], sizes = [8, 128], strides = [1, 1]} : vector<8x384xf32> to vector<8x128xf32>
    %55 = vector.extract_strided_slice %53 {offsets = [0, 128], sizes = [8, 128], strides = [1, 1]} : vector<8x384xf32> to vector<8x128xf32>
    %56 = vector.extract_strided_slice %53 {offsets = [0, 256], sizes = [8, 128], strides = [1, 1]} : vector<8x384xf32> to vector<8x128xf32>
    %57 = vector.extract_strided_slice %47 {offsets = [0, 384], sizes = [8, 128], strides = [1, 1]} : vector<8x512xf32> to vector<8x128xf32>
    %58 = math.tanh %57 : vector<8x128xf32>
    %59 = arith.mulf %55, %35 : vector<8x128xf32>
    %60 = arith.mulf %54, %58 : vector<8x128xf32>
    %61 = arith.addf %59, %60 : vector<8x128xf32>
    %62 = math.tanh %61 : vector<8x128xf32>
    %63 = arith.mulf %56, %62 : vector<8x128xf32>
    %c1_36 = arith.constant 1 : index
    %c0_37 = arith.constant 0 : index
    %c0_38 = arith.constant 0 : index
    %64 = vector.load %arg6[%c1_36, %c0_37, %c0_38] : memref<8x8x128xf32, #tpu.memory_space<vmem>>, vector<1x8x128xf32>
    %65 = vector.shape_cast %64 : vector<1x8x128xf32> to vector<8x128xf32>
    %66 = vector.shape_cast %63 : vector<8x128xf32> to vector<1x8x128xf32>
    tpu.vector_store %arg6[%c1_36, %c0_37, %c0_38], %66 {strides = array<i32>} : memref<8x8x128xf32, #tpu.memory_space<vmem>>, vector<1x8x128xf32>,
    %c2 = arith.constant 2 : index
    %c0_39 = arith.constant 0 : index
    %c0_40 = arith.constant 0 : index
    %67 = vector.load %arg7[%c2, %c0_39, %c0_40] : memref<8x8x512xf32, #tpu.memory_space<vmem>>, vector<1x8x512xf32>
    %68 = vector.shape_cast %67 : vector<1x8x512xf32> to vector<8x512xf32>
    %69 = arith.truncf %63 : vector<8x128xf32> to vector<8x128xbf16>
    %c0_41 = arith.constant 0 : index
    %c0_42 = arith.constant 0 : index
    %c0_43 = arith.constant 0 : index
    %c0_44 = arith.constant 0 : index
    %70 = vector.load %arg3[%c0_41, %c0_42, %c0_43, %c0_44] : memref<1x2x128x512xbf16, #tpu.memory_space<vmem>>, vector<1x1x128x512xbf16>
    %71 = vector.shape_cast %70 : vector<1x1x128x512xbf16> to vector<128x512xbf16>
    %cst_45 = arith.constant dense<0.000000e+00> : vector<8x512xf32>
    %72 = tpu.matmul %69, %71, %cst_45 {dimension_numbers = #tpu.dot_dimension_numbers<[1], [0], [0], [1], [0, 0, 1, 1], [], []>} : vector<8x128xbf16>, vector<128x512xbf16>, vector<8x512xf32> -> vector<8x512xf32>
    %73 = arith.addf %68, %72 : vector<8x512xf32>
    %74 = vector.extract_strided_slice %73 {offsets = [0, 0], sizes = [8, 384], strides = [1, 1]} : vector<8x512xf32> to vector<8x384xf32>
    %75 = arith.negf %74 : vector<8x384xf32>
    %76 = math.exp %75 : vector<8x384xf32>
    %cst_46 = arith.constant 1.000000e+00 : f32
    %77 = vector.broadcast %cst_46 : f32 to vector<8x384xf32>
    %78 = arith.addf %77, %76 : vector<8x384xf32>
    %79 = arith.divf %77, %78 : vector<8x384xf32>
    %80 = vector.extract_strided_slice %79 {offsets = [0, 0], sizes = [8, 128], strides = [1, 1]} : vector<8x384xf32> to vector<8x128xf32>
    %81 = vector.extract_strided_slice %79 {offsets = [0, 128], sizes = [8, 128], strides = [1, 1]} : vector<8x384xf32> to vector<8x128xf32>
    %82 = vector.extract_strided_slice %79 {offsets = [0, 256], sizes = [8, 128], strides = [1, 1]} : vector<8x384xf32> to vector<8x128xf32>
    %83 = vector.extract_strided_slice %73 {offsets = [0, 384], sizes = [8, 128], strides = [1, 1]} : vector<8x512xf32> to vector<8x128xf32>
    %84 = math.tanh %83 : vector<8x128xf32>
    %85 = arith.mulf %81, %61 : vector<8x128xf32>
    %86 = arith.mulf %80, %84 : vector<8x128xf32>
    %87 = arith.addf %85, %86 : vector<8x128xf32>
    %88 = math.tanh %87 : vector<8x128xf32>
    %89 = arith.mulf %82, %88 : vector<8x128xf32>
    %c2_47 = arith.constant 2 : index
    %c0_48 = arith.constant 0 : index
    %c0_49 = arith.constant 0 : index
    %90 = vector.load %arg6[%c2_47, %c0_48, %c0_49] : memref<8x8x128xf32, #tpu.memory_space<vmem>>, vector<1x8x128xf32>
    %91 = vector.shape_cast %90 : vector<1x8x128xf32> to vector<8x128xf32>
    %92 = vector.shape_cast %89 : vector<8x128xf32> to vector<1x8x128xf32>
    tpu.vector_store %arg6[%c2_47, %c0_48, %c0_49], %92 {strides = array<i32>} : memref<8x8x128xf32, #tpu.memory_space<vmem>>, vector<1x8x128xf32>,
    %c3 = arith.constant 3 : index
    %c0_50 = arith.constant 0 : index
    %c0_51 = arith.constant 0 : index
    %93 = vector.load %arg7[%c3, %c0_50, %c0_51] : memref<8x8x512xf32, #tpu.memory_space<vmem>>, vector<1x8x512xf32>
    %94 = vector.shape_cast %93 : vector<1x8x512xf32> to vector<8x512xf32>
    %95 = arith.truncf %89 : vector<8x128xf32> to vector<8x128xbf16>
    %c0_52 = arith.constant 0 : index
    %c0_53 = arith.constant 0 : index
    %c0_54 = arith.constant 0 : index
    %c0_55 = arith.constant 0 : index
    %96 = vector.load %arg3[%c0_52, %c0_53, %c0_54, %c0_55] : memref<1x2x128x512xbf16, #tpu.memory_space<vmem>>, vector<1x1x128x512xbf16>
    %97 = vector.shape_cast %96 : vector<1x1x128x512xbf16> to vector<128x512xbf16>
    %cst_56 = arith.constant dense<0.000000e+00> : vector<8x512xf32>
    %98 = tpu.matmul %95, %97, %cst_56 {dimension_numbers = #tpu.dot_dimension_numbers<[1], [0], [0], [1], [0, 0, 1, 1], [], []>} : vector<8x128xbf16>, vector<128x512xbf16>, vector<8x512xf32> -> vector<8x512xf32>
    %99 = arith.addf %94, %98 : vector<8x512xf32>
    %100 = vector.extract_strided_slice %99 {offsets = [0, 0], sizes = [8, 384], strides = [1, 1]} : vector<8x512xf32> to vector<8x384xf32>
    %101 = arith.negf %100 : vector<8x384xf32>
    %102 = math.exp %101 : vector<8x384xf32>
    %cst_57 = arith.constant 1.000000e+00 : f32
    %103 = vector.broadcast %cst_57 : f32 to vector<8x384xf32>
    %104 = arith.addf %103, %102 : vector<8x384xf32>
    %105 = arith.divf %103, %104 : vector<8x384xf32>
    %106 = vector.extract_strided_slice %105 {offsets = [0, 0], sizes = [8, 128], strides = [1, 1]} : vector<8x384xf32> to vector<8x128xf32>
    %107 = vector.extract_strided_slice %105 {offsets = [0, 128], sizes = [8, 128], strides = [1, 1]} : vector<8x384xf32> to vector<8x128xf32>
    %108 = vector.extract_strided_slice %105 {offsets = [0, 256], sizes = [8, 128], strides = [1, 1]} : vector<8x384xf32> to vector<8x128xf32>
    %109 = vector.extract_strided_slice %99 {offsets = [0, 384], sizes = [8, 128], strides = [1, 1]} : vector<8x512xf32> to vector<8x128xf32>
    %110 = math.tanh %109 : vector<8x128xf32>
    %111 = arith.mulf %107, %87 : vector<8x128xf32>
    %112 = arith.mulf %106, %110 : vector<8x128xf32>
    %113 = arith.addf %111, %112 : vector<8x128xf32>
    %114 = math.tanh %113 : vector<8x128xf32>
    %115 = arith.mulf %108, %114 : vector<8x128xf32>
    %c3_58 = arith.constant 3 : index
    %c0_59 = arith.constant 0 : index
    %c0_60 = arith.constant 0 : index
    %116 = vector.load %arg6[%c3_58, %c0_59, %c0_60] : memref<8x8x128xf32, #tpu.memory_space<vmem>>, vector<1x8x128xf32>
    %117 = vector.shape_cast %116 : vector<1x8x128xf32> to vector<8x128xf32>
    %118 = vector.shape_cast %115 : vector<8x128xf32> to vector<1x8x128xf32>
    tpu.vector_store %arg6[%c3_58, %c0_59, %c0_60], %118 {strides = array<i32>} : memref<8x8x128xf32, #tpu.memory_space<vmem>>, vector<1x8x128xf32>,
    %c4 = arith.constant 4 : index
    %c0_61 = arith.constant 0 : index
    %c0_62 = arith.constant 0 : index
    %119 = vector.load %arg7[%c4, %c0_61, %c0_62] : memref<8x8x512xf32, #tpu.memory_space<vmem>>, vector<1x8x512xf32>
    %120 = vector.shape_cast %119 : vector<1x8x512xf32> to vector<8x512xf32>
    %121 = arith.truncf %115 : vector<8x128xf32> to vector<8x128xbf16>
    %c0_63 = arith.constant 0 : index
    %c0_64 = arith.constant 0 : index
    %c0_65 = arith.constant 0 : index
    %c0_66 = arith.constant 0 : index
    %122 = vector.load %arg3[%c0_63, %c0_64, %c0_65, %c0_66] : memref<1x2x128x512xbf16, #tpu.memory_space<vmem>>, vector<1x1x128x512xbf16>
    %123 = vector.shape_cast %122 : vector<1x1x128x512xbf16> to vector<128x512xbf16>
    %cst_67 = arith.constant dense<0.000000e+00> : vector<8x512xf32>
    %124 = tpu.matmul %121, %123, %cst_67 {dimension_numbers = #tpu.dot_dimension_numbers<[1], [0], [0], [1], [0, 0, 1, 1], [], []>} : vector<8x128xbf16>, vector<128x512xbf16>, vector<8x512xf32> -> vector<8x512xf32>
    %125 = arith.addf %120, %124 : vector<8x512xf32>
    %126 = vector.extract_strided_slice %125 {offsets = [0, 0], sizes = [8, 384], strides = [1, 1]} : vector<8x512xf32> to vector<8x384xf32>
    %127 = arith.negf %126 : vector<8x384xf32>
    %128 = math.exp %127 : vector<8x384xf32>
    %cst_68 = arith.constant 1.000000e+00 : f32
    %129 = vector.broadcast %cst_68 : f32 to vector<8x384xf32>
    %130 = arith.addf %129, %128 : vector<8x384xf32>
    %131 = arith.divf %129, %130 : vector<8x384xf32>
    %132 = vector.extract_strided_slice %131 {offsets = [0, 0], sizes = [8, 128], strides = [1, 1]} : vector<8x384xf32> to vector<8x128xf32>
    %133 = vector.extract_strided_slice %131 {offsets = [0, 128], sizes = [8, 128], strides = [1, 1]} : vector<8x384xf32> to vector<8x128xf32>
    %134 = vector.extract_strided_slice %131 {offsets = [0, 256], sizes = [8, 128], strides = [1, 1]} : vector<8x384xf32> to vector<8x128xf32>
    %135 = vector.extract_strided_slice %125 {offsets = [0, 384], sizes = [8, 128], strides = [1, 1]} : vector<8x512xf32> to vector<8x128xf32>
    %136 = math.tanh %135 : vector<8x128xf32>
    %137 = arith.mulf %133, %113 : vector<8x128xf32>
    %138 = arith.mulf %132, %136 : vector<8x128xf32>
    %139 = arith.addf %137, %138 : vector<8x128xf32>
    %140 = math.tanh %139 : vector<8x128xf32>
    %141 = arith.mulf %134, %140 : vector<8x128xf32>
    %c4_69 = arith.constant 4 : index
    %c0_70 = arith.constant 0 : index
    %c0_71 = arith.constant 0 : index
    %142 = vector.load %arg6[%c4_69, %c0_70, %c0_71] : memref<8x8x128xf32, #tpu.memory_space<vmem>>, vector<1x8x128xf32>
    %143 = vector.shape_cast %142 : vector<1x8x128xf32> to vector<8x128xf32>
    %144 = vector.shape_cast %141 : vector<8x128xf32> to vector<1x8x128xf32>
    tpu.vector_store %arg6[%c4_69, %c0_70, %c0_71], %144 {strides = array<i32>} : memref<8x8x128xf32, #tpu.memory_space<vmem>>, vector<1x8x128xf32>,
    %c5 = arith.constant 5 : index
    %c0_72 = arith.constant 0 : index
    %c0_73 = arith.constant 0 : index
    %145 = vector.load %arg7[%c5, %c0_72, %c0_73] : memref<8x8x512xf32, #tpu.memory_space<vmem>>, vector<1x8x512xf32>
    %146 = vector.shape_cast %145 : vector<1x8x512xf32> to vector<8x512xf32>
    %147 = arith.truncf %141 : vector<8x128xf32> to vector<8x128xbf16>
    %c0_74 = arith.constant 0 : index
    %c0_75 = arith.constant 0 : index
    %c0_76 = arith.constant 0 : index
    %c0_77 = arith.constant 0 : index
    %148 = vector.load %arg3[%c0_74, %c0_75, %c0_76, %c0_77] : memref<1x2x128x512xbf16, #tpu.memory_space<vmem>>, vector<1x1x128x512xbf16>
    %149 = vector.shape_cast %148 : vector<1x1x128x512xbf16> to vector<128x512xbf16>
    %cst_78 = arith.constant dense<0.000000e+00> : vector<8x512xf32>
    %150 = tpu.matmul %147, %149, %cst_78 {dimension_numbers = #tpu.dot_dimension_numbers<[1], [0], [0], [1], [0, 0, 1, 1], [], []>} : vector<8x128xbf16>, vector<128x512xbf16>, vector<8x512xf32> -> vector<8x512xf32>
    %151 = arith.addf %146, %150 : vector<8x512xf32>
    %152 = vector.extract_strided_slice %151 {offsets = [0, 0], sizes = [8, 384], strides = [1, 1]} : vector<8x512xf32> to vector<8x384xf32>
    %153 = arith.negf %152 : vector<8x384xf32>
    %154 = math.exp %153 : vector<8x384xf32>
    %cst_79 = arith.constant 1.000000e+00 : f32
    %155 = vector.broadcast %cst_79 : f32 to vector<8x384xf32>
    %156 = arith.addf %155, %154 : vector<8x384xf32>
    %157 = arith.divf %155, %156 : vector<8x384xf32>
    %158 = vector.extract_strided_slice %157 {offsets = [0, 0], sizes = [8, 128], strides = [1, 1]} : vector<8x384xf32> to vector<8x128xf32>
    %159 = vector.extract_strided_slice %157 {offsets = [0, 128], sizes = [8, 128], strides = [1, 1]} : vector<8x384xf32> to vector<8x128xf32>
    %160 = vector.extract_strided_slice %157 {offsets = [0, 256], sizes = [8, 128], strides = [1, 1]} : vector<8x384xf32> to vector<8x128xf32>
    %161 = vector.extract_strided_slice %151 {offsets = [0, 384], sizes = [8, 128], strides = [1, 1]} : vector<8x512xf32> to vector<8x128xf32>
    %162 = math.tanh %161 : vector<8x128xf32>
    %163 = arith.mulf %159, %139 : vector<8x128xf32>
    %164 = arith.mulf %158, %162 : vector<8x128xf32>
    %165 = arith.addf %163, %164 : vector<8x128xf32>
    %166 = math.tanh %165 : vector<8x128xf32>
    %167 = arith.mulf %160, %166 : vector<8x128xf32>
    %c5_80 = arith.constant 5 : index
    %c0_81 = arith.constant 0 : index
    %c0_82 = arith.constant 0 : index
    %168 = vector.load %arg6[%c5_80, %c0_81, %c0_82] : memref<8x8x128xf32, #tpu.memory_space<vmem>>, vector<1x8x128xf32>
    %169 = vector.shape_cast %168 : vector<1x8x128xf32> to vector<8x128xf32>
    %170 = vector.shape_cast %167 : vector<8x128xf32> to vector<1x8x128xf32>
    tpu.vector_store %arg6[%c5_80, %c0_81, %c0_82], %170 {strides = array<i32>} : memref<8x8x128xf32, #tpu.memory_space<vmem>>, vector<1x8x128xf32>,
    %c6 = arith.constant 6 : index
    %c0_83 = arith.constant 0 : index
    %c0_84 = arith.constant 0 : index
    %171 = vector.load %arg7[%c6, %c0_83, %c0_84] : memref<8x8x512xf32, #tpu.memory_space<vmem>>, vector<1x8x512xf32>
    %172 = vector.shape_cast %171 : vector<1x8x512xf32> to vector<8x512xf32>
    %173 = arith.truncf %167 : vector<8x128xf32> to vector<8x128xbf16>
    %c0_85 = arith.constant 0 : index
    %c0_86 = arith.constant 0 : index
    %c0_87 = arith.constant 0 : index
    %c0_88 = arith.constant 0 : index
    %174 = vector.load %arg3[%c0_85, %c0_86, %c0_87, %c0_88] : memref<1x2x128x512xbf16, #tpu.memory_space<vmem>>, vector<1x1x128x512xbf16>
    %175 = vector.shape_cast %174 : vector<1x1x128x512xbf16> to vector<128x512xbf16>
    %cst_89 = arith.constant dense<0.000000e+00> : vector<8x512xf32>
    %176 = tpu.matmul %173, %175, %cst_89 {dimension_numbers = #tpu.dot_dimension_numbers<[1], [0], [0], [1], [0, 0, 1, 1], [], []>} : vector<8x128xbf16>, vector<128x512xbf16>, vector<8x512xf32> -> vector<8x512xf32>
    %177 = arith.addf %172, %176 : vector<8x512xf32>
    %178 = vector.extract_strided_slice %177 {offsets = [0, 0], sizes = [8, 384], strides = [1, 1]} : vector<8x512xf32> to vector<8x384xf32>
    %179 = arith.negf %178 : vector<8x384xf32>
    %180 = math.exp %179 : vector<8x384xf32>
    %cst_90 = arith.constant 1.000000e+00 : f32
    %181 = vector.broadcast %cst_90 : f32 to vector<8x384xf32>
    %182 = arith.addf %181, %180 : vector<8x384xf32>
    %183 = arith.divf %181, %182 : vector<8x384xf32>
    %184 = vector.extract_strided_slice %183 {offsets = [0, 0], sizes = [8, 128], strides = [1, 1]} : vector<8x384xf32> to vector<8x128xf32>
    %185 = vector.extract_strided_slice %183 {offsets = [0, 128], sizes = [8, 128], strides = [1, 1]} : vector<8x384xf32> to vector<8x128xf32>
    %186 = vector.extract_strided_slice %183 {offsets = [0, 256], sizes = [8, 128], strides = [1, 1]} : vector<8x384xf32> to vector<8x128xf32>
    %187 = vector.extract_strided_slice %177 {offsets = [0, 384], sizes = [8, 128], strides = [1, 1]} : vector<8x512xf32> to vector<8x128xf32>
    %188 = math.tanh %187 : vector<8x128xf32>
    %189 = arith.mulf %185, %165 : vector<8x128xf32>
    %190 = arith.mulf %184, %188 : vector<8x128xf32>
    %191 = arith.addf %189, %190 : vector<8x128xf32>
    %192 = math.tanh %191 : vector<8x128xf32>
    %193 = arith.mulf %186, %192 : vector<8x128xf32>
    %c6_91 = arith.constant 6 : index
    %c0_92 = arith.constant 0 : index
    %c0_93 = arith.constant 0 : index
    %194 = vector.load %arg6[%c6_91, %c0_92, %c0_93] : memref<8x8x128xf32, #tpu.memory_space<vmem>>, vector<1x8x128xf32>
    %195 = vector.shape_cast %194 : vector<1x8x128xf32> to vector<8x128xf32>
    %196 = vector.shape_cast %193 : vector<8x128xf32> to vector<1x8x128xf32>
    tpu.vector_store %arg6[%c6_91, %c0_92, %c0_93], %196 {strides = array<i32>} : memref<8x8x128xf32, #tpu.memory_space<vmem>>, vector<1x8x128xf32>,
    %c7 = arith.constant 7 : index
    %c0_94 = arith.constant 0 : index
    %c0_95 = arith.constant 0 : index
    %197 = vector.load %arg7[%c7, %c0_94, %c0_95] : memref<8x8x512xf32, #tpu.memory_space<vmem>>, vector<1x8x512xf32>
    %198 = vector.shape_cast %197 : vector<1x8x512xf32> to vector<8x512xf32>
    %199 = arith.truncf %193 : vector<8x128xf32> to vector<8x128xbf16>
    %c0_96 = arith.constant 0 : index
    %c0_97 = arith.constant 0 : index
    %c0_98 = arith.constant 0 : index
    %c0_99 = arith.constant 0 : index
    %200 = vector.load %arg3[%c0_96, %c0_97, %c0_98, %c0_99] : memref<1x2x128x512xbf16, #tpu.memory_space<vmem>>, vector<1x1x128x512xbf16>
    %201 = vector.shape_cast %200 : vector<1x1x128x512xbf16> to vector<128x512xbf16>
    %cst_100 = arith.constant dense<0.000000e+00> : vector<8x512xf32>
    %202 = tpu.matmul %199, %201, %cst_100 {dimension_numbers = #tpu.dot_dimension_numbers<[1], [0], [0], [1], [0, 0, 1, 1], [], []>} : vector<8x128xbf16>, vector<128x512xbf16>, vector<8x512xf32> -> vector<8x512xf32>
    %203 = arith.addf %198, %202 : vector<8x512xf32>
    %204 = vector.extract_strided_slice %203 {offsets = [0, 0], sizes = [8, 384], strides = [1, 1]} : vector<8x512xf32> to vector<8x384xf32>
    %205 = arith.negf %204 : vector<8x384xf32>
    %206 = math.exp %205 : vector<8x384xf32>
    %cst_101 = arith.constant 1.000000e+00 : f32
    %207 = vector.broadcast %cst_101 : f32 to vector<8x384xf32>
    %208 = arith.addf %207, %206 : vector<8x384xf32>
    %209 = arith.divf %207, %208 : vector<8x384xf32>
    %210 = vector.extract_strided_slice %209 {offsets = [0, 0], sizes = [8, 128], strides = [1, 1]} : vector<8x384xf32> to vector<8x128xf32>
    %211 = vector.extract_strided_slice %209 {offsets = [0, 128], sizes = [8, 128], strides = [1, 1]} : vector<8x384xf32> to vector<8x128xf32>
    %212 = vector.extract_strided_slice %209 {offsets = [0, 256], sizes = [8, 128], strides = [1, 1]} : vector<8x384xf32> to vector<8x128xf32>
    %213 = vector.extract_strided_slice %203 {offsets = [0, 384], sizes = [8, 128], strides = [1, 1]} : vector<8x512xf32> to vector<8x128xf32>
    %214 = math.tanh %213 : vector<8x128xf32>
    %215 = arith.mulf %211, %191 : vector<8x128xf32>
    %216 = arith.mulf %210, %214 : vector<8x128xf32>
    %217 = arith.addf %215, %216 : vector<8x128xf32>
    %218 = math.tanh %217 : vector<8x128xf32>
    %219 = arith.mulf %212, %218 : vector<8x128xf32>
    %c7_102 = arith.constant 7 : index
    %c0_103 = arith.constant 0 : index
    %c0_104 = arith.constant 0 : index
    %220 = vector.load %arg6[%c7_102, %c0_103, %c0_104] : memref<8x8x128xf32, #tpu.memory_space<vmem>>, vector<1x8x128xf32>
    %221 = vector.shape_cast %220 : vector<1x8x128xf32> to vector<8x128xf32>
    %222 = vector.shape_cast %219 : vector<8x128xf32> to vector<1x8x128xf32>
    tpu.vector_store %arg6[%c7_102, %c0_103, %c0_104], %222 {strides = array<i32>} : memref<8x8x128xf32, #tpu.memory_space<vmem>>, vector<1x8x128xf32>,
    %c0_105 = arith.constant 0 : index
    %c0_106 = arith.constant 0 : index
    %c0_107 = arith.constant 0 : index
    %223 = vector.load %arg6[%c0_105, %c0_106, %c0_107] : memref<8x8x128xf32, #tpu.memory_space<vmem>>, vector<8x8x128xf32>
    %224 = vector.shape_cast %223 : vector<8x8x128xf32> to vector<64x128xf32>
    %225 = arith.truncf %224 : vector<64x128xf32> to vector<64x128xbf16>
    %c0_108 = arith.constant 0 : index
    %c1_109 = arith.constant 1 : index
    %c0_110 = arith.constant 0 : index
    %c0_111 = arith.constant 0 : index
    %226 = vector.load %arg2[%c0_108, %c1_109, %c0_110, %c0_111] : memref<1x2x128x512xbf16, #tpu.memory_space<vmem>>, vector<1x1x128x512xbf16>
    %227 = vector.shape_cast %226 : vector<1x1x128x512xbf16> to vector<128x512xbf16>
    %cst_112 = arith.constant dense<0.000000e+00> : vector<64x512xf32>
    %228 = tpu.matmul %225, %227, %cst_112 {dimension_numbers = #tpu.dot_dimension_numbers<[1], [0], [0], [1], [0, 0, 1, 1], [], []>} : vector<64x128xbf16>, vector<128x512xbf16>, vector<64x512xf32> -> vector<64x512xf32>
    %c0_113 = arith.constant 0 : index
    %c1_114 = arith.constant 1 : index
    %c0_115 = arith.constant 0 : index
    %c0_116 = arith.constant 0 : index
    %229 = vector.load %arg4[%c0_113, %c1_114, %c0_115, %c0_116] : memref<1x2x1x512xf32, #tpu.memory_space<vmem>>, vector<1x1x1x512xf32>
    %230 = vector.shape_cast %229 : vector<1x1x1x512xf32> to vector<1x512xf32>
    %231 = vector.broadcast %230 : vector<1x512xf32> to vector<64x512xf32>
    %232 = arith.addf %228, %231 : vector<64x512xf32>
    %233 = vector.shape_cast %232 : vector<64x512xf32> to vector<8x8x512xf32>
    %c0_117 = arith.constant 0 : index
    %c0_118 = arith.constant 0 : index
    %c0_119 = arith.constant 0 : index
    %234 = vector.load %arg7[%c0_117, %c0_118, %c0_119] : memref<8x8x512xf32, #tpu.memory_space<vmem>>, vector<8x8x512xf32>
    tpu.vector_store %arg7[%c0_117, %c0_118, %c0_119], %233 {strides = array<i32>} : memref<8x8x512xf32, #tpu.memory_space<vmem>>, vector<8x8x512xf32>,
    %cst_120 = arith.constant 0.000000e+00 : f32
    %235 = vector.broadcast %cst_120 : f32 to vector<8x128xf32>
    %cst_121 = arith.constant 0.000000e+00 : f32
    %236 = vector.broadcast %cst_121 : f32 to vector<8x128xf32>
    %c0_122 = arith.constant 0 : index
    %c0_123 = arith.constant 0 : index
    %c0_124 = arith.constant 0 : index
    %237 = vector.load %arg7[%c0_122, %c0_123, %c0_124] : memref<8x8x512xf32, #tpu.memory_space<vmem>>, vector<1x8x512xf32>
    %238 = vector.shape_cast %237 : vector<1x8x512xf32> to vector<8x512xf32>
    %239 = arith.truncf %235 : vector<8x128xf32> to vector<8x128xbf16>
    %c0_125 = arith.constant 0 : index
    %c1_126 = arith.constant 1 : index
    %c0_127 = arith.constant 0 : index
    %c0_128 = arith.constant 0 : index
    %240 = vector.load %arg3[%c0_125, %c1_126, %c0_127, %c0_128] : memref<1x2x128x512xbf16, #tpu.memory_space<vmem>>, vector<1x1x128x512xbf16>
    %241 = vector.shape_cast %240 : vector<1x1x128x512xbf16> to vector<128x512xbf16>
    %cst_129 = arith.constant dense<0.000000e+00> : vector<8x512xf32>
    %242 = tpu.matmul %239, %241, %cst_129 {dimension_numbers = #tpu.dot_dimension_numbers<[1], [0], [0], [1], [0, 0, 1, 1], [], []>} : vector<8x128xbf16>, vector<128x512xbf16>, vector<8x512xf32> -> vector<8x512xf32>
    %243 = arith.addf %238, %242 : vector<8x512xf32>
    %244 = vector.extract_strided_slice %243 {offsets = [0, 0], sizes = [8, 384], strides = [1, 1]} : vector<8x512xf32> to vector<8x384xf32>
    %245 = arith.negf %244 : vector<8x384xf32>
    %246 = math.exp %245 : vector<8x384xf32>
    %cst_130 = arith.constant 1.000000e+00 : f32
    %247 = vector.broadcast %cst_130 : f32 to vector<8x384xf32>
    %248 = arith.addf %247, %246 : vector<8x384xf32>
    %249 = arith.divf %247, %248 : vector<8x384xf32>
    %250 = vector.extract_strided_slice %249 {offsets = [0, 0], sizes = [8, 128], strides = [1, 1]} : vector<8x384xf32> to vector<8x128xf32>
    %251 = vector.extract_strided_slice %249 {offsets = [0, 128], sizes = [8, 128], strides = [1, 1]} : vector<8x384xf32> to vector<8x128xf32>
    %252 = vector.extract_strided_slice %249 {offsets = [0, 256], sizes = [8, 128], strides = [1, 1]} : vector<8x384xf32> to vector<8x128xf32>
    %253 = vector.extract_strided_slice %243 {offsets = [0, 384], sizes = [8, 128], strides = [1, 1]} : vector<8x512xf32> to vector<8x128xf32>
    %254 = math.tanh %253 : vector<8x128xf32>
    %255 = arith.mulf %251, %236 : vector<8x128xf32>
    %256 = arith.mulf %250, %254 : vector<8x128xf32>
    %257 = arith.addf %255, %256 : vector<8x128xf32>
    %258 = math.tanh %257 : vector<8x128xf32>
    %259 = arith.mulf %252, %258 : vector<8x128xf32>
    %c1_131 = arith.constant 1 : index
    %c0_132 = arith.constant 0 : index
    %c0_133 = arith.constant 0 : index
    %260 = vector.load %arg7[%c1_131, %c0_132, %c0_133] : memref<8x8x512xf32, #tpu.memory_space<vmem>>, vector<1x8x512xf32>
    %261 = vector.shape_cast %260 : vector<1x8x512xf32> to vector<8x512xf32>
    %262 = arith.truncf %259 : vector<8x128xf32> to vector<8x128xbf16>
    %c0_134 = arith.constant 0 : index
    %c1_135 = arith.constant 1 : index
    %c0_136 = arith.constant 0 : index
    %c0_137 = arith.constant 0 : index
    %263 = vector.load %arg3[%c0_134, %c1_135, %c0_136, %c0_137] : memref<1x2x128x512xbf16, #tpu.memory_space<vmem>>, vector<1x1x128x512xbf16>
    %264 = vector.shape_cast %263 : vector<1x1x128x512xbf16> to vector<128x512xbf16>
    %cst_138 = arith.constant dense<0.000000e+00> : vector<8x512xf32>
    %265 = tpu.matmul %262, %264, %cst_138 {dimension_numbers = #tpu.dot_dimension_numbers<[1], [0], [0], [1], [0, 0, 1, 1], [], []>} : vector<8x128xbf16>, vector<128x512xbf16>, vector<8x512xf32> -> vector<8x512xf32>
    %266 = arith.addf %261, %265 : vector<8x512xf32>
    %267 = vector.extract_strided_slice %266 {offsets = [0, 0], sizes = [8, 384], strides = [1, 1]} : vector<8x512xf32> to vector<8x384xf32>
    %268 = arith.negf %267 : vector<8x384xf32>
    %269 = math.exp %268 : vector<8x384xf32>
    %cst_139 = arith.constant 1.000000e+00 : f32
    %270 = vector.broadcast %cst_139 : f32 to vector<8x384xf32>
    %271 = arith.addf %270, %269 : vector<8x384xf32>
    %272 = arith.divf %270, %271 : vector<8x384xf32>
    %273 = vector.extract_strided_slice %272 {offsets = [0, 0], sizes = [8, 128], strides = [1, 1]} : vector<8x384xf32> to vector<8x128xf32>
    %274 = vector.extract_strided_slice %272 {offsets = [0, 128], sizes = [8, 128], strides = [1, 1]} : vector<8x384xf32> to vector<8x128xf32>
    %275 = vector.extract_strided_slice %272 {offsets = [0, 256], sizes = [8, 128], strides = [1, 1]} : vector<8x384xf32> to vector<8x128xf32>
    %276 = vector.extract_strided_slice %266 {offsets = [0, 384], sizes = [8, 128], strides = [1, 1]} : vector<8x512xf32> to vector<8x128xf32>
    %277 = math.tanh %276 : vector<8x128xf32>
    %278 = arith.mulf %274, %257 : vector<8x128xf32>
    %279 = arith.mulf %273, %277 : vector<8x128xf32>
    %280 = arith.addf %278, %279 : vector<8x128xf32>
    %281 = math.tanh %280 : vector<8x128xf32>
    %282 = arith.mulf %275, %281 : vector<8x128xf32>
    %c2_140 = arith.constant 2 : index
    %c0_141 = arith.constant 0 : index
    %c0_142 = arith.constant 0 : index
    %283 = vector.load %arg7[%c2_140, %c0_141, %c0_142] : memref<8x8x512xf32, #tpu.memory_space<vmem>>, vector<1x8x512xf32>
    %284 = vector.shape_cast %283 : vector<1x8x512xf32> to vector<8x512xf32>
    %285 = arith.truncf %282 : vector<8x128xf32> to vector<8x128xbf16>
    %c0_143 = arith.constant 0 : index
    %c1_144 = arith.constant 1 : index
    %c0_145 = arith.constant 0 : index
    %c0_146 = arith.constant 0 : index
    %286 = vector.load %arg3[%c0_143, %c1_144, %c0_145, %c0_146] : memref<1x2x128x512xbf16, #tpu.memory_space<vmem>>, vector<1x1x128x512xbf16>
    %287 = vector.shape_cast %286 : vector<1x1x128x512xbf16> to vector<128x512xbf16>
    %cst_147 = arith.constant dense<0.000000e+00> : vector<8x512xf32>
    %288 = tpu.matmul %285, %287, %cst_147 {dimension_numbers = #tpu.dot_dimension_numbers<[1], [0], [0], [1], [0, 0, 1, 1], [], []>} : vector<8x128xbf16>, vector<128x512xbf16>, vector<8x512xf32> -> vector<8x512xf32>
    %289 = arith.addf %284, %288 : vector<8x512xf32>
    %290 = vector.extract_strided_slice %289 {offsets = [0, 0], sizes = [8, 384], strides = [1, 1]} : vector<8x512xf32> to vector<8x384xf32>
    %291 = arith.negf %290 : vector<8x384xf32>
    %292 = math.exp %291 : vector<8x384xf32>
    %cst_148 = arith.constant 1.000000e+00 : f32
    %293 = vector.broadcast %cst_148 : f32 to vector<8x384xf32>
    %294 = arith.addf %293, %292 : vector<8x384xf32>
    %295 = arith.divf %293, %294 : vector<8x384xf32>
    %296 = vector.extract_strided_slice %295 {offsets = [0, 0], sizes = [8, 128], strides = [1, 1]} : vector<8x384xf32> to vector<8x128xf32>
    %297 = vector.extract_strided_slice %295 {offsets = [0, 128], sizes = [8, 128], strides = [1, 1]} : vector<8x384xf32> to vector<8x128xf32>
    %298 = vector.extract_strided_slice %295 {offsets = [0, 256], sizes = [8, 128], strides = [1, 1]} : vector<8x384xf32> to vector<8x128xf32>
    %299 = vector.extract_strided_slice %289 {offsets = [0, 384], sizes = [8, 128], strides = [1, 1]} : vector<8x512xf32> to vector<8x128xf32>
    %300 = math.tanh %299 : vector<8x128xf32>
    %301 = arith.mulf %297, %280 : vector<8x128xf32>
    %302 = arith.mulf %296, %300 : vector<8x128xf32>
    %303 = arith.addf %301, %302 : vector<8x128xf32>
    %304 = math.tanh %303 : vector<8x128xf32>
    %305 = arith.mulf %298, %304 : vector<8x128xf32>
    %c3_149 = arith.constant 3 : index
    %c0_150 = arith.constant 0 : index
    %c0_151 = arith.constant 0 : index
    %306 = vector.load %arg7[%c3_149, %c0_150, %c0_151] : memref<8x8x512xf32, #tpu.memory_space<vmem>>, vector<1x8x512xf32>
    %307 = vector.shape_cast %306 : vector<1x8x512xf32> to vector<8x512xf32>
    %308 = arith.truncf %305 : vector<8x128xf32> to vector<8x128xbf16>
    %c0_152 = arith.constant 0 : index
    %c1_153 = arith.constant 1 : index
    %c0_154 = arith.constant 0 : index
    %c0_155 = arith.constant 0 : index
    %309 = vector.load %arg3[%c0_152, %c1_153, %c0_154, %c0_155] : memref<1x2x128x512xbf16, #tpu.memory_space<vmem>>, vector<1x1x128x512xbf16>
    %310 = vector.shape_cast %309 : vector<1x1x128x512xbf16> to vector<128x512xbf16>
    %cst_156 = arith.constant dense<0.000000e+00> : vector<8x512xf32>
    %311 = tpu.matmul %308, %310, %cst_156 {dimension_numbers = #tpu.dot_dimension_numbers<[1], [0], [0], [1], [0, 0, 1, 1], [], []>} : vector<8x128xbf16>, vector<128x512xbf16>, vector<8x512xf32> -> vector<8x512xf32>
    %312 = arith.addf %307, %311 : vector<8x512xf32>
    %313 = vector.extract_strided_slice %312 {offsets = [0, 0], sizes = [8, 384], strides = [1, 1]} : vector<8x512xf32> to vector<8x384xf32>
    %314 = arith.negf %313 : vector<8x384xf32>
    %315 = math.exp %314 : vector<8x384xf32>
    %cst_157 = arith.constant 1.000000e+00 : f32
    %316 = vector.broadcast %cst_157 : f32 to vector<8x384xf32>
    %317 = arith.addf %316, %315 : vector<8x384xf32>
    %318 = arith.divf %316, %317 : vector<8x384xf32>
    %319 = vector.extract_strided_slice %318 {offsets = [0, 0], sizes = [8, 128], strides = [1, 1]} : vector<8x384xf32> to vector<8x128xf32>
    %320 = vector.extract_strided_slice %318 {offsets = [0, 128], sizes = [8, 128], strides = [1, 1]} : vector<8x384xf32> to vector<8x128xf32>
    %321 = vector.extract_strided_slice %318 {offsets = [0, 256], sizes = [8, 128], strides = [1, 1]} : vector<8x384xf32> to vector<8x128xf32>
    %322 = vector.extract_strided_slice %312 {offsets = [0, 384], sizes = [8, 128], strides = [1, 1]} : vector<8x512xf32> to vector<8x128xf32>
    %323 = math.tanh %322 : vector<8x128xf32>
    %324 = arith.mulf %320, %303 : vector<8x128xf32>
    %325 = arith.mulf %319, %323 : vector<8x128xf32>
    %326 = arith.addf %324, %325 : vector<8x128xf32>
    %327 = math.tanh %326 : vector<8x128xf32>
    %328 = arith.mulf %321, %327 : vector<8x128xf32>
    %c4_158 = arith.constant 4 : index
    %c0_159 = arith.constant 0 : index
    %c0_160 = arith.constant 0 : index
    %329 = vector.load %arg7[%c4_158, %c0_159, %c0_160] : memref<8x8x512xf32, #tpu.memory_space<vmem>>, vector<1x8x512xf32>
    %330 = vector.shape_cast %329 : vector<1x8x512xf32> to vector<8x512xf32>
    %331 = arith.truncf %328 : vector<8x128xf32> to vector<8x128xbf16>
    %c0_161 = arith.constant 0 : index
    %c1_162 = arith.constant 1 : index
    %c0_163 = arith.constant 0 : index
    %c0_164 = arith.constant 0 : index
    %332 = vector.load %arg3[%c0_161, %c1_162, %c0_163, %c0_164] : memref<1x2x128x512xbf16, #tpu.memory_space<vmem>>, vector<1x1x128x512xbf16>
    %333 = vector.shape_cast %332 : vector<1x1x128x512xbf16> to vector<128x512xbf16>
    %cst_165 = arith.constant dense<0.000000e+00> : vector<8x512xf32>
    %334 = tpu.matmul %331, %333, %cst_165 {dimension_numbers = #tpu.dot_dimension_numbers<[1], [0], [0], [1], [0, 0, 1, 1], [], []>} : vector<8x128xbf16>, vector<128x512xbf16>, vector<8x512xf32> -> vector<8x512xf32>
    %335 = arith.addf %330, %334 : vector<8x512xf32>
    %336 = vector.extract_strided_slice %335 {offsets = [0, 0], sizes = [8, 384], strides = [1, 1]} : vector<8x512xf32> to vector<8x384xf32>
    %337 = arith.negf %336 : vector<8x384xf32>
    %338 = math.exp %337 : vector<8x384xf32>
    %cst_166 = arith.constant 1.000000e+00 : f32
    %339 = vector.broadcast %cst_166 : f32 to vector<8x384xf32>
    %340 = arith.addf %339, %338 : vector<8x384xf32>
    %341 = arith.divf %339, %340 : vector<8x384xf32>
    %342 = vector.extract_strided_slice %341 {offsets = [0, 0], sizes = [8, 128], strides = [1, 1]} : vector<8x384xf32> to vector<8x128xf32>
    %343 = vector.extract_strided_slice %341 {offsets = [0, 128], sizes = [8, 128], strides = [1, 1]} : vector<8x384xf32> to vector<8x128xf32>
    %344 = vector.extract_strided_slice %341 {offsets = [0, 256], sizes = [8, 128], strides = [1, 1]} : vector<8x384xf32> to vector<8x128xf32>
    %345 = vector.extract_strided_slice %335 {offsets = [0, 384], sizes = [8, 128], strides = [1, 1]} : vector<8x512xf32> to vector<8x128xf32>
    %346 = math.tanh %345 : vector<8x128xf32>
    %347 = arith.mulf %343, %326 : vector<8x128xf32>
    %348 = arith.mulf %342, %346 : vector<8x128xf32>
    %349 = arith.addf %347, %348 : vector<8x128xf32>
    %350 = math.tanh %349 : vector<8x128xf32>
    %351 = arith.mulf %344, %350 : vector<8x128xf32>
    %c5_167 = arith.constant 5 : index
    %c0_168 = arith.constant 0 : index
    %c0_169 = arith.constant 0 : index
    %352 = vector.load %arg7[%c5_167, %c0_168, %c0_169] : memref<8x8x512xf32, #tpu.memory_space<vmem>>, vector<1x8x512xf32>
    %353 = vector.shape_cast %352 : vector<1x8x512xf32> to vector<8x512xf32>
    %354 = arith.truncf %351 : vector<8x128xf32> to vector<8x128xbf16>
    %c0_170 = arith.constant 0 : index
    %c1_171 = arith.constant 1 : index
    %c0_172 = arith.constant 0 : index
    %c0_173 = arith.constant 0 : index
    %355 = vector.load %arg3[%c0_170, %c1_171, %c0_172, %c0_173] : memref<1x2x128x512xbf16, #tpu.memory_space<vmem>>, vector<1x1x128x512xbf16>
    %356 = vector.shape_cast %355 : vector<1x1x128x512xbf16> to vector<128x512xbf16>
    %cst_174 = arith.constant dense<0.000000e+00> : vector<8x512xf32>
    %357 = tpu.matmul %354, %356, %cst_174 {dimension_numbers = #tpu.dot_dimension_numbers<[1], [0], [0], [1], [0, 0, 1, 1], [], []>} : vector<8x128xbf16>, vector<128x512xbf16>, vector<8x512xf32> -> vector<8x512xf32>
    %358 = arith.addf %353, %357 : vector<8x512xf32>
    %359 = vector.extract_strided_slice %358 {offsets = [0, 0], sizes = [8, 384], strides = [1, 1]} : vector<8x512xf32> to vector<8x384xf32>
    %360 = arith.negf %359 : vector<8x384xf32>
    %361 = math.exp %360 : vector<8x384xf32>
    %cst_175 = arith.constant 1.000000e+00 : f32
    %362 = vector.broadcast %cst_175 : f32 to vector<8x384xf32>
    %363 = arith.addf %362, %361 : vector<8x384xf32>
    %364 = arith.divf %362, %363 : vector<8x384xf32>
    %365 = vector.extract_strided_slice %364 {offsets = [0, 0], sizes = [8, 128], strides = [1, 1]} : vector<8x384xf32> to vector<8x128xf32>
    %366 = vector.extract_strided_slice %364 {offsets = [0, 128], sizes = [8, 128], strides = [1, 1]} : vector<8x384xf32> to vector<8x128xf32>
    %367 = vector.extract_strided_slice %364 {offsets = [0, 256], sizes = [8, 128], strides = [1, 1]} : vector<8x384xf32> to vector<8x128xf32>
    %368 = vector.extract_strided_slice %358 {offsets = [0, 384], sizes = [8, 128], strides = [1, 1]} : vector<8x512xf32> to vector<8x128xf32>
    %369 = math.tanh %368 : vector<8x128xf32>
    %370 = arith.mulf %366, %349 : vector<8x128xf32>
    %371 = arith.mulf %365, %369 : vector<8x128xf32>
    %372 = arith.addf %370, %371 : vector<8x128xf32>
    %373 = math.tanh %372 : vector<8x128xf32>
    %374 = arith.mulf %367, %373 : vector<8x128xf32>
    %c6_176 = arith.constant 6 : index
    %c0_177 = arith.constant 0 : index
    %c0_178 = arith.constant 0 : index
    %375 = vector.load %arg7[%c6_176, %c0_177, %c0_178] : memref<8x8x512xf32, #tpu.memory_space<vmem>>, vector<1x8x512xf32>
    %376 = vector.shape_cast %375 : vector<1x8x512xf32> to vector<8x512xf32>
    %377 = arith.truncf %374 : vector<8x128xf32> to vector<8x128xbf16>
    %c0_179 = arith.constant 0 : index
    %c1_180 = arith.constant 1 : index
    %c0_181 = arith.constant 0 : index
    %c0_182 = arith.constant 0 : index
    %378 = vector.load %arg3[%c0_179, %c1_180, %c0_181, %c0_182] : memref<1x2x128x512xbf16, #tpu.memory_space<vmem>>, vector<1x1x128x512xbf16>
    %379 = vector.shape_cast %378 : vector<1x1x128x512xbf16> to vector<128x512xbf16>
    %cst_183 = arith.constant dense<0.000000e+00> : vector<8x512xf32>
    %380 = tpu.matmul %377, %379, %cst_183 {dimension_numbers = #tpu.dot_dimension_numbers<[1], [0], [0], [1], [0, 0, 1, 1], [], []>} : vector<8x128xbf16>, vector<128x512xbf16>, vector<8x512xf32> -> vector<8x512xf32>
    %381 = arith.addf %376, %380 : vector<8x512xf32>
    %382 = vector.extract_strided_slice %381 {offsets = [0, 0], sizes = [8, 384], strides = [1, 1]} : vector<8x512xf32> to vector<8x384xf32>
    %383 = arith.negf %382 : vector<8x384xf32>
    %384 = math.exp %383 : vector<8x384xf32>
    %cst_184 = arith.constant 1.000000e+00 : f32
    %385 = vector.broadcast %cst_184 : f32 to vector<8x384xf32>
    %386 = arith.addf %385, %384 : vector<8x384xf32>
    %387 = arith.divf %385, %386 : vector<8x384xf32>
    %388 = vector.extract_strided_slice %387 {offsets = [0, 0], sizes = [8, 128], strides = [1, 1]} : vector<8x384xf32> to vector<8x128xf32>
    %389 = vector.extract_strided_slice %387 {offsets = [0, 128], sizes = [8, 128], strides = [1, 1]} : vector<8x384xf32> to vector<8x128xf32>
    %390 = vector.extract_strided_slice %387 {offsets = [0, 256], sizes = [8, 128], strides = [1, 1]} : vector<8x384xf32> to vector<8x128xf32>
    %391 = vector.extract_strided_slice %381 {offsets = [0, 384], sizes = [8, 128], strides = [1, 1]} : vector<8x512xf32> to vector<8x128xf32>
    %392 = math.tanh %391 : vector<8x128xf32>
    %393 = arith.mulf %389, %372 : vector<8x128xf32>
    %394 = arith.mulf %388, %392 : vector<8x128xf32>
    %395 = arith.addf %393, %394 : vector<8x128xf32>
    %396 = math.tanh %395 : vector<8x128xf32>
    %397 = arith.mulf %390, %396 : vector<8x128xf32>
    %c7_185 = arith.constant 7 : index
    %c0_186 = arith.constant 0 : index
    %c0_187 = arith.constant 0 : index
    %398 = vector.load %arg7[%c7_185, %c0_186, %c0_187] : memref<8x8x512xf32, #tpu.memory_space<vmem>>, vector<1x8x512xf32>
    %399 = vector.shape_cast %398 : vector<1x8x512xf32> to vector<8x512xf32>
    %400 = arith.truncf %397 : vector<8x128xf32> to vector<8x128xbf16>
    %c0_188 = arith.constant 0 : index
    %c1_189 = arith.constant 1 : index
    %c0_190 = arith.constant 0 : index
    %c0_191 = arith.constant 0 : index
    %401 = vector.load %arg3[%c0_188, %c1_189, %c0_190, %c0_191] : memref<1x2x128x512xbf16, #tpu.memory_space<vmem>>, vector<1x1x128x512xbf16>
    %402 = vector.shape_cast %401 : vector<1x1x128x512xbf16> to vector<128x512xbf16>
    %cst_192 = arith.constant dense<0.000000e+00> : vector<8x512xf32>
    %403 = tpu.matmul %400, %402, %cst_192 {dimension_numbers = #tpu.dot_dimension_numbers<[1], [0], [0], [1], [0, 0, 1, 1], [], []>} : vector<8x128xbf16>, vector<128x512xbf16>, vector<8x512xf32> -> vector<8x512xf32>
    %404 = arith.addf %399, %403 : vector<8x512xf32>
    %405 = vector.extract_strided_slice %404 {offsets = [0, 0], sizes = [8, 384], strides = [1, 1]} : vector<8x512xf32> to vector<8x384xf32>
    %406 = arith.negf %405 : vector<8x384xf32>
    %407 = math.exp %406 : vector<8x384xf32>
    %cst_193 = arith.constant 1.000000e+00 : f32
    %408 = vector.broadcast %cst_193 : f32 to vector<8x384xf32>
    %409 = arith.addf %408, %407 : vector<8x384xf32>
    %410 = arith.divf %408, %409 : vector<8x384xf32>
    %411 = vector.extract_strided_slice %410 {offsets = [0, 0], sizes = [8, 128], strides = [1, 1]} : vector<8x384xf32> to vector<8x128xf32>
    %412 = vector.extract_strided_slice %410 {offsets = [0, 128], sizes = [8, 128], strides = [1, 1]} : vector<8x384xf32> to vector<8x128xf32>
    %413 = vector.extract_strided_slice %410 {offsets = [0, 256], sizes = [8, 128], strides = [1, 1]} : vector<8x384xf32> to vector<8x128xf32>
    %414 = vector.extract_strided_slice %404 {offsets = [0, 384], sizes = [8, 128], strides = [1, 1]} : vector<8x512xf32> to vector<8x128xf32>
    %415 = math.tanh %414 : vector<8x128xf32>
    %416 = arith.mulf %412, %395 : vector<8x128xf32>
    %417 = arith.mulf %411, %415 : vector<8x128xf32>
    %418 = arith.addf %416, %417 : vector<8x128xf32>
    %419 = math.tanh %418 : vector<8x128xf32>
    %420 = arith.mulf %413, %419 : vector<8x128xf32>
    %c0_194 = arith.constant 0 : index
    %c0_195 = arith.constant 0 : index
    %c0_196 = arith.constant 0 : index
    %421 = vector.load %arg5[%c0_194, %c0_195, %c0_196] : memref<1x8x128xf32, #tpu.memory_space<vmem>>, vector<1x8x128xf32>
    %422 = vector.shape_cast %421 : vector<1x8x128xf32> to vector<8x128xf32>
    %423 = vector.shape_cast %420 : vector<8x128xf32> to vector<1x8x128xf32>
    tpu.vector_store %arg5[%c0_194, %c0_195, %c0_196], %423 {strides = array<i32>} : memref<1x8x128xf32, #tpu.memory_space<vmem>>, vector<1x8x128xf32>,
    return
  }
  func.func @transform_0(%arg0: i32) -> (i32, i32, i32, i32) {
    %c0_i32 = arith.constant 0 : i32
    %c0_i32_0 = arith.constant 0 : i32
    %c0_i32_1 = arith.constant 0 : i32
    %c0_i32_2 = arith.constant 0 : i32
    return %arg0, %c0_i32, %c0_i32_0, %c0_i32_1 : i32, i32, i32, i32
  }
  func.func @transform_1(%arg0: i32) -> (i32, i32, i32, i32) {
    %c0_i32 = arith.constant 0 : i32
    %c0_i32_0 = arith.constant 0 : i32
    %c0_i32_1 = arith.constant 0 : i32
    %c0_i32_2 = arith.constant 0 : i32
    return %arg0, %c0_i32, %c0_i32_0, %c0_i32_1 : i32, i32, i32, i32
  }
  func.func @transform_2(%arg0: i32) -> (i32, i32, i32, i32) {
    %c0_i32 = arith.constant 0 : i32
    %c0_i32_0 = arith.constant 0 : i32
    %c0_i32_1 = arith.constant 0 : i32
    %c0_i32_2 = arith.constant 0 : i32
    return %arg0, %c0_i32, %c0_i32_0, %c0_i32_1 : i32, i32, i32, i32
  }
  func.func @transform_3(%arg0: i32) -> (i32, i32, i32, i32) {
    %c0_i32 = arith.constant 0 : i32
    %c0_i32_0 = arith.constant 0 : i32
    %c0_i32_1 = arith.constant 0 : i32
    %c0_i32_2 = arith.constant 0 : i32
    return %arg0, %c0_i32, %c0_i32_0, %c0_i32_1 : i32, i32, i32, i32
  }
  func.func @transform_4(%arg0: i32) -> (i32, i32, i32) {
    %c0_i32 = arith.constant 0 : i32
    %c0_i32_0 = arith.constant 0 : i32
    %c0_i32_1 = arith.constant 0 : i32
    return %arg0, %c0_i32, %c0_i32_0 : i32, i32, i32
  }
}

</mosaic_0001>

<bundles_post_ra>
// kernel: tpu_custom_call.1
= control target key start
LH: loop header
LB: loop body
LE: loop exit
PB: predicated region body
PF: predicated region fallthrough
CT: control target
= control target key end

     0   :  { %s7842_s0 = inlined_call_operand.hbm [shape: f32[3,8,8,128], index: 0, kind: input, shape index: {}]   ;;  %s7843_s1 = inlined_call_operand.hbm [shape: bf16[3,2,128,512], index: 1, kind: input, shape index: {}]   ;;  %s7844_s2 = inlined_call_operand.hbm [shape: bf16[3,2,128,512], index: 2, kind: input, shape index: {}]   ;;  %s7845_s3 = inlined_call_operand.hbm [shape: f32[3,2,1,512], index: 3, kind: input, shape index: {}]   ;;  %s7846_s4 = inlined_call_operand.hbm [shape: f32[3,8,128], index: 4, kind: output, shape index: {}]  }
   0x1   :  { %7860 = sst [smem:[#allocation40_spill]] %s7843_s1 }
   0x2   :  { %9 = vsyncpa [#allocation5], 0 }
   0x3   :  { %11 = vsyncpa [#allocation5 + $0x1], 0 }
   0x4   :  { %12 = vsyncpa [#allocation8], 0 }
   0x5   :  { %14 = vsyncpa [#allocation8 + $0x1], 0 }
   0x6   :  { %15 = vsyncpa [#allocation11], 0 }
   0x7   :  { %17 = vsyncpa [#allocation11 + $0x1], 0 }
   0x8   :  { %18 = vsyncpa [#allocation6], 0 }
   0x9   :  { %20 = vsyncpa [#allocation6 + $0x1], 0  ;;  %s6197_s15 = smov 0   ;;  %s6199_s16 = smov 0  }
   0xa   :  { %s6201_s17 = smov 0   ;;  %s6203_s18 = smov 0  }
   0xb LB: > { %7861 = sst [smem:[#allocation17_spill]] %s6154_s17  ;;  %s6218_s19 = sadd.s32 4294967295, %s6158_s18   ;;  %s6158_s18 = sphi %s6203_s18, %s7967_s18   ;;  %s6154_s17 = sphi %s6201_s17, %s7964_s17   ;;  %s6150_s16 = sphi %s6199_s16, %s7966_s16   ;;  %s6146_s15 = sphi %s6197_s15, %s7965_s15  }
   0xc   : > { %s4884_s20 = sadd.s32 4294967294, %s6158_s18   ;;  %s6222_s21 = sadd.s32 1, %s6158_s18  }
   0xd   : > { %s33_s22 = sadd.s32 1, %s6154_s17  ;;  %s30_s23 = ssub.s32 %s6158_s18, %s6222_s21 }
   0xe   : > { %p40_p0 = scmp.ne.s32.totalorder %s6154_s17, %s6150_s16  ;;  %p31_p1 = scmp.eq.s32.totalorder %s30_s23, 0 }
   0xf   : > { %p41_p2 = scmp.eq.s32.totalorder %s6158_s18, 0  ;;  %p46_p3 = scmp.ne.s32.totalorder %s6150_s16, %s6146_s15 }
  0x10   : > { %p47_p4 = scmp.eq.s32.totalorder %s6218_s19, 0  ;;  %p148_p7 = scmp.eq.s32.totalorder %s6218_s19, 2 }
  0x11   : > { %s6234_s24 = scalar_select %p31_p1, %s6154_s17, %s33_s22  }
  0x12   : > { %p42_p5 = por %p41_p2, %p40_p0  ;;  %p6236_p6 = por %p47_p4, %p46_p3 }
  0x13   : > { %7862 = sst [smem:[#allocation18_spill]] %s6234_s24  ;;  %p154_p8 = scmp.eq.s32.totalorder %s4884_s20, 2 }
  0x14   : > { %s7863_s25 = scalar_select %p6236_p6, 1, 0 }
  0x15   : > { %p5405_p9 = scmp.lt.s32.totalorder %s6158_s18, 3  ;;  %p6242_p10 = por %p148_p7, %p40_p0 }
  0x16   : > { %p6246_p11 = por %p154_p8, %p46_p3  ;;  %s6251_s28 = sand.u32 1, %s6154_s17  }
  0x17   : > { %s7864_s26 = scalar_select %p6242_p10, 1, 0 }
  0x18   : > { %s7865_s27 = scalar_select %p6246_p11, 1, 0 }
  0x19   : > { %p6253_p12 = pnand %p5405_p9, %p42_p5  ;;  %s195_s30 = sand.u32 1, %s6158_s18  }
  0x1a   : > { %s4890_s5 = sshll.u32 %s6251_s28, 9  ;;  %s5375_s6 = sshll.u32 %s6158_s18, 13 }
  0x1b   : > { %s7867_s1 = sld [smem:[#allocation40_spill]]  ;;  %s199_s10 = scalar_lea.vmem [#allocation7], %s4890_s5 }
  0x1c   : > { %s206_s11 = sshll.u32 %s199_s10, 4  ;;  %s6271_s12 = scalar_lea.sflag [#allocation8], %s195_s30  ;;  %s6269_s11 = int_to_ptr.vmem [resolvable:$true] %s206_s11 }
  0x1d   : > { %p6277_p0 = pneg %p6253_p12 }
  0x21   : > { %s6265_s9 = scalar_lea.hbm %s7867_s1, %s5375_s6  ;;  %s5979_s23 = scalar_lea.hbm %s7867_s1, 24576 }
  0x22   : > { %s5974_s13 = scalar_lea.hbm %s6265_s9, 8192  ;;  %p5980_p3 = scmp.lt.s32.totalorder %s6265_s9, %s7867_s1 }
  0x23   : > { %p5975_p13 = scmp.ne.s32.totalorder %s6265_s9, %s5974_s13  ;;  %p5981_p4 = scmp.lt.s32.totalorder %s5979_s23, %s5974_s13 }
  0x25   : > { %p5977_p1 = pnand %p6277_p0, %p5975_p13  ;;  %p5982_p5 = por %p5981_p4, %p5980_p3 }
  0x27   : > { %p5978_p2 = pneg %p5977_p1 }
  0x29   : > { %p5983_p7 = pnand %p5982_p5, %p5978_p2 }
  0x2b   : > { %5986 = shalt.err (!%p5983_p7)
}
  0x2c   : > { %s5987_s30 = scalar_lea.vmem %s6269_s11, 8192  ;;  %s6160_s10 = smov [#allocation7]  }
  0x2d   : > { %p5988_p8 = scmp.ne.s32.totalorder %s6269_s11, %s5987_s30  ;;  %s5992_s20 = sshll.u32 %s6160_s10, 4  ;;  %s5993_s20 = int_to_ptr.vmem [resolvable:$false] %s5992_s20 }
  0x2e   : > { %s5994_s22 = scalar_lea.vmem %s5993_s20, 16384  ;;  %p5995_p1 = scmp.lt.s32.totalorder %s6269_s11, %s5993_s20 }
  0x2f   : > { %p5990_p9 = pnand %p5988_p8, %p6277_p0  ;;  %p5996_p11 = scmp.lt.s32.totalorder %s5994_s22, %s5987_s30 }
  0x31   : > { %p5991_p13 = pneg %p5990_p9  ;;  %p5997_p10 = por %p5996_p11, %p5995_p1 }
  0x33   : > { %p5998_p6 = pnand %p5997_p10, %p5991_p13 }
  0x35   : > { %6001 = shalt.err (!%p5998_p6)
}
  0x36   : > { %s7849_s13 = smov 256   ;;  %s7850_s23 = smov 16  }
  0x37   : > { %5394 = dma.hbm_to_vmem [thread:$0]  (!%p6253_p12), %s6265_s9, 8192, %s6269_s11, %s6271_s12, %s7849_s13, %s7849_s13, %s7850_s23  }
  0x38   : > { %s6308_s30 = scalar_lea.hbm %s7844_s2, %s5375_s6  ;;  %s220_s10 = scalar_lea.vmem [#allocation9], %s4890_s5 }
  0x39   : > { %s227_s20 = sshll.u32 %s220_s10, 4  ;;  %p4899_p6 = scmp.ge.s32.totalorder %s6158_s18, 1  ;;  %s6312_s20 = int_to_ptr.vmem [resolvable:$true] %s227_s20 }
  0x3a   : > { %p256_p10 = scmp.lt.s32.totalorder %s6158_s18, 4  ;;  %s4887_s22 = sshll.u32 %s6251_s28, 6 }
  0x3b   : > { %s5374_s1 = sshll.u32 %s6158_s18, 10  ;;  %s178_s5 = scalar_lea.vmem [#allocation4], %s4887_s22 }
  0x3c   : > { %p6318_p11 = pnand %p4899_p6, %p256_p10  ;;  %s6325_s7 = scalar_lea.hbm %s7842_s0, %s5374_s1 }
  0x3d   : > { %s185_s6 = sshll.u32 %s178_s5, 4  ;;  %s175_s8 = scalar_lea.sflag [#allocation5], %s6251_s28  ;;  %s6327_s6 = int_to_ptr.vmem [resolvable:$true] %s185_s6 }
  0x3e   : > { %s7869_s24 = scalar_select %p6318_p11, 1, 0 }
  0x3f   : > { %s6002_s10 = scalar_lea.hbm %s6325_s7, 1024  ;;  %s6007_s17 = scalar_lea.hbm %s7842_s0, 3072 }
  0x40   : > { %p6003_p2 = scmp.ne.s32.totalorder %s6325_s7, %s6002_s10  ;;  %p6008_p5 = scmp.lt.s32.totalorder %s6325_s7, %s7842_s0 }
  0x41   : > { %p6009_p7 = scmp.lt.s32.totalorder %s6007_s17, %s6002_s10 }
  0x42   : > { %p6005_p3 = pnand %p6003_p2, %p6277_p0 }
  0x43   : > { %p6010_p8 = por %p6009_p7, %p6008_p5 }
  0x44   : > { %p6006_p4 = pneg %p6005_p3 }
  0x46   : > { %p6011_p9 = pnand %p6010_p8, %p6006_p4 }
  0x48   : > { %6014 = shalt.err (!%p6011_p9)
}
  0x49   : > { %s6015_s22 = scalar_lea.vmem %s6327_s6, 1024  ;;  %s6163_s11 = smov [#allocation4]  }
  0x4a   : > { %p6016_p13 = scmp.ne.s32.totalorder %s6327_s6, %s6015_s22  ;;  %s6020_s13 = sshll.u32 %s6163_s11, 4  ;;  %s6021_s13 = int_to_ptr.vmem [resolvable:$false] %s6020_s13 }
  0x4b   : > { %s6022_s23 = scalar_lea.vmem %s6021_s13, 2048  ;;  %p6023_p10 = scmp.lt.s32.totalorder %s6327_s6, %s6021_s13 }
  0x4c   : > { %p6018_p1 = pnand %p6016_p13, %p6277_p0  ;;  %p6024_p2 = scmp.lt.s32.totalorder %s6022_s23, %s6015_s22 }
  0x4e   : > { %p6019_p6 = pneg %p6018_p1  ;;  %p6025_p3 = por %p6024_p2, %p6023_p10 }
  0x50   : > { %p6026_p11 = pnand %p6025_p3, %p6019_p6 }
  0x52   : > { %6029 = shalt.err (!%p6026_p11)
}
  0x53   : > { %s6164_s17 = smov 128   ;;  %s6165_s5 = smov 8  }
  0x54   : > { %5391 = dma.hbm_to_vmem [thread:$0]  (!%p6253_p12), %s6325_s7, 1024, %s6327_s6, %s175_s8, %s6164_s17, %s6164_s17, %s6165_s5  }
  0x55   : > { %s6030_s10 = scalar_lea.hbm %s6308_s30, 8192  ;;  %s6035_s22 = scalar_lea.hbm %s7844_s2, 24576 }
  0x56   : > { %p6031_p4 = scmp.ne.s32.totalorder %s6308_s30, %s6030_s10  ;;  %p6036_p11 = scmp.lt.s32.totalorder %s6308_s30, %s7844_s2 }
  0x57   : > { %p6037_p8 = scmp.lt.s32.totalorder %s6035_s22, %s6030_s10 }
  0x58   : > { %p6033_p5 = pnand %p6031_p4, %p6277_p0 }
  0x59   : > { %p6038_p9 = por %p6037_p8, %p6036_p11 }
  0x5a   : > { %p6034_p7 = pneg %p6033_p5 }
  0x5c   : > { %p6039_p13 = pnand %p6038_p9, %p6034_p7 }
  0x5e   : > { %6042 = shalt.err (!%p6039_p13)
}
  0x5f   : > { %s6043_s7 = scalar_lea.vmem %s6312_s20, 8192  ;;  %s6166_s6 = smov [#allocation9]  }
  0x60   : > { %p6044_p1 = scmp.ne.s32.totalorder %s6312_s20, %s6043_s7  ;;  %s6048_s8 = sshll.u32 %s6166_s6, 4  ;;  %s6049_s8 = int_to_ptr.vmem [resolvable:$false] %s6048_s8 }
  0x61   : > { %s6050_s23 = scalar_lea.vmem %s6049_s8, 16384  ;;  %p6051_p2 = scmp.lt.s32.totalorder %s6312_s20, %s6049_s8 }
  0x62   : > { %p6046_p6 = pnand %p6044_p1, %p6277_p0  ;;  %p6052_p3 = scmp.lt.s32.totalorder %s6050_s23, %s6043_s7 }
  0x64   : > { %p6047_p10 = pneg %p6046_p6  ;;  %p6053_p4 = por %p6052_p3, %p6051_p2 }
  0x66   : > { %p6054_p5 = pnand %p6053_p4, %p6047_p10 }
  0x68   : > { %6057 = shalt.err (!%p6054_p5)
}
  0x69   : > { %s7870_s17 = smov 16   ;;  %s7871_s5 = smov 256  }
  0x6a   : > { %5397 = dma.hbm_to_vmem [thread:$0]  (!%p6253_p12), %s6308_s30, 8192, %s6312_s20, %s6271_s12, %s7871_s5, %s7871_s5, %s7870_s17  }
  0x6b   : > { %s4896_s10 = sshll.u32 %s6251_s28, 3  ;;  %s5377_s9 = sshll.u32 %s6158_s18, 7 }
  0x6c   : > { %s6381_s11 = scalar_lea.hbm %s7845_s3, %s5377_s9  ;;  %s241_s13 = scalar_lea.vmem [#allocation10], %s4896_s10 }
  0x6d   : > { %s248_s7 = sshll.u32 %s241_s13, 4  ;;  %s238_s6 = scalar_lea.sflag [#allocation11], %s6251_s28  ;;  %s6383_s7 = int_to_ptr.vmem [resolvable:$true] %s248_s7 }
  0x6e   : > { %s6058_s8 = scalar_lea.hbm %s6381_s11, 128  ;;  %s6063_s20 = scalar_lea.hbm %s7845_s3, 384 }
  0x6f   : > { %p6059_p7 = scmp.ne.s32.totalorder %s6381_s11, %s6058_s8  ;;  %p6064_p9 = scmp.lt.s32.totalorder %s6381_s11, %s7845_s3 }
  0x70   : > { %p6065_p13 = scmp.lt.s32.totalorder %s6063_s20, %s6058_s8 }
  0x71   : > { %p6061_p11 = pnand %p6059_p7, %p6277_p0 }
  0x72   : > { %p6066_p1 = por %p6065_p13, %p6064_p9 }
  0x73   : > { %p6062_p8 = pneg %p6061_p11 }
  0x75   : > { %p6067_p6 = pnand %p6066_p1, %p6062_p8 }
  0x77   : > { %6070 = shalt.err (!%p6067_p6)
}
  0x78   : > { %s6071_s5 = scalar_lea.vmem %s6383_s7, 128  ;;  %s6167_s10 = smov [#allocation10]  }
  0x79   : > { %p6072_p10 = scmp.ne.s32.totalorder %s6383_s7, %s6071_s5  ;;  %s6076_s9 = sshll.u32 %s6167_s10, 4  ;;  %s6077_s9 = int_to_ptr.vmem [resolvable:$false] %s6076_s9 }
  0x7a   : > { %s6078_s1 = scalar_lea.vmem %s6077_s9, 256  ;;  %p6079_p4 = scmp.lt.s32.totalorder %s6383_s7, %s6077_s9 }
  0x7b   : > { %p6074_p2 = pnand %p6072_p10, %p6277_p0  ;;  %p6080_p5 = scmp.lt.s32.totalorder %s6078_s1, %s6071_s5 }
  0x7d   : > { %p6075_p3 = pneg %p6074_p2  ;;  %p6081_p7 = por %p6080_p5, %p6079_p4 }
  0x7f   : > { %p6082_p11 = pnand %p6081_p7, %p6075_p3 }
  0x81   : > { %6085 = shalt.err (!%p6082_p11)
}
  0x82   : > { %s6168_s22 = smov 64   ;;  %s6169_s13 = smov 4  }
  0x83   : > { %5400 = dma.hbm_to_vmem [thread:$0]  (!%p6253_p12), %s6381_s11, 128, %s6383_s7, %s238_s6, %s6168_s22, %s6168_s22, %s6169_s13  }
  0x84   : > { %p7872_p0 = scmp.ne.s32.totalorder %s7869_s24, 0 }
  0x86   : > { %260 = sbr.rel (%p7872_p0) target bundleno = 4250 (0x109a), region = 36 }
  0x8b   : > { %s6411_s14 = sand.u32 1, %s6150_s16   ;;  %p7873_p8 = scmp.ne.s32.totalorder %s7863_s25, 0 }
  0x8c   : > { %s4900_s8 = sshll.u32 %s6411_s14, 6  ;;  %s263_s12 = scalar_lea.sflag [#allocation5], %s6411_s14 }
  0x8d   : > { %s6415_s30 = scalar_lea.vmem [#allocation4], %s4900_s8 }
  0x8e   : > { %6129 = dma.done.wait (%p7873_p8), %s263_s12, 1024  }
  0x8f   : > { %6131 = vsyncadd (%p7873_p8), %s263_s12, 4294966272  ;;  %s271_s24 = sand.u32 1, %s6218_s19   ;;  %s4901_s28 = sshll.u32 %s6411_s14, 9 }
  0x90   : > { %s272_s29 = scalar_lea.sflag [#allocation8], %s271_s24  ;;  %s6423_s11 = scalar_lea.vmem [#allocation7], %s4901_s28 }
  0x91   : > { %6133 = dma.done.wait (%p7873_p8), %s272_s29, 16384  }
  0x92   : > { %6135 = vsyncadd (%p7873_p8), %s272_s29, 4294950912  ;;  %s4903_s7 = sshll.u32 %s6411_s14, 3  ;;  %s6430_s6 = scalar_lea.vmem [#allocation9], %s4901_s28 }
  0x93   : > { %s290_s20 = scalar_lea.sflag [#allocation11], %s6411_s14  ;;  %s6435_s23 = scalar_lea.vmem [#allocation10], %s4903_s7 }
  0x94   : > { %6137 = dma.done.wait (%p7873_p8), %s290_s20, 128  }
  0x95   : > { %6139 = vsyncadd (%p7873_p8), %s290_s20, 4294967168  ;;  %v7856_v0 = vmov 0   ;;  %v5446_v1 = vld [vmem:[%s6423_s11 + $0xe4] ss:$16 sps:$4 sm:$0xff]   ;;  %v5448_v2 = vld [vmem:[%s6423_s11 + $0xec] ss:$16 sps:$4 sm:$0xff]  }
  0x96   : > { %592 = vmatprep.mubr.bf16.mxu0 %v7856_v0  ;;  %665 = vmatprep.mubr.bf16.mxu1 %v7856_v0  ;;  %v5450_v3 = vld [vmem:[%s6423_s11 + $0xe0] ss:$16 sps:$4 sm:$0xff]   ;;  %v5451_v4 = vld [vmem:[%s6423_s11 + $0xe8] ss:$16 sps:$4 sm:$0xff]   ;;  %v5452_v5 = vld [vmem:[%s6423_s11 + $0xc4] ss:$16 sps:$4 sm:$0xff]  }
  0x97   : > { %560 = vmatprep.subr.bf16.mxu0 %v5446_v1  ;;  %633 = vmatprep.subr.bf16.mxu1 %v5448_v2  ;;  %v5454_v6 = vld [vmem:[%s6423_s11 + $0xcc] ss:$16 sps:$4 sm:$0xff]   ;;  %v5456_v7 = vld [vmem:[%s6423_s11 + $0xc0] ss:$16 sps:$4 sm:$0xff]   ;;  %v5457_v8 = vld [vmem:[%s6423_s11 + $0xc8] ss:$16 sps:$4 sm:$0xff]  }
  0x98   : > { %561 = vmatpush1.bf16.msra.mxu0 %v5450_v3  ;;  %634 = vmatpush1.bf16.msra.mxu1 %v5451_v4  ;;  %v5458_v9 = vld [vmem:[%s6423_s11 + $0xa4] ss:$16 sps:$4 sm:$0xff]   ;;  %v5460_v10 = vld [vmem:[%s6423_s11 + $0xac] ss:$16 sps:$4 sm:$0xff]   ;;  %v5462_v11 = vld [vmem:[%s6423_s11 + $0xa0] ss:$16 sps:$4 sm:$0xff]  }
  0x99   : > { %562 = vmatprep.subr.bf16.mxu0 %v5452_v5  ;;  %635 = vmatprep.subr.bf16.mxu1 %v5454_v6  ;;  %v5463_v12 = vld [vmem:[%s6423_s11 + $0xa8] ss:$16 sps:$4 sm:$0xff]   ;;  %v5464_v13 = vld [vmem:[%s6423_s11 + $0x84] ss:$16 sps:$4 sm:$0xff]   ;;  %v5466_v14 = vld [vmem:[%s6423_s11 + $0x8c] ss:$16 sps:$4 sm:$0xff]  }
  0x9a   : > { %v5468_v15 = vld [vmem:[%s6423_s11 + $0x80] ss:$16 sps:$4 sm:$0xff]   ;;  %v5469_v16 = vld [vmem:[%s6423_s11 + $0x88] ss:$16 sps:$4 sm:$0xff]   ;;  %v5470_v17 = vld [vmem:[%s6423_s11 + $0x64] ss:$16 sps:$4 sm:$0xff]  }
  0x9b   : > { %v5472_v18 = vld [vmem:[%s6423_s11 + $0x6c] ss:$16 sps:$4 sm:$0xff]   ;;  %v5474_v19 = vld [vmem:[%s6423_s11 + $0x60] ss:$16 sps:$4 sm:$0xff]   ;;  %v5475_v20 = vld [vmem:[%s6423_s11 + $0x68] ss:$16 sps:$4 sm:$0xff]  }
  0x9c   : > { %563 = vmatpush1.bf16.msra.mxu0 %v5456_v7  ;;  %636 = vmatpush1.bf16.msra.mxu1 %v5457_v8  ;;  %v5476_v21 = vld [vmem:[%s6423_s11 + $0x44] ss:$16 sps:$4 sm:$0xff]   ;;  %v5478_v22 = vld [vmem:[%s6423_s11 + $0x4c] ss:$16 sps:$4 sm:$0xff]   ;;  %v5480_v23 = vld [vmem:[%s6423_s11 + $0x40] ss:$16 sps:$4 sm:$0xff]  }
  0x9d   : > { %564 = vmatprep.subr.bf16.mxu0 %v5458_v9  ;;  %637 = vmatprep.subr.bf16.mxu1 %v5460_v10  ;;  %v5481_v24 = vld [vmem:[%s6423_s11 + $0x48] ss:$16 sps:$4 sm:$0xff]   ;;  %v5482_v25 = vld [vmem:[%s6423_s11 + $0x24] ss:$16 sps:$4 sm:$0xff]   ;;  %v5484_v26 = vld [vmem:[%s6423_s11 + $0x2c] ss:$16 sps:$4 sm:$0xff]  }
  0x9e   : > { %v5486_v27 = vld [vmem:[%s6423_s11 + $0x20] ss:$16 sps:$4 sm:$0xff]   ;;  %v5487_v28 = vld [vmem:[%s6423_s11 + $0x28] ss:$16 sps:$4 sm:$0xff]   ;;  %v5488_v29 = vld [vmem:[%s6423_s11 + $0x4] ss:$16 sps:$4 sm:$0xff]  }
  0x9f   : > { %v5490_v30 = vld [vmem:[%s6423_s11 + $0xc] ss:$16 sps:$4 sm:$0xff]   ;;  %v5492_v31 = vld [vmem:[%s6423_s11] ss:$16 sps:$4 sm:$0xff]   ;;  %v5493_v32 = vld [vmem:[%s6423_s11 + $0x8] ss:$16 sps:$4 sm:$0xff]  }
  0xa0   : > { %565 = vmatpush1.bf16.msra.mxu0 %v5462_v11  ;;  %638 = vmatpush1.bf16.msra.mxu1 %v5463_v12  ;;  %v334_v33 = vld [vmem:[%s6415_s30] sm:$0xff]  ;;  %v335_v34 = vld [vmem:[%s6415_s30 + $0x8] sm:$0xff]  ;;  %v336_v44 = vld [vmem:[%s6415_s30 + $0x10] sm:$0xff]  ;;  %s5371_s25 = sshll.u32 %s6218_s19, 7  ;;  %s332_s17 = scalar_lea.vmem [#allocation12], %s4903_s7 }
  0xa1   : > { %566 = vmatprep.subr.bf16.mxu0 %v5464_v13  ;;  %639 = vmatprep.subr.bf16.mxu1 %v5466_v14  ;;  %v6478_v35 = vld [vmem:[%s6430_s6 + $0xe4] ss:$16 sps:$4 sm:$0xff]   ;;  %v6481_v36 = vld [vmem:[%s6430_s6 + $0xec] ss:$16 sps:$4 sm:$0xff]   ;;  %v342_v37 = vpack.c.bf16 %v335_v34, %v334_v33  ;;  %v6484_v38 = vld [vmem:[%s6430_s6 + $0xe0] ss:$16 sps:$4 sm:$0xff]   ;;  %v380_v14 = vlaneseq  ;;  %s4746_s1 = scalar_lea.hbm %s7846_s4, %s5371_s25 }
  0xa2   : > { %v6487_v39 = vld [vmem:[%s6430_s6 + $0xe8] ss:$16 sps:$4 sm:$0xff]   ;;  %v6492_v40 = vld [vmem:[%s6430_s6 + $0xc4] ss:$16 sps:$4 sm:$0xff]   ;;  %v6495_v41 = vld [vmem:[%s6430_s6 + $0xcc] ss:$16 sps:$4 sm:$0xff]  }
  0xa3   : > { %v6498_v42 = vld [vmem:[%s6430_s6 + $0xc0] ss:$16 sps:$4 sm:$0xff]   ;;  %v6501_v43 = vld [vmem:[%s6430_s6 + $0xc8] ss:$16 sps:$4 sm:$0xff]   ;;  %v6510_v46 = vld [vmem:[%s6430_s6 + $0xa4] ss:$16 sps:$4 sm:$0xff]  }
  0xa4   : > { %567 = vmatpush1.bf16.msra.mxu0 %v5468_v15  ;;  %640 = vmatpush1.bf16.msra.mxu1 %v5469_v16  ;;  %v337_v45 = vld [vmem:[%s6415_s30 + $0x18] sm:$0xff]  ;;  %v6518_v49 = vld [vmem:[%s6430_s6 + $0xa0] ss:$16 sps:$4 sm:$0xff]   ;;  %v6526_v51 = vld [vmem:[%s6430_s6 + $0x84] ss:$16 sps:$4 sm:$0xff]   ;;  %v6657_v15 = vshrl.u32 %v380_v14, 7 }
  0xa5   : > { %568 = vmatprep.subr.bf16.mxu0 %v5470_v17  ;;  %641 = vmatprep.subr.bf16.mxu1 %v5472_v18  ;;  %v6513_v47 = vld [vmem:[%s6430_s6 + $0xac] ss:$16 sps:$4 sm:$0xff]   ;;  %v343_v48 = vpack.c.bf16 %v337_v45, %v336_v44  ;;  %v6521_v50 = vld [vmem:[%s6430_s6 + $0xa8] ss:$16 sps:$4 sm:$0xff]   ;;  %v6534_v53 = vld [vmem:[%s6430_s6 + $0x80] ss:$16 sps:$4 sm:$0xff]  }
  0xa6   : > { %v6531_v52 = vld [vmem:[%s6430_s6 + $0x8c] ss:$16 sps:$4 sm:$0xff]   ;;  %v6537_v54 = vld [vmem:[%s6430_s6 + $0x88] ss:$16 sps:$4 sm:$0xff]   ;;  %v338_v55 = vld [vmem:[%s6415_s30 + $0x20] sm:$0xff]  ;;  %7874 = vst [vmem:[#allocation19_spill] sm:$0xff] %v6657_v15 }
  0xa7   : > { %v339_v56 = vld [vmem:[%s6415_s30 + $0x28] sm:$0xff]  ;;  %v6546_v57 = vld [vmem:[%s6430_s6 + $0x64] ss:$16 sps:$4 sm:$0xff]   ;;  %v6554_v59 = vld [vmem:[%s6430_s6 + $0x60] ss:$16 sps:$4 sm:$0xff]   ;;  %v7853_v16 = vsub.s32 2, %v6657_v15 }
  0xa8   : > { %569 = vmatpush1.bf16.msra.mxu0 %v5474_v19  ;;  %642 = vmatpush1.bf16.msra.mxu1 %v5475_v20  ;;  %v6549_v58 = vld [vmem:[%s6430_s6 + $0x6c] ss:$16 sps:$4 sm:$0xff]   ;;  %v6557_v60 = vld [vmem:[%s6430_s6 + $0x68] ss:$16 sps:$4 sm:$0xff]   ;;  %v344_v61 = vpack.c.bf16 %v339_v56, %v338_v55  ;;  %v6560_v62 = vld [vmem:[%s6430_s6 + $0x44] ss:$16 sps:$4 sm:$0xff]  }
  0xa9   : > { %570 = vmatprep.subr.bf16.mxu0 %v5476_v21  ;;  %643 = vmatprep.subr.bf16.mxu1 %v5478_v22  ;;  %v6563_v63 = vld [vmem:[%s6430_s6 + $0x4c] ss:$16 sps:$4 sm:$0xff]   ;;  %v6570_v1 = vld [vmem:[%s6430_s6 + $0x40] ss:$16 sps:$4 sm:$0xff]   ;;  %v6573_v2 = vld [vmem:[%s6430_s6 + $0x48] ss:$16 sps:$4 sm:$0xff]  }
  0xaa   : > { %v340_v3 = vld [vmem:[%s6415_s30 + $0x30] sm:$0xff]  ;;  %v341_v4 = vld [vmem:[%s6415_s30 + $0x38] sm:$0xff]  ;;  %v7855_v17 = vsub.s32 0, %v6657_v15  ;;  %v7852_v18 = vsub.s32 3, %v6657_v15  ;;  %v378_v19 = vld [vmem:[%s6435_s23] sm:$0xf] }
  0xab   : > { %v6578_v5 = vld [vmem:[%s6430_s6 + $0x24] ss:$16 sps:$4 sm:$0xff]   ;;  %v6581_v6 = vld [vmem:[%s6430_s6 + $0x2c] ss:$16 sps:$4 sm:$0xff]   ;;  %v6590_v7 = vld [vmem:[%s6430_s6 + $0x20] ss:$16 sps:$4 sm:$0xff]   ;;  %v345_v9 = vpack.c.bf16 %v341_v4, %v340_v3  ;;  %v6669_v22 = vrot.slane %v378_v19, %v7853_v16 }
  0xac   : > { %571 = vmatpush1.bf16.msra.mxu0 %v5480_v23  ;;  %644 = vmatpush1.bf16.msra.mxu1 %v5481_v24  ;;  %v6593_v8 = vld [vmem:[%s6430_s6 + $0x28] ss:$16 sps:$4 sm:$0xff]   ;;  %v6596_v10 = vld [vmem:[%s6430_s6 + $0x4] ss:$16 sps:$4 sm:$0xff]   ;;  %v6599_v11 = vld [vmem:[%s6430_s6 + $0xc] ss:$16 sps:$4 sm:$0xff]  }
  0xad   : > { %572 = vmatprep.subr.bf16.mxu0 %v5482_v25  ;;  %645 = vmatprep.subr.bf16.mxu1 %v5484_v26  ;;  %v6606_v12 = vld [vmem:[%s6430_s6] ss:$16 sps:$4 sm:$0xff]   ;;  %v6609_v13 = vld [vmem:[%s6430_s6 + $0x8] ss:$16 sps:$4 sm:$0xff]   ;;  %v7854_v23 = vsub.s32 1, %v6657_v15  ;;  %v383_v26 = vrot.slane %v378_v19, %v7855_v17  ;;  %s4748_s5 = sshll.u32 %s332_s17, 4  ;;  %s4749_s5 = int_to_ptr.vmem [resolvable:$true] %s4748_s5 }
  0xae   : > { %s4735_s22 = scalar_lea.sflag [#allocation6], %s6411_s14  ;;  %s6086_s13 = scalar_lea.vmem %s4749_s5, 128 }
  0xaf   : > { %p6087_p12 = scmp.ne.s32.totalorder %s4749_s5, %s6086_s13  ;;  %p7961_p9 = scmp.ne.s32.totalorder %s7864_s26, 0 }
  0xb0   : > { %573 = vmatpush1.bf16.msra.mxu0 %v5486_v27  ;;  %646 = vmatpush1.bf16.msra.mxu1 %v5487_v28  ;;  %v6680_v27 = vrot.slane %v378_v19, %v7852_v18  ;;  %s6171_s8 = smov [#allocation12]  }
  0xb1   : > { %574 = vmatprep.subr.bf16.mxu0 %v5488_v29  ;;  %647 = vmatprep.subr.bf16.mxu1 %v5490_v30  ;;  %v387_v30 = vrot.slane %v378_v19, %v7854_v23  ;;  %p6088_p13 = pnand %p6087_p12, %p7961_p9  ;;  %s6090_s19 = sshll.u32 %s6171_s8, 4  ;;  %s6091_s19 = int_to_ptr.vmem [resolvable:$false] %s6090_s19 }
  0xb2   : > { %s6092_s12 = scalar_lea.vmem %s6091_s19, 256  ;;  %p6093_p6 = scmp.lt.s32.totalorder %s4749_s5, %s6091_s19 }
  0xb3   : > { %p6089_p1 = pneg %p6088_p13  ;;  %p6094_p10 = scmp.lt.s32.totalorder %s6092_s12, %s6086_s13 }
  0xb4   : > { %575 = vmatpush1.bf16.msra.mxu0 %v5492_v31  ;;  %648 = vmatpush1.bf16.msra.mxu1 %v5493_v32 }
  0xb5   : > { %934 = vmatprep.subr.bf16.mxu0 %v6478_v35  ;;  %975 = vmatprep.subr.bf16.mxu1 %v6481_v36  ;;  %p6095_p2 = por %p6094_p10, %p6093_p6 }
  0xb7   : > { %593 = vmatmul.mubr.bf16.vlgmr.msra.gmra.mxu0 %v342_v37  ;;  %666 = vmatmul.mubr.bf16.vlgmr.msra.gmra.mxu1 %v342_v37  ;;  %p6096_p3 = pnand %p6095_p2, %p6089_p1 }
  0xb8   : > { %935 = vmatpush1.bf16.msra.mxu0 %v6484_v38  ;;  %976 = vmatpush1.bf16.msra.mxu1 %v6487_v39 }
  0xb9   : > { %936 = vmatprep.subr.bf16.mxu0 %v6492_v40  ;;  %977 = vmatprep.subr.bf16.mxu1 %v6495_v41 }
  0xba   : > { %602 = vmatprep.mubr.bf16.mxu0 %v7856_v0  ;;  %675 = vmatprep.mubr.bf16.mxu1 %v7856_v0 }
  0xbc   : > { %937 = vmatpush1.bf16.msra.mxu0 %v6498_v42  ;;  %978 = vmatpush1.bf16.msra.mxu1 %v6501_v43 }
  0xbd   : > { %938 = vmatprep.subr.bf16.mxu0 %v6510_v46  ;;  %979 = vmatprep.subr.bf16.mxu1 %v6513_v47 }
  0xbf   : > { %603 = vmatmul.mubr.bf16.gmra.mxu0 %v343_v48  ;;  %676 = vmatmul.mubr.bf16.gmra.mxu1 %v343_v48 }
  0xc0   : > { %939 = vmatpush1.bf16.msra.mxu0 %v6518_v49  ;;  %980 = vmatpush1.bf16.msra.mxu1 %v6521_v50 }
  0xc1   : > { %940 = vmatprep.subr.bf16.mxu0 %v6526_v51  ;;  %981 = vmatprep.subr.bf16.mxu1 %v6531_v52 }
  0xc2   : > { %612 = vmatprep.mubr.bf16.mxu0 %v7856_v0  ;;  %685 = vmatprep.mubr.bf16.mxu1 %v7856_v0 }
  0xc4   : > { %941 = vmatpush1.bf16.msra.mxu0 %v6534_v53  ;;  %982 = vmatpush1.bf16.msra.mxu1 %v6537_v54 }
  0xc5   : > { %942 = vmatprep.subr.bf16.mxu0 %v6546_v57  ;;  %983 = vmatprep.subr.bf16.mxu1 %v6549_v58 }
  0xc7   : > { %613 = vmatmul.mubr.bf16.gmra.mxu0 %v344_v61  ;;  %686 = vmatmul.mubr.bf16.gmra.mxu1 %v344_v61 }
  0xc8   : > { %943 = vmatpush1.bf16.msra.mxu0 %v6554_v59  ;;  %984 = vmatpush1.bf16.msra.mxu1 %v6557_v60 }
  0xc9   : > { %944 = vmatprep.subr.bf16.mxu0 %v6560_v62  ;;  %985 = vmatprep.subr.bf16.mxu1 %v6563_v63 }
  0xca   : > { %622 = vmatprep.mubr.bf16.mxu0 %v7856_v0  ;;  %695 = vmatprep.mubr.bf16.mxu1 %v7856_v0 }
  0xcc   : > { %945 = vmatpush1.bf16.msra.mxu0 %v6570_v1  ;;  %986 = vmatpush1.bf16.msra.mxu1 %v6573_v2 }
  0xcd   : > { %946 = vmatprep.subr.bf16.mxu0 %v6578_v5  ;;  %987 = vmatprep.subr.bf16.mxu1 %v6581_v6 }
  0xcf   : > { %623 = vmatmul.mubr.bf16.gmra.mxu0 %v345_v9  ;;  %696 = vmatmul.mubr.bf16.gmra.mxu1 %v345_v9 }
  0xd0   : > { %947 = vmatpush1.bf16.msra.mxu0 %v6590_v7  ;;  %988 = vmatpush1.bf16.msra.mxu1 %v6593_v8 }
  0xd1   : > { %948 = vmatprep.subr.bf16.mxu0 %v6596_v10  ;;  %989 = vmatprep.subr.bf16.mxu1 %v6599_v11 }
  0xd2   : > { %966 = vmatprep.mubr.bf16.mxu0 %v7856_v0  ;;  %1007 = vmatprep.mubr.bf16.mxu1 %v7856_v0 }
  0xd4   : > { %949 = vmatpush1.bf16.msra.mxu0 %v6606_v12  ;;  %990 = vmatpush1.bf16.msra.mxu1 %v6609_v13 }
  0xd5   : > { %1243 = vmatprep.subr.bf16.mxu0 %v6478_v35  ;;  %1284 = vmatprep.subr.bf16.mxu1 %v6481_v36 }
  0xd7   : > { %967 = vmatmul.mubr.bf16.vlgmr.msra.gmra.mxu0 %v7856_v0  ;;  %1008 = vmatmul.mubr.bf16.vlgmr.msra.gmra.mxu1 %v7856_v0 }
  0xd8   : > { %1244 = vmatpush1.bf16.msra.mxu0 %v6484_v38  ;;  %1285 = vmatpush1.bf16.msra.mxu1 %v6487_v39 }
  0xd9   : > { %1245 = vmatprep.subr.bf16.mxu0 %v6492_v40  ;;  %1286 = vmatprep.subr.bf16.mxu1 %v6495_v41 }
  0xda   : > { %1275 = vmatprep.mubr.bf16.mxu0 %v7856_v0  ;;  %1316 = vmatprep.mubr.bf16.mxu1 %v7856_v0 }
  0xdc   : > { %1246 = vmatpush1.bf16.msra.mxu0 %v6498_v42  ;;  %1287 = vmatpush1.bf16.msra.mxu1 %v6501_v43 }
  0xdd   : > { %1247 = vmatprep.subr.bf16.mxu0 %v6510_v46  ;;  %1288 = vmatprep.subr.bf16.mxu1 %v6513_v47 }
  0xe0   : > { %1248 = vmatpush1.bf16.msra.mxu0 %v6518_v49  ;;  %1289 = vmatpush1.bf16.msra.mxu1 %v6521_v50 }
  0xe1   : > { %1249 = vmatprep.subr.bf16.mxu0 %v6526_v51  ;;  %1290 = vmatprep.subr.bf16.mxu1 %v6531_v52 }
  0xe4   : > { %1250 = vmatpush1.bf16.msra.mxu0 %v6534_v53  ;;  %1291 = vmatpush1.bf16.msra.mxu1 %v6537_v54 }
  0xe5   : > { %1251 = vmatprep.subr.bf16.mxu0 %v6546_v57  ;;  %1292 = vmatprep.subr.bf16.mxu1 %v6549_v58 }
  0xe8   : > { %1252 = vmatpush1.bf16.msra.mxu0 %v6554_v59  ;;  %1293 = vmatpush1.bf16.msra.mxu1 %v6557_v60 }
  0xe9   : > { %1253 = vmatprep.subr.bf16.mxu0 %v6560_v62  ;;  %1294 = vmatprep.subr.bf16.mxu1 %v6563_v63 }
  0xec   : > { %1254 = vmatpush1.bf16.msra.mxu0 %v6570_v1  ;;  %1295 = vmatpush1.bf16.msra.mxu1 %v6573_v2 }
  0xed   : > { %1255 = vmatprep.subr.bf16.mxu0 %v6578_v5  ;;  %1296 = vmatprep.subr.bf16.mxu1 %v6581_v6 }
  0xf0   : > { %1256 = vmatpush1.bf16.msra.mxu0 %v6590_v7  ;;  %1297 = vmatpush1.bf16.msra.mxu1 %v6593_v8 }
  0xf1   : > { %1257 = vmatprep.subr.bf16.mxu0 %v6596_v10  ;;  %1298 = vmatprep.subr.bf16.mxu1 %v6599_v11 }
  0xf4   : > { %1258 = vmatpush1.bf16.msra.mxu0 %v6606_v12  ;;  %1299 = vmatpush1.bf16.msra.mxu1 %v6609_v13 }
  0xf5   : > { %1553 = vmatprep.subr.bf16.mxu0 %v6478_v35  ;;  %1594 = vmatprep.subr.bf16.mxu1 %v6481_v36 }
 0x177   : > { %v6663_v20 = vpop.f32.mrf.mxu0  ;;  %v6665_v21 = vpop.f32.mrf.mxu1 }
 0x179   : > { %v6672_v24 = vpop.f32.mrf.mxu0  ;;  %v6674_v25 = vpop.f32.mrf.mxu1 }
 0x17b   : > { %v598_v28 = vpop.f32.mrf.mxu0  ;;  %v671_v29 = vpop.f32.mrf.mxu1 }
 0x17c   : > { %v6684_v31 = vadd.f32 %v598_v28, %v383_v26  ;;  %v6687_v32 = vadd.f32 %v671_v29, %v6669_v22 }
 0x17d   : > { %v600_v33 = vpop.f32.mrf.mxu0  ;;  %v673_v34 = vpop.f32.mrf.mxu1 }
 0x17e   : > { %v6689_v37 = vadd.f32 %v600_v33, %v387_v30  ;;  %v6692_v44 = vadd.f32 %v673_v34, %v6680_v27 }
 0x17f   : > { %v604_v45 = vpop.f32.mrf.mxu0  ;;  %v677_v48 = vpop.f32.mrf.mxu1 }
 0x180   : > { %v6694_v55 = vadd.f32 %v604_v45, %v383_v26  ;;  %v6697_v56 = vadd.f32 %v677_v48, %v6669_v22 }
 0x181   : > { %v606_v61 = vpop.f32.mrf.mxu0  ;;  %v679_v3 = vpop.f32.mrf.mxu1 }
 0x182   : > { %v6699_v4 = vadd.f32 %v606_v61, %v387_v30  ;;  %v6702_v9 = vadd.f32 %v679_v3, %v6680_v27 }
 0x183   : > { %v608_v14 = vpop.f32.mrf.mxu0  ;;  %v681_v19 = vpop.f32.mrf.mxu1 }
 0x184   : > { %7875 = vst [vmem:[#allocation20_spill] sm:$0xff] %v6702_v9  ;;  %v6704_v28 = vadd.f32 %v608_v14, %v383_v26  ;;  %v6707_v29 = vadd.f32 %v681_v19, %v6669_v22 }
 0x185   : > { %v610_v33 = vpop.f32.mrf.mxu0  ;;  %v683_v34 = vpop.f32.mrf.mxu1 }
 0x186   : > { %7876 = vst [vmem:[#allocation21_spill] sm:$0xff] %v6704_v28  ;;  %7877 = vst [vmem:[#allocation22_spill] sm:$0xff] %v6707_v29  ;;  %v6709_v45 = vadd.f32 %v610_v33, %v387_v30  ;;  %v6712_v48 = vadd.f32 %v683_v34, %v6680_v27 }
 0x187   : > { %v614_v18 = vpop.f32.mrf.mxu0  ;;  %v687_v61 = vpop.f32.mrf.mxu1 }
 0x188   : > { %7878 = vst [vmem:[#allocation23_spill] sm:$0xff] %v6709_v45  ;;  %7879 = vst [vmem:[#allocation24_spill] sm:$0xff] %v6712_v48  ;;  %v6714_v16 = vadd.f32 %v614_v18, %v383_v26  ;;  %v6717_v3 = vadd.f32 %v687_v61, %v6669_v22 }
 0x189   : > { %v616_v23 = vpop.f32.mrf.mxu0  ;;  %v689_v14 = vpop.f32.mrf.mxu1 }
 0x18a   : > { %7880 = vst [vmem:[#allocation25_spill] sm:$0xff] %v6714_v16  ;;  %7881 = vst [vmem:[#allocation26_spill] sm:$0xff] %v6717_v3  ;;  %v6719_v17 = vadd.f32 %v616_v23, %v387_v30  ;;  %v6722_v19 = vadd.f32 %v689_v14, %v6680_v27 }
 0x18b   : > { %v618_v0 = vpop.f32.mrf.mxu0  ;;  %v691_v33 = vpop.f32.mrf.mxu1 }
 0x18c   : > { %7882 = vst [vmem:[#allocation27_spill] sm:$0xff] %v6719_v17  ;;  %7883 = vst [vmem:[#allocation28_spill] sm:$0xff] %v6722_v19  ;;  %v6724_v15 = vadd.f32 %v618_v0, %v383_v26  ;;  %v6727_v34 = vadd.f32 %v691_v33, %v6669_v22 }
 0x18d   : > { %v620_v48 = vpop.f32.mrf.mxu0  ;;  %v693_v18 = vpop.f32.mrf.mxu1 }
 0x18e   : > { %7884 = vst [vmem:[#allocation29_spill] sm:$0xff] %v6724_v15  ;;  %7885 = vst [vmem:[#allocation30_spill] sm:$0xff] %v6727_v34  ;;  %v6729_v16 = vadd.f32 %v620_v48, %v387_v30  ;;  %v6732_v61 = vadd.f32 %v693_v18, %v6680_v27 }
 0x18f   : > { %v624_v3 = vpop.f32.mrf.mxu0  ;;  %v697_v23 = vpop.f32.mrf.mxu1 }
 0x190   : > { %7886 = vst [vmem:[#allocation31_spill] sm:$0xff] %v6729_v16  ;;  %7887 = vst [vmem:[#allocation32_spill] sm:$0xff] %v6732_v61  ;;  %v6734_v17 = vadd.f32 %v624_v3, %v383_v26  ;;  %v6737_v14 = vadd.f32 %v697_v23, %v6669_v22 }
 0x191   : > { %v626_v19 = vpop.f32.mrf.mxu0  ;;  %v699_v0 = vpop.f32.mrf.mxu1 }
 0x192   : > { %7888 = vst [vmem:[#allocation33_spill] sm:$0xff] %v6734_v17  ;;  %7889 = vst [vmem:[#allocation34_spill] sm:$0xff] %v6737_v14  ;;  %v6739_v15 = vadd.f32 %v626_v19, %v387_v30  ;;  %v6742_v33 = vadd.f32 %v699_v0, %v6680_v27  ;;  %v595_v17 = vadd.f32 %v6663_v20, %v383_v26 }
 0x193   : > { %v628_v34 = vpop.f32.mrf.mxu0  ;;  %v701_v48 = vpop.f32.mrf.mxu1  ;;  %v597_v0 = vadd.f32 %v6672_v24, %v387_v30 }
 0x194   : > { %7890 = vst [vmem:[#allocation35_spill] sm:$0xff] %v6739_v15  ;;  %7891 = vst [vmem:[#allocation36_spill] sm:$0xff] %v6742_v33  ;;  %v6744_v16 = vadd.f32 %v628_v34, %v383_v26  ;;  %v6747_v18 = vadd.f32 %v701_v48, %v6669_v22  ;;  %v668_v26 = vadd.f32 %v6665_v21, %v6669_v22 }
 0x195   : > { %v630_v61 = vpop.f32.mrf.mxu0  ;;  %v703_v3 = vpop.f32.mrf.mxu1 }
 0x196   : > { %7892 = vst [vmem:[#allocation37_spill] sm:$0xff] %v6744_v16  ;;  %7893 = vst [vmem:[#allocation38_spill] sm:$0xff] %v6747_v18  ;;  %v6750_v23 = vadd.f32 %v630_v61, %v387_v30  ;;  %v6753_v14 = vadd.f32 %v703_v3, %v6680_v27  ;;  %v670_v3 = vadd.f32 %v6674_v25, %v6680_v27 }
 0x197   : > { %v968_v19 = vpop.f32.mrf.mxu0  ;;  %v1009_v15 = vpop.f32.mrf.mxu1 }
 0x198   : > { %v1016_v33 = vadd.f32 %v968_v19, %v595_v17  ;;  %v1018_v61 = vadd.f32 %v1009_v15, %v668_v26 }
 0x199   : > { %v970_v29 = vpop.f32.mrf.mxu0  ;;  %v1011_v34 = vpop.f32.mrf.mxu1 }
 0x19a   : > { %v4969_v16 = vmul.f32 -1.442695, %v1016_v33  ;;  %v1017_v45 = vadd.f32 %v970_v29, %v597_v0  ;;  %v4971_v24 = vmul.f32 -1.442695, %v1018_v61  ;;  %v1019_v30 = vadd.f32 %v1011_v34, %v670_v3 }
 0x19b   : > { %v972_v48 = vpop.f32.mrf.mxu0  ;;  %v1013_v18 = vpop.f32.mrf.mxu1 }
 0x19c   : > { %5686 = vpow2.f32 %v4969_v16  ;;  %v4970_v28 = vmul.f32 -1.442695, %v1017_v45  ;;  %v7894_v48 = vmov 0  }
 0x19d   : > { %v973_v9 = vpop.f32.mrf.mxu0  ;;  %v1014_v20 = vpop.f32.mrf.mxu1 }
 0x19e   : > { %5688 = vpow2.f32 %v4970_v28 }
 0x19f   : > { %5690 = vpow2.f32 %v4971_v24 }
 0x1a9   : > { %v5687_v17 = vpop.eup %5686 }
 0x1aa   : > { %v1029_v19 = vadd.f32 1.0, %v5687_v17 }
 0x1ab   : > { %v5689_v33 = vpop.eup %5688 }
 0x1ac   : > { %5692 = vrcp.f32 %v1029_v19  ;;  %v1030_v29 = vadd.f32 1.0, %v5689_v33  ;;  %v5691_v16 = vpop.eup %5690 }
 0x1ad   : > { %5694 = vtanh.f32 %v1019_v30  ;;  %v1031_v18 = vadd.f32 1.0, %v5691_v16 }
 0x1ae   : > { %5696 = vrcp.f32 %v1030_v29 }
 0x1af   : > { %5698 = vrcp.f32 %v1031_v18 }
 0x1b9   : > { %v5693_v9 = vpop.eup %5692 }
 0x1ba   : > { %v5695_v28 = vpop.eup %5694 }
 0x1bb   : > { %v5697_v45 = vpop.eup %5696  ;;  %v1040_v15 = vmul.f32 %v5695_v28, %v5693_v9 }
 0x1bc   : > { %v1039_v21 = vmul.f32 0.0, %v5697_v45  ;;  %v5699_v25 = vpop.eup %5698 }
 0x1be   : > { %v6760_v22 = vadd.f32 %v1040_v15, %v1039_v21 }
 0x1c0   : > { %5700 = vtanh.f32 %v6760_v22 }
 0x1cd   : > { %v5701_v27 = vpop.eup %5700 }
 0x1ce   : > { %v6763_v0 = vmul.f32 %v5701_v27, %v5699_v25 }
 0x1d0   : > { %v1050_v34 = vpack.c.bf16 %v6763_v0, %v6763_v0 }
 0x1d2   : > { %1276 = vmatmul.mubr.bf16.vlgmr.msra.gmra.mxu0 %v1050_v34  ;;  %1317 = vmatmul.mubr.bf16.vlgmr.msra.gmra.mxu1 %v1050_v34 }
 0x1d3   : > { %1554 = vmatpush1.bf16.msra.mxu0 %v6484_v38  ;;  %1595 = vmatpush1.bf16.msra.mxu1 %v6487_v39 }
 0x1d4   : > { %1555 = vmatprep.subr.bf16.mxu0 %v6492_v40  ;;  %1596 = vmatprep.subr.bf16.mxu1 %v6495_v41 }
 0x1d5   : > { %1585 = vmatprep.mubr.bf16.mxu0 %v7894_v48  ;;  %1626 = vmatprep.mubr.bf16.mxu1 %v7894_v48 }
 0x1d7   : > { %1556 = vmatpush1.bf16.msra.mxu0 %v6498_v42  ;;  %1597 = vmatpush1.bf16.msra.mxu1 %v6501_v43 }
 0x1d8   : > { %1557 = vmatprep.subr.bf16.mxu0 %v6510_v46  ;;  %1598 = vmatprep.subr.bf16.mxu1 %v6513_v47 }
 0x1db   : > { %1558 = vmatpush1.bf16.msra.mxu0 %v6518_v49  ;;  %1599 = vmatpush1.bf16.msra.mxu1 %v6521_v50 }
 0x1dc   : > { %1559 = vmatprep.subr.bf16.mxu0 %v6526_v51  ;;  %1600 = vmatprep.subr.bf16.mxu1 %v6531_v52 }
 0x1df   : > { %1560 = vmatpush1.bf16.msra.mxu0 %v6534_v53  ;;  %1601 = vmatpush1.bf16.msra.mxu1 %v6537_v54 }
 0x1e0   : > { %1561 = vmatprep.subr.bf16.mxu0 %v6546_v57  ;;  %1602 = vmatprep.subr.bf16.mxu1 %v6549_v58 }
 0x1e3   : > { %1562 = vmatpush1.bf16.msra.mxu0 %v6554_v59  ;;  %1603 = vmatpush1.bf16.msra.mxu1 %v6557_v60 }
 0x1e4   : > { %1563 = vmatprep.subr.bf16.mxu0 %v6560_v62  ;;  %1604 = vmatprep.subr.bf16.mxu1 %v6563_v63 }
 0x1e7   : > { %1564 = vmatpush1.bf16.msra.mxu0 %v6570_v1  ;;  %1605 = vmatpush1.bf16.msra.mxu1 %v6573_v2 }
 0x1e8   : > { %1565 = vmatprep.subr.bf16.mxu0 %v6578_v5  ;;  %1606 = vmatprep.subr.bf16.mxu1 %v6581_v6 }
 0x1eb   : > { %1566 = vmatpush1.bf16.msra.mxu0 %v6590_v7  ;;  %1607 = vmatpush1.bf16.msra.mxu1 %v6593_v8 }
 0x1ec   : > { %1567 = vmatprep.subr.bf16.mxu0 %v6596_v10  ;;  %1608 = vmatprep.subr.bf16.mxu1 %v6599_v11 }
 0x1ef   : > { %1568 = vmatpush1.bf16.msra.mxu0 %v6606_v12  ;;  %1609 = vmatpush1.bf16.msra.mxu1 %v6609_v13 }
 0x1f0   : > { %1863 = vmatprep.subr.bf16.mxu0 %v6478_v35  ;;  %1904 = vmatprep.subr.bf16.mxu1 %v6481_v36 }
 0x292   : > { %v1277_v20 = vpop.f32.mrf.mxu0  ;;  %v1318_v26 = vpop.f32.mrf.mxu1 }
 0x293   : > { %v1325_v61 = vadd.f32 %v1277_v20, %v6684_v31  ;;  %v1327_v35 = vadd.f32 %v1318_v26, %v6687_v32 }
 0x294   : > { %v1279_v3 = vpop.f32.mrf.mxu0  ;;  %v1320_v24 = vpop.f32.mrf.mxu1 }
 0x295   : > { %v5004_v17 = vmul.f32 -1.442695, %v1325_v61  ;;  %v1326_v30 = vadd.f32 %v1279_v3, %v6689_v37  ;;  %v5006_v28 = vmul.f32 -1.442695, %v1327_v35  ;;  %v1328_v36 = vadd.f32 %v1320_v24, %v6692_v44  ;;  %v6895_v35 = vld [vmem:[%s6430_s6 + $0xac] ss:$16 sps:$4 sm:$0xff]  }
 0x296   : > { %v1281_v19 = vpop.f32.mrf.mxu0  ;;  %v1322_v33 = vpop.f32.mrf.mxu1 }
 0x297   : > { %5702 = vpow2.f32 %v5004_v17  ;;  %v5005_v29 = vmul.f32 -1.442695, %v1326_v30  ;;  %v6866_v17 = vld [vmem:[%s6430_s6 + $0xe0] ss:$16 sps:$4 sm:$0xff]   ;;  %v6869_v30 = vld [vmem:[%s6430_s6 + $0xe8] ss:$16 sps:$4 sm:$0xff]  }
 0x298   : > { %v1282_v16 = vpop.f32.mrf.mxu0  ;;  %v1323_v9 = vpop.f32.mrf.mxu1  ;;  %v6876_v19 = vld [vmem:[%s6430_s6 + $0xc4] ss:$16 sps:$4 sm:$0xff]   ;;  %v6879_v33 = vld [vmem:[%s6430_s6 + $0xcc] ss:$16 sps:$4 sm:$0xff]  }
 0x299   : > { %5704 = vpow2.f32 %v5005_v29  ;;  %v6882_v29 = vld [vmem:[%s6430_s6 + $0xc0] ss:$16 sps:$4 sm:$0xff]   ;;  %v6885_v16 = vld [vmem:[%s6430_s6 + $0xc8] ss:$16 sps:$4 sm:$0xff]   ;;  %v6892_v9 = vld [vmem:[%s6430_s6 + $0xa4] ss:$16 sps:$4 sm:$0xff]  }
 0x29a   : > { %5706 = vpow2.f32 %v5006_v28  ;;  %v6898_v28 = vld [vmem:[%s6430_s6 + $0xa0] ss:$16 sps:$4 sm:$0xff]  }
 0x29b   : > { %5708 = vtanh.f32 %v1328_v36  ;;  %v6901_v36 = vld [vmem:[%s6430_s6 + $0xa8] ss:$16 sps:$4 sm:$0xff]  }
 0x2a4   : > { %v5703_v45 = vpop.eup %5702 }
 0x2a5   : > { %v1338_v18 = vadd.f32 1.0, %v5703_v45  ;;  %v6908_v45 = vld [vmem:[%s6430_s6 + $0x84] ss:$16 sps:$4 sm:$0xff]  }
 0x2a6   : > { %v5705_v31 = vpop.eup %5704 }
 0x2a7   : > { %5710 = vrcp.f32 %v1338_v18  ;;  %v1339_v21 = vadd.f32 1.0, %v5705_v31  ;;  %v5707_v37 = vpop.eup %5706  ;;  %v6911_v18 = vld [vmem:[%s6430_s6 + $0x8c] ss:$16 sps:$4 sm:$0xff]   ;;  %v6914_v31 = vld [vmem:[%s6430_s6 + $0x80] ss:$16 sps:$4 sm:$0xff]  }
 0x2a8   : > { %v5709_v15 = vpop.eup %5708  ;;  %v1340_v20 = vadd.f32 1.0, %v5707_v37  ;;  %v6922_v37 = vld [vmem:[%s6430_s6 + $0x64] ss:$16 sps:$4 sm:$0xff]  }
 0x2a9   : > { %5712 = vrcp.f32 %v1339_v21  ;;  %v6917_v21 = vld [vmem:[%s6430_s6 + $0x88] ss:$16 sps:$4 sm:$0xff]  }
 0x2aa   : > { %5714 = vrcp.f32 %v1340_v20  ;;  %v6941_v20 = vld [vmem:[%s6430_s6 + $0x4c] ss:$16 sps:$4 sm:$0xff]  }
 0x2b4   : > { %v5711_v25 = vpop.eup %5710 }
 0x2b5   : > { %v1349_v27 = vmul.f32 %v5711_v25, %v5709_v15  ;;  %v6925_v15 = vld [vmem:[%s6430_s6 + $0x6c] ss:$16 sps:$4 sm:$0xff]   ;;  %v6930_v25 = vld [vmem:[%s6430_s6 + $0x60] ss:$16 sps:$4 sm:$0xff]  }
 0x2b6   : > { %v5713_v34 = vpop.eup %5712 }
 0x2b7   : > { %v1348_v61 = vmul.f32 %v5713_v34, %v6760_v22  ;;  %v5715_v44 = vpop.eup %5714  ;;  %v6863_v22 = vld [vmem:[%s6430_s6 + $0xec] ss:$16 sps:$4 sm:$0xff]   ;;  %v6938_v34 = vld [vmem:[%s6430_s6 + $0x44] ss:$16 sps:$4 sm:$0xff]  }
 0x2b9   : > { %v6806_v32 = vadd.f32 %v1349_v27, %v1348_v61  ;;  %v6933_v27 = vld [vmem:[%s6430_s6 + $0x68] ss:$16 sps:$4 sm:$0xff]   ;;  %v6946_v61 = vld [vmem:[%s6430_s6 + $0x40] ss:$16 sps:$4 sm:$0xff]  }
 0x2bb   : > { %5716 = vtanh.f32 %v6806_v32 }
 0x2c8   : > { %v5717_v26 = vpop.eup %5716 }
 0x2c9   : > { %v6809_v3 = vmul.f32 %v5717_v26, %v5715_v44  ;;  %v6954_v44 = vld [vmem:[%s6430_s6 + $0x24] ss:$16 sps:$4 sm:$0xff]   ;;  %v6957_v26 = vld [vmem:[%s6430_s6 + $0x2c] ss:$16 sps:$4 sm:$0xff]  }
 0x2cb   : > { %v1360_v24 = vpack.c.bf16 %v6809_v3, %v6809_v3 }
 0x2cd   : > { %1586 = vmatmul.mubr.bf16.vlgmr.msra.gmra.mxu0 %v1360_v24  ;;  %1627 = vmatmul.mubr.bf16.vlgmr.msra.gmra.mxu1 %v1360_v24  ;;  %v6962_v24 = vld [vmem:[%s6430_s6 + $0x20] ss:$16 sps:$4 sm:$0xff]  }
 0x2ce   : > { %1864 = vmatpush1.bf16.msra.mxu0 %v6484_v38  ;;  %1905 = vmatpush1.bf16.msra.mxu1 %v6487_v39 }
 0x2cf   : > { %1865 = vmatprep.subr.bf16.mxu0 %v6492_v40  ;;  %1906 = vmatprep.subr.bf16.mxu1 %v6495_v41 }
 0x2d0   : > { %1895 = vmatprep.mubr.bf16.mxu0 %v7894_v48  ;;  %1936 = vmatprep.mubr.bf16.mxu1 %v7894_v48 }
 0x2d2   : > { %1866 = vmatpush1.bf16.msra.mxu0 %v6498_v42  ;;  %1907 = vmatpush1.bf16.msra.mxu1 %v6501_v43 }
 0x2d3   : > { %1867 = vmatprep.subr.bf16.mxu0 %v6510_v46  ;;  %1908 = vmatprep.subr.bf16.mxu1 %v6513_v47 }
 0x2d6   : > { %1868 = vmatpush1.bf16.msra.mxu0 %v6518_v49  ;;  %1909 = vmatpush1.bf16.msra.mxu1 %v6521_v50 }
 0x2d7   : > { %1869 = vmatprep.subr.bf16.mxu0 %v6526_v51  ;;  %1910 = vmatprep.subr.bf16.mxu1 %v6531_v52 }
 0x2da   : > { %1870 = vmatpush1.bf16.msra.mxu0 %v6534_v53  ;;  %1911 = vmatpush1.bf16.msra.mxu1 %v6537_v54 }
 0x2db   : > { %1871 = vmatprep.subr.bf16.mxu0 %v6546_v57  ;;  %1912 = vmatprep.subr.bf16.mxu1 %v6549_v58  ;;  %v7895_v57 = vld [vmem:[#allocation20_spill] sm:$0xff] }
 0x2de   : > { %1872 = vmatpush1.bf16.msra.mxu0 %v6554_v59  ;;  %1913 = vmatpush1.bf16.msra.mxu1 %v6557_v60 }
 0x2df   : > { %1873 = vmatprep.subr.bf16.mxu0 %v6560_v62  ;;  %1914 = vmatprep.subr.bf16.mxu1 %v6563_v63 }
 0x2e2   : > { %1874 = vmatpush1.bf16.msra.mxu0 %v6570_v1  ;;  %1915 = vmatpush1.bf16.msra.mxu1 %v6573_v2 }
 0x2e3   : > { %1875 = vmatprep.subr.bf16.mxu0 %v6578_v5  ;;  %1916 = vmatprep.subr.bf16.mxu1 %v6581_v6 }
 0x2e6   : > { %1876 = vmatpush1.bf16.msra.mxu0 %v6590_v7  ;;  %1917 = vmatpush1.bf16.msra.mxu1 %v6593_v8 }
 0x2e7   : > { %1877 = vmatprep.subr.bf16.mxu0 %v6596_v10  ;;  %1918 = vmatprep.subr.bf16.mxu1 %v6599_v11 }
 0x2ea   : > { %1878 = vmatpush1.bf16.msra.mxu0 %v6606_v12  ;;  %1919 = vmatpush1.bf16.msra.mxu1 %v6609_v13 }
 0x2eb   : > { %2214 = vmatprep.subr.bf16.mxu1 %v6863_v22 }
 0x38d   : > { %v1587_v38 = vpop.f32.mrf.mxu0  ;;  %v1628_v39 = vpop.f32.mrf.mxu1 }
 0x38e   : > { %v1635_v40 = vadd.f32 %v1587_v38, %v6694_v55  ;;  %v1637_v53 = vadd.f32 %v1628_v39, %v6697_v56  ;;  %v6965_v38 = vld [vmem:[%s6430_s6 + $0x28] ss:$16 sps:$4 sm:$0xff]   ;;  %v6970_v39 = vld [vmem:[%s6430_s6 + $0x4] ss:$16 sps:$4 sm:$0xff]  }
 0x38f   : > { %v1589_v41 = vpop.f32.mrf.mxu0  ;;  %v1630_v42 = vpop.f32.mrf.mxu1 }
 0x390   : > { %v5039_v43 = vmul.f32 -1.442695, %v1635_v40  ;;  %v1636_v46 = vadd.f32 %v1589_v41, %v6699_v4  ;;  %v5041_v54 = vmul.f32 -1.442695, %v1637_v53  ;;  %v1638_v58 = vadd.f32 %v1630_v42, %v7895_v57  ;;  %v6860_v4 = vld [vmem:[%s6430_s6 + $0xe4] ss:$16 sps:$4 sm:$0xff]  }
 0x391   : > { %v1591_v47 = vpop.f32.mrf.mxu0  ;;  %v1632_v49 = vpop.f32.mrf.mxu1  ;;  %2173 = vmatprep.subr.bf16.mxu0 %v6860_v4  ;;  %v6973_v40 = vld [vmem:[%s6430_s6 + $0xc] ss:$16 sps:$4 sm:$0xff]   ;;  %v6978_v41 = vld [vmem:[%s6430_s6] ss:$16 sps:$4 sm:$0xff]   ;;  %v6981_v42 = vld [vmem:[%s6430_s6 + $0x8] ss:$16 sps:$4 sm:$0xff]  }
 0x392   : > { %5718 = vpow2.f32 %v5039_v43  ;;  %v5040_v50 = vmul.f32 -1.442695, %v1636_v46  ;;  %v7896_v47 = vld [vmem:[#allocation21_spill] sm:$0xff]  ;;  %v7897_v53 = vld [vmem:[#allocation23_spill] sm:$0xff] }
 0x393   : > { %v1592_v51 = vpop.f32.mrf.mxu0  ;;  %v1633_v52 = vpop.f32.mrf.mxu1 }
 0x394   : > { %5720 = vpow2.f32 %v5040_v50 }
 0x395   : > { %5722 = vpow2.f32 %v5041_v54 }
 0x396   : > { %5724 = vtanh.f32 %v1638_v58 }
 0x39f   : > { %v5719_v59 = vpop.eup %5718 }
 0x3a0   : > { %v1648_v60 = vadd.f32 1.0, %v5719_v59 }
 0x3a1   : > { %v5721_v62 = vpop.eup %5720 }
 0x3a2   : > { %5726 = vrcp.f32 %v1648_v60  ;;  %v1649_v63 = vadd.f32 1.0, %v5721_v62  ;;  %v5723_v1 = vpop.eup %5722 }
 0x3a3   : > { %v5725_v2 = vpop.eup %5724  ;;  %v1650_v8 = vadd.f32 1.0, %v5723_v1 }
 0x3a4   : > { %5728 = vrcp.f32 %v1649_v63  ;;  %v7898_v63 = vld [vmem:[#allocation22_spill] sm:$0xff] }
 0x3a5   : > { %5730 = vrcp.f32 %v1650_v8 }
 0x3af   : > { %v5727_v5 = vpop.eup %5726 }
 0x3b0   : > { %v1659_v6 = vmul.f32 %v5727_v5, %v5725_v2  ;;  %v7899_v5 = vld [vmem:[#allocation24_spill] sm:$0xff] }
 0x3b1   : > { %v5729_v7 = vpop.eup %5728 }
 0x3b2   : > { %v1658_v10 = vmul.f32 %v5729_v7, %v6806_v32  ;;  %v5731_v12 = vpop.eup %5730  ;;  %v6949_v32 = vld [vmem:[%s6430_s6 + $0x48] ss:$16 sps:$4 sm:$0xff]  }
 0x3b4   : > { %v6850_v11 = vadd.f32 %v1659_v6, %v1658_v10 }
 0x3b6   : > { %5732 = vtanh.f32 %v6850_v11 }
 0x3c3   : > { %v5733_v13 = vpop.eup %5732 }
 0x3c4   : > { %v6853_v55 = vmul.f32 %v5733_v13, %v5731_v12 }
 0x3c6   : > { %v1670_v56 = vpack.c.bf16 %v6853_v55, %v6853_v55 }
 0x3c8   : > { %1896 = vmatmul.mubr.bf16.vlgmr.msra.gmra.mxu0 %v1670_v56  ;;  %1937 = vmatmul.mubr.bf16.vlgmr.msra.gmra.mxu1 %v1670_v56 }
 0x3c9   : > { %2205 = vmatprep.mubr.bf16.mxu0 %v7894_v48  ;;  %2246 = vmatprep.mubr.bf16.mxu1 %v7894_v48 }
 0x3ca   : > { %2174 = vmatpush1.bf16.msra.mxu0 %v6866_v17  ;;  %2215 = vmatpush1.bf16.msra.mxu1 %v6869_v30 }
 0x3cb   : > { %2175 = vmatprep.subr.bf16.mxu0 %v6876_v19  ;;  %2216 = vmatprep.subr.bf16.mxu1 %v6879_v33 }
 0x3ce   : > { %2176 = vmatpush1.bf16.msra.mxu0 %v6882_v29  ;;  %2217 = vmatpush1.bf16.msra.mxu1 %v6885_v16 }
 0x3cf   : > { %2177 = vmatprep.subr.bf16.mxu0 %v6892_v9  ;;  %2218 = vmatprep.subr.bf16.mxu1 %v6895_v35 }
 0x3d2   : > { %2178 = vmatpush1.bf16.msra.mxu0 %v6898_v28  ;;  %2219 = vmatpush1.bf16.msra.mxu1 %v6901_v36 }
 0x3d3   : > { %2179 = vmatprep.subr.bf16.mxu0 %v6908_v45  ;;  %2220 = vmatprep.subr.bf16.mxu1 %v6911_v18 }
 0x3d6   : > { %2180 = vmatpush1.bf16.msra.mxu0 %v6914_v31  ;;  %2221 = vmatpush1.bf16.msra.mxu1 %v6917_v21 }
 0x3d7   : > { %2181 = vmatprep.subr.bf16.mxu0 %v6922_v37  ;;  %2222 = vmatprep.subr.bf16.mxu1 %v6925_v15 }
 0x3da   : > { %2182 = vmatpush1.bf16.msra.mxu0 %v6930_v25  ;;  %2223 = vmatpush1.bf16.msra.mxu1 %v6933_v27 }
 0x3db   : > { %2183 = vmatprep.subr.bf16.mxu0 %v6938_v34  ;;  %2224 = vmatprep.subr.bf16.mxu1 %v6941_v20 }
 0x3de   : > { %2184 = vmatpush1.bf16.msra.mxu0 %v6946_v61  ;;  %2225 = vmatpush1.bf16.msra.mxu1 %v6949_v32 }
 0x3df   : > { %2185 = vmatprep.subr.bf16.mxu0 %v6954_v44  ;;  %2226 = vmatprep.subr.bf16.mxu1 %v6957_v26 }
 0x3e2   : > { %2186 = vmatpush1.bf16.msra.mxu0 %v6962_v24  ;;  %2227 = vmatpush1.bf16.msra.mxu1 %v6965_v38 }
 0x3e3   : > { %2187 = vmatprep.subr.bf16.mxu0 %v6970_v39  ;;  %2228 = vmatprep.subr.bf16.mxu1 %v6973_v40 }
 0x3e6   : > { %2188 = vmatpush1.bf16.msra.mxu0 %v6978_v41  ;;  %2229 = vmatpush1.bf16.msra.mxu1 %v6981_v42 }
 0x3e7   : > { %2483 = vmatprep.subr.bf16.mxu0 %v6860_v4  ;;  %2524 = vmatprep.subr.bf16.mxu1 %v6863_v22 }
 0x488   : > { %v1897_v43 = vpop.f32.mrf.mxu0  ;;  %v1938_v46 = vpop.f32.mrf.mxu1 }
 0x489   : > { %v1945_v49 = vadd.f32 %v1897_v43, %v7896_v47  ;;  %v1947_v1 = vadd.f32 %v1938_v46, %v7898_v63 }
 0x48a   : > { %v1899_v50 = vpop.f32.mrf.mxu0  ;;  %v1940_v51 = vpop.f32.mrf.mxu1 }
 0x48b   : > { %v5074_v52 = vmul.f32 -1.442695, %v1945_v49  ;;  %v1946_v54 = vadd.f32 %v1899_v50, %v7897_v53  ;;  %v5076_v2 = vmul.f32 -1.442695, %v1947_v1  ;;  %v1948_v6 = vadd.f32 %v1940_v51, %v7899_v5 }
 0x48c   : > { %v1901_v57 = vpop.f32.mrf.mxu0  ;;  %v1942_v58 = vpop.f32.mrf.mxu1 }
 0x48d   : > { %5734 = vpow2.f32 %v5074_v52  ;;  %v5075_v59 = vmul.f32 -1.442695, %v1946_v54 }
 0x48e   : > { %v1902_v60 = vpop.f32.mrf.mxu0  ;;  %v1943_v62 = vpop.f32.mrf.mxu1 }
 0x48f   : > { %5736 = vpow2.f32 %v5075_v59  ;;  %v7900_v59 = vld [vmem:[#allocation25_spill] sm:$0xff] }
 0x490   : > { %5738 = vpow2.f32 %v5076_v2  ;;  %v7901_v2 = vld [vmem:[#allocation27_spill] sm:$0xff] }
 0x491   : > { %5740 = vtanh.f32 %v1948_v6 }
 0x49a   : > { %v5735_v7 = vpop.eup %5734 }
 0x49b   : > { %v1958_v8 = vadd.f32 1.0, %v5735_v7 }
 0x49c   : > { %v5737_v10 = vpop.eup %5736 }
 0x49d   : > { %5742 = vrcp.f32 %v1958_v8  ;;  %v1959_v12 = vadd.f32 1.0, %v5737_v10  ;;  %v5739_v13 = vpop.eup %5738 }
 0x49e   : > { %v5741_v56 = vpop.eup %5740  ;;  %v1960_v50 = vadd.f32 1.0, %v5739_v13  ;;  %v7902_v13 = vld [vmem:[#allocation26_spill] sm:$0xff] }
 0x49f   : > { %5744 = vrcp.f32 %v1959_v12 }
 0x4a0   : > { %5746 = vrcp.f32 %v1960_v50 }
 0x4aa   : > { %v5743_v43 = vpop.eup %5742 }
 0x4ab   : > { %v1969_v47 = vmul.f32 %v5743_v43, %v5741_v56 }
 0x4ac   : > { %v5745_v49 = vpop.eup %5744 }
 0x4ad   : > { %v1968_v52 = vmul.f32 %v5745_v49, %v6850_v11  ;;  %v5747_v51 = vpop.eup %5746 }
 0x4af   : > { %v6994_v46 = vadd.f32 %v1969_v47, %v1968_v52  ;;  %v7903_v47 = vld [vmem:[#allocation28_spill] sm:$0xff] }
 0x4b1   : > { %5748 = vtanh.f32 %v6994_v46 }
 0x4be   : > { %v5749_v53 = vpop.eup %5748 }
 0x4bf   : > { %v6997_v54 = vmul.f32 %v5749_v53, %v5747_v51 }
 0x4c1   : > { %v1980_v57 = vpack.c.bf16 %v6997_v54, %v6997_v54 }
 0x4c3   : > { %2206 = vmatmul.mubr.bf16.vlgmr.msra.gmra.mxu0 %v1980_v57  ;;  %2247 = vmatmul.mubr.bf16.vlgmr.msra.gmra.mxu1 %v1980_v57 }
 0x4c4   : > { %2484 = vmatpush1.bf16.msra.mxu0 %v6866_v17  ;;  %2525 = vmatpush1.bf16.msra.mxu1 %v6869_v30 }
 0x4c5   : > { %2485 = vmatprep.subr.bf16.mxu0 %v6876_v19  ;;  %2526 = vmatprep.subr.bf16.mxu1 %v6879_v33 }
 0x4c6   : > { %2515 = vmatprep.mubr.bf16.mxu0 %v7894_v48  ;;  %2556 = vmatprep.mubr.bf16.mxu1 %v7894_v48 }
 0x4c8   : > { %2486 = vmatpush1.bf16.msra.mxu0 %v6882_v29  ;;  %2527 = vmatpush1.bf16.msra.mxu1 %v6885_v16 }
 0x4c9   : > { %2487 = vmatprep.subr.bf16.mxu0 %v6892_v9  ;;  %2528 = vmatprep.subr.bf16.mxu1 %v6895_v35 }
 0x4cc   : > { %2488 = vmatpush1.bf16.msra.mxu0 %v6898_v28  ;;  %2529 = vmatpush1.bf16.msra.mxu1 %v6901_v36 }
 0x4cd   : > { %2489 = vmatprep.subr.bf16.mxu0 %v6908_v45  ;;  %2530 = vmatprep.subr.bf16.mxu1 %v6911_v18 }
 0x4d0   : > { %2490 = vmatpush1.bf16.msra.mxu0 %v6914_v31  ;;  %2531 = vmatpush1.bf16.msra.mxu1 %v6917_v21 }
 0x4d1   : > { %2491 = vmatprep.subr.bf16.mxu0 %v6922_v37  ;;  %2532 = vmatprep.subr.bf16.mxu1 %v6925_v15 }
 0x4d4   : > { %2492 = vmatpush1.bf16.msra.mxu0 %v6930_v25  ;;  %2533 = vmatpush1.bf16.msra.mxu1 %v6933_v27 }
 0x4d5   : > { %2493 = vmatprep.subr.bf16.mxu0 %v6938_v34  ;;  %2534 = vmatprep.subr.bf16.mxu1 %v6941_v20 }
 0x4d8   : > { %2494 = vmatpush1.bf16.msra.mxu0 %v6946_v61  ;;  %2535 = vmatpush1.bf16.msra.mxu1 %v6949_v32 }
 0x4d9   : > { %2495 = vmatprep.subr.bf16.mxu0 %v6954_v44  ;;  %2536 = vmatprep.subr.bf16.mxu1 %v6957_v26 }
 0x4dc   : > { %2496 = vmatpush1.bf16.msra.mxu0 %v6962_v24  ;;  %2537 = vmatpush1.bf16.msra.mxu1 %v6965_v38 }
 0x4dd   : > { %2497 = vmatprep.subr.bf16.mxu0 %v6970_v39  ;;  %2538 = vmatprep.subr.bf16.mxu1 %v6973_v40 }
 0x4e0   : > { %2498 = vmatpush1.bf16.msra.mxu0 %v6978_v41  ;;  %2539 = vmatpush1.bf16.msra.mxu1 %v6981_v42 }
 0x4e1   : > { %2793 = vmatprep.subr.bf16.mxu0 %v6860_v4  ;;  %2834 = vmatprep.subr.bf16.mxu1 %v6863_v22 }
 0x583   : > { %v2207_v11 = vpop.f32.mrf.mxu0  ;;  %v2248_v58 = vpop.f32.mrf.mxu1 }
 0x584   : > { %v2255_v60 = vadd.f32 %v2207_v11, %v7900_v59  ;;  %v2257_v56 = vadd.f32 %v2248_v58, %v7902_v13 }
 0x585   : > { %v2209_v62 = vpop.f32.mrf.mxu0  ;;  %v2250_v63 = vpop.f32.mrf.mxu1 }
 0x586   : > { %v5109_v1 = vmul.f32 -1.442695, %v2255_v60  ;;  %v2256_v5 = vadd.f32 %v2209_v62, %v7901_v2  ;;  %v5111_v43 = vmul.f32 -1.442695, %v2257_v56  ;;  %v2258_v49 = vadd.f32 %v2250_v63, %v7903_v47  ;;  %v7905_v47 = vld [vmem:[#allocation31_spill] sm:$0xff] }
 0x587   : > { %v2211_v6 = vpop.f32.mrf.mxu0  ;;  %v2252_v7 = vpop.f32.mrf.mxu1 }
 0x588   : > { %5750 = vpow2.f32 %v5109_v1  ;;  %v5110_v8 = vmul.f32 -1.442695, %v2256_v5 }
 0x589   : > { %v2212_v10 = vpop.f32.mrf.mxu0  ;;  %v2253_v12 = vpop.f32.mrf.mxu1 }
 0x58a   : > { %5752 = vpow2.f32 %v5110_v8  ;;  %v7904_v10 = vld [vmem:[#allocation29_spill] sm:$0xff] }
 0x58b   : > { %5754 = vpow2.f32 %v5111_v43 }
 0x58c   : > { %5756 = vtanh.f32 %v2258_v49 }
 0x595   : > { %v5751_v50 = vpop.eup %5750 }
 0x596   : > { %v2268_v52 = vadd.f32 1.0, %v5751_v50 }
 0x597   : > { %v5753_v51 = vpop.eup %5752 }
 0x598   : > { %5758 = vrcp.f32 %v2268_v52  ;;  %v2269_v53 = vadd.f32 1.0, %v5753_v51  ;;  %v5755_v57 = vpop.eup %5754 }
 0x599   : > { %v5757_v11 = vpop.eup %5756  ;;  %v2270_v1 = vadd.f32 1.0, %v5755_v57 }
 0x59a   : > { %5760 = vrcp.f32 %v2269_v53 }
 0x59b   : > { %5762 = vrcp.f32 %v2270_v1 }
 0x5a5   : > { %v5759_v59 = vpop.eup %5758 }
 0x5a6   : > { %v2279_v60 = vmul.f32 %v5759_v59, %v5757_v11  ;;  %v7906_v11 = vld [vmem:[#allocation30_spill] sm:$0xff] }
 0x5a7   : > { %v5761_v62 = vpop.eup %5760 }
 0x5a8   : > { %v2278_v2 = vmul.f32 %v5761_v62, %v6994_v46  ;;  %v5763_v63 = vpop.eup %5762 }
 0x5aa   : > { %v7040_v58 = vadd.f32 %v2279_v60, %v2278_v2 }
 0x5ac   : > { %5764 = vtanh.f32 %v7040_v58 }
 0x5b9   : > { %v5765_v5 = vpop.eup %5764 }
 0x5ba   : > { %v7043_v6 = vmul.f32 %v5765_v5, %v5763_v63 }
 0x5bc   : > { %v2290_v7 = vpack.c.bf16 %v7043_v6, %v7043_v6 }
 0x5be   : > { %2516 = vmatmul.mubr.bf16.vlgmr.msra.gmra.mxu0 %v2290_v7  ;;  %2557 = vmatmul.mubr.bf16.vlgmr.msra.gmra.mxu1 %v2290_v7 }
 0x5bf   : > { %2794 = vmatpush1.bf16.msra.mxu0 %v6866_v17  ;;  %2835 = vmatpush1.bf16.msra.mxu1 %v6869_v30 }
 0x5c0   : > { %2795 = vmatprep.subr.bf16.mxu0 %v6876_v19  ;;  %2836 = vmatprep.subr.bf16.mxu1 %v6879_v33 }
 0x5c1   : > { %2825 = vmatprep.mubr.bf16.mxu0 %v7894_v48  ;;  %2866 = vmatprep.mubr.bf16.mxu1 %v7894_v48 }
 0x5c3   : > { %2796 = vmatpush1.bf16.msra.mxu0 %v6882_v29  ;;  %2837 = vmatpush1.bf16.msra.mxu1 %v6885_v16 }
 0x5c4   : > { %2797 = vmatprep.subr.bf16.mxu0 %v6892_v9  ;;  %2838 = vmatprep.subr.bf16.mxu1 %v6895_v35 }
 0x5c7   : > { %2798 = vmatpush1.bf16.msra.mxu0 %v6898_v28  ;;  %2839 = vmatpush1.bf16.msra.mxu1 %v6901_v36 }
 0x5c8   : > { %2799 = vmatprep.subr.bf16.mxu0 %v6908_v45  ;;  %2840 = vmatprep.subr.bf16.mxu1 %v6911_v18 }
 0x5cb   : > { %2800 = vmatpush1.bf16.msra.mxu0 %v6914_v31  ;;  %2841 = vmatpush1.bf16.msra.mxu1 %v6917_v21 }
 0x5cc   : > { %2801 = vmatprep.subr.bf16.mxu0 %v6922_v37  ;;  %2842 = vmatprep.subr.bf16.mxu1 %v6925_v15 }
 0x5cf   : > { %2802 = vmatpush1.bf16.msra.mxu0 %v6930_v25  ;;  %2843 = vmatpush1.bf16.msra.mxu1 %v6933_v27 }
 0x5d0   : > { %2803 = vmatprep.subr.bf16.mxu0 %v6938_v34  ;;  %2844 = vmatprep.subr.bf16.mxu1 %v6941_v20 }
 0x5d3   : > { %2804 = vmatpush1.bf16.msra.mxu0 %v6946_v61  ;;  %2845 = vmatpush1.bf16.msra.mxu1 %v6949_v32 }
 0x5d4   : > { %2805 = vmatprep.subr.bf16.mxu0 %v6954_v44  ;;  %2846 = vmatprep.subr.bf16.mxu1 %v6957_v26 }
 0x5d7   : > { %2806 = vmatpush1.bf16.msra.mxu0 %v6962_v24  ;;  %2847 = vmatpush1.bf16.msra.mxu1 %v6965_v38 }
 0x5d8   : > { %2807 = vmatprep.subr.bf16.mxu0 %v6970_v39  ;;  %2848 = vmatprep.subr.bf16.mxu1 %v6973_v40 }
 0x5db   : > { %2808 = vmatpush1.bf16.msra.mxu0 %v6978_v41  ;;  %2849 = vmatpush1.bf16.msra.mxu1 %v6981_v42 }
 0x5dc   : > { %3103 = vmatprep.subr.bf16.mxu0 %v6860_v4  ;;  %3144 = vmatprep.subr.bf16.mxu1 %v6863_v22  ;;  %v7907_v22 = vld [vmem:[#allocation32_spill] sm:$0xff] }
 0x67e   : > { %v2517_v46 = vpop.f32.mrf.mxu0  ;;  %v2558_v8 = vpop.f32.mrf.mxu1 }
 0x67f   : > { %v2565_v12 = vadd.f32 %v2517_v46, %v7904_v10  ;;  %v2567_v4 = vadd.f32 %v2558_v8, %v7906_v11 }
 0x680   : > { %v2519_v13 = vpop.f32.mrf.mxu0  ;;  %v2560_v56 = vpop.f32.mrf.mxu1 }
 0x681   : > { %v5144_v43 = vmul.f32 -1.442695, %v2565_v12  ;;  %v2566_v49 = vadd.f32 %v2519_v13, %v7905_v47  ;;  %v5146_v59 = vmul.f32 -1.442695, %v2567_v4  ;;  %v2568_v60 = vadd.f32 %v2560_v56, %v7907_v22  ;;  %v5590_v4 = vld [vmem:[%s6423_s11 + $0x1e0] ss:$16 sps:$4 sm:$0xff]  }
 0x682   : > { %v2521_v50 = vpop.f32.mrf.mxu0  ;;  %v2562_v52 = vpop.f32.mrf.mxu1 }
 0x683   : > { %5766 = vpow2.f32 %v5144_v43  ;;  %v5145_v51 = vmul.f32 -1.442695, %v2566_v49 }
 0x684   : > { %v2522_v53 = vpop.f32.mrf.mxu0  ;;  %v2563_v57 = vpop.f32.mrf.mxu1 }
 0x685   : > { %5768 = vpow2.f32 %v5145_v51 }
 0x686   : > { %5770 = vpow2.f32 %v5146_v59  ;;  %v5593_v59 = vld [vmem:[%s6423_s11 + $0x1e8] ss:$16 sps:$4 sm:$0xff]  }
 0x687   : > { %5772 = vtanh.f32 %v2568_v60  ;;  %v5598_v60 = vld [vmem:[%s6423_s11 + $0x1c4] ss:$16 sps:$4 sm:$0xff]  }
 0x690   : > { %v5767_v62 = vpop.eup %5766 }
 0x691   : > { %v2578_v1 = vadd.f32 1.0, %v5767_v62  ;;  %v5601_v62 = vld [vmem:[%s6423_s11 + $0x1cc] ss:$16 sps:$4 sm:$0xff]  }
 0x692   : > { %v5769_v2 = vpop.eup %5768 }
 0x693   : > { %5774 = vrcp.f32 %v2578_v1  ;;  %v2579_v63 = vadd.f32 1.0, %v5769_v2  ;;  %v5771_v5 = vpop.eup %5770  ;;  %v5596_v1 = vld [vmem:[%s6423_s11 + $0x1c0] ss:$16 sps:$4 sm:$0xff]   ;;  %v5599_v2 = vld [vmem:[%s6423_s11 + $0x1c8] ss:$16 sps:$4 sm:$0xff]  }
 0x694   : > { %v5773_v7 = vpop.eup %5772  ;;  %v2580_v13 = vadd.f32 1.0, %v5771_v5  ;;  %v5607_v5 = vld [vmem:[%s6423_s11 + $0x1ac] ss:$16 sps:$4 sm:$0xff]  }
 0x695   : > { %5776 = vrcp.f32 %v2579_v63  ;;  %v5604_v63 = vld [vmem:[%s6423_s11 + $0x1a4] ss:$16 sps:$4 sm:$0xff]  }
 0x696   : > { %5778 = vrcp.f32 %v2580_v13  ;;  %v5608_v13 = vld [vmem:[%s6423_s11 + $0x180] ss:$16 sps:$4 sm:$0xff]  }
 0x6a0   : > { %v5775_v46 = vpop.eup %5774 }
 0x6a1   : > { %v2589_v10 = vmul.f32 %v5775_v46, %v5773_v7  ;;  %v5602_v7 = vld [vmem:[%s6423_s11 + $0x1a0] ss:$16 sps:$4 sm:$0xff]   ;;  %v5605_v46 = vld [vmem:[%s6423_s11 + $0x1a8] ss:$16 sps:$4 sm:$0xff]  }
 0x6a2   : > { %v5777_v12 = vpop.eup %5776 }
 0x6a3   : > { %v2588_v43 = vmul.f32 %v5777_v12, %v7040_v58  ;;  %v5779_v56 = vpop.eup %5778  ;;  %v5613_v12 = vld [vmem:[%s6423_s11 + $0x18c] ss:$16 sps:$4 sm:$0xff]  }
 0x6a5   : > { %v7086_v8 = vadd.f32 %v2589_v10, %v2588_v43  ;;  %v5610_v10 = vld [vmem:[%s6423_s11 + $0x184] ss:$16 sps:$4 sm:$0xff]   ;;  %v5611_v43 = vld [vmem:[%s6423_s11 + $0x188] ss:$16 sps:$4 sm:$0xff]  }
 0x6a7   : > { %5780 = vtanh.f32 %v7086_v8 }
 0x6b4   : > { %v5781_v47 = vpop.eup %5780 }
 0x6b5   : > { %v7089_v49 = vmul.f32 %v5781_v47, %v5779_v56  ;;  %v5619_v56 = vld [vmem:[%s6423_s11 + $0x16c] ss:$16 sps:$4 sm:$0xff]   ;;  %v5614_v47 = vld [vmem:[%s6423_s11 + $0x160] ss:$16 sps:$4 sm:$0xff]  }
 0x6b7   : > { %v2600_v50 = vpack.c.bf16 %v7089_v49, %v7089_v49 }
 0x6b9   : > { %2826 = vmatmul.mubr.bf16.vlgmr.msra.gmra.mxu0 %v2600_v50  ;;  %2867 = vmatmul.mubr.bf16.vlgmr.msra.gmra.mxu1 %v2600_v50  ;;  %v5617_v50 = vld [vmem:[%s6423_s11 + $0x168] ss:$16 sps:$4 sm:$0xff]  }
 0x6ba   : > { %3104 = vmatpush1.bf16.msra.mxu0 %v6866_v17  ;;  %3145 = vmatpush1.bf16.msra.mxu1 %v6869_v30  ;;  %v5592_v17 = vld [vmem:[%s6423_s11 + $0x1e4] ss:$16 sps:$4 sm:$0xff]   ;;  %v5595_v30 = vld [vmem:[%s6423_s11 + $0x1ec] ss:$16 sps:$4 sm:$0xff]  }
 0x6bb   : > { %3105 = vmatprep.subr.bf16.mxu0 %v6876_v19  ;;  %3146 = vmatprep.subr.bf16.mxu1 %v6879_v33 }
 0x6bc   : > { %3135 = vmatprep.mubr.bf16.mxu0 %v7894_v48  ;;  %3176 = vmatprep.mubr.bf16.mxu1 %v7894_v48 }
 0x6be   : > { %3106 = vmatpush1.bf16.msra.mxu0 %v6882_v29  ;;  %3147 = vmatpush1.bf16.msra.mxu1 %v6885_v16  ;;  %v7908_v29 = vld [vmem:[#allocation33_spill] sm:$0xff] }
 0x6bf   : > { %3107 = vmatprep.subr.bf16.mxu0 %v6892_v9  ;;  %3148 = vmatprep.subr.bf16.mxu1 %v6895_v35 }
 0x6c2   : > { %3108 = vmatpush1.bf16.msra.mxu0 %v6898_v28  ;;  %3149 = vmatpush1.bf16.msra.mxu1 %v6901_v36  ;;  %v7909_v36 = vld [vmem:[#allocation35_spill] sm:$0xff] }
 0x6c3   : > { %3109 = vmatprep.subr.bf16.mxu0 %v6908_v45  ;;  %3150 = vmatprep.subr.bf16.mxu1 %v6911_v18 }
 0x6c6   : > { %3110 = vmatpush1.bf16.msra.mxu0 %v6914_v31  ;;  %3151 = vmatpush1.bf16.msra.mxu1 %v6917_v21 }
 0x6c7   : > { %3111 = vmatprep.subr.bf16.mxu0 %v6922_v37  ;;  %3152 = vmatprep.subr.bf16.mxu1 %v6925_v15 }
 0x6ca   : > { %3112 = vmatpush1.bf16.msra.mxu0 %v6930_v25  ;;  %3153 = vmatpush1.bf16.msra.mxu1 %v6933_v27  ;;  %v7910_v25 = vld [vmem:[#allocation34_spill] sm:$0xff] }
 0x6cb   : > { %3113 = vmatprep.subr.bf16.mxu0 %v6938_v34  ;;  %3154 = vmatprep.subr.bf16.mxu1 %v6941_v20  ;;  %v7911_v20 = vld [vmem:[#allocation36_spill] sm:$0xff] }
 0x6ce   : > { %3114 = vmatpush1.bf16.msra.mxu0 %v6946_v61  ;;  %3155 = vmatpush1.bf16.msra.mxu1 %v6949_v32 }
 0x6cf   : > { %3115 = vmatprep.subr.bf16.mxu0 %v6954_v44  ;;  %3156 = vmatprep.subr.bf16.mxu1 %v6957_v26 }
 0x6d2   : > { %3116 = vmatpush1.bf16.msra.mxu0 %v6962_v24  ;;  %3157 = vmatpush1.bf16.msra.mxu1 %v6965_v38 }
 0x6d3   : > { %3117 = vmatprep.subr.bf16.mxu0 %v6970_v39  ;;  %3158 = vmatprep.subr.bf16.mxu1 %v6973_v40 }
 0x6d6   : > { %3118 = vmatpush1.bf16.msra.mxu0 %v6978_v41  ;;  %3159 = vmatpush1.bf16.msra.mxu1 %v6981_v42 }
 0x6d7   : > { %3443 = vmatprep.subr.bf16.mxu0 %v5592_v17  ;;  %3516 = vmatprep.subr.bf16.mxu1 %v5595_v30  ;;  %v5622_v17 = vld [vmem:[%s6423_s11 + $0x144] ss:$16 sps:$4 sm:$0xff]   ;;  %v5625_v30 = vld [vmem:[%s6423_s11 + $0x14c] ss:$16 sps:$4 sm:$0xff]  }
 0x779   : > { %v2827_v19 = vpop.f32.mrf.mxu0  ;;  %v2868_v33 = vpop.f32.mrf.mxu1 }
 0x77a   : > { %v2875_v16 = vadd.f32 %v2827_v19, %v7908_v29  ;;  %v2877_v27 = vadd.f32 %v2868_v33, %v7910_v25  ;;  %v5620_v19 = vld [vmem:[%s6423_s11 + $0x140] ss:$16 sps:$4 sm:$0xff]   ;;  %v5623_v33 = vld [vmem:[%s6423_s11 + $0x148] ss:$16 sps:$4 sm:$0xff]   ;;  %v5628_v29 = vld [vmem:[%s6423_s11 + $0x124] ss:$16 sps:$4 sm:$0xff]  }
 0x77b   : > { %v2829_v9 = vpop.f32.mrf.mxu0  ;;  %v2870_v35 = vpop.f32.mrf.mxu1  ;;  %v7209_v25 = vld [vmem:[%s6430_s6 + $0x1c8] ss:$16 sps:$4 sm:$0xff]  }
 0x77c   : > { %v5179_v28 = vmul.f32 -1.442695, %v2875_v16  ;;  %v2876_v45 = vadd.f32 %v2829_v9, %v7909_v36  ;;  %v5181_v34 = vmul.f32 -1.442695, %v2877_v27  ;;  %v2878_v61 = vadd.f32 %v2870_v35, %v7911_v20  ;;  %v5631_v16 = vld [vmem:[%s6423_s11 + $0x12c] ss:$16 sps:$4 sm:$0xff]  }
 0x77d   : > { %v2831_v18 = vpop.f32.mrf.mxu0  ;;  %v2872_v31 = vpop.f32.mrf.mxu1  ;;  %v5626_v9 = vld [vmem:[%s6423_s11 + $0x120] ss:$16 sps:$4 sm:$0xff]   ;;  %v5629_v35 = vld [vmem:[%s6423_s11 + $0x128] ss:$16 sps:$4 sm:$0xff]   ;;  %v5637_v36 = vld [vmem:[%s6423_s11 + $0x10c] ss:$16 sps:$4 sm:$0xff]  }
 0x77e   : > { %5782 = vpow2.f32 %v5179_v28  ;;  %v5180_v21 = vmul.f32 -1.442695, %v2876_v45  ;;  %v5634_v28 = vld [vmem:[%s6423_s11 + $0x104] ss:$16 sps:$4 sm:$0xff]   ;;  %v5632_v45 = vld [vmem:[%s6423_s11 + $0x100] ss:$16 sps:$4 sm:$0xff]   ;;  %v3223_v31 = vpack.c.bf16 %v6809_v3, %v6763_v0  ;;  %v3225_v0 = vpack.c.bf16 %v7089_v49, %v7043_v6 }
 0x77f   : > { %v2832_v37 = vpop.f32.mrf.mxu0  ;;  %v2873_v15 = vpop.f32.mrf.mxu1  ;;  %v5635_v18 = vld [vmem:[%s6423_s11 + $0x108] ss:$16 sps:$4 sm:$0xff]   ;;  %v7184_v3 = vld [vmem:[%s6430_s6 + $0x1e4] ss:$16 sps:$4 sm:$0xff]   ;;  %v7203_v49 = vld [vmem:[%s6430_s6 + $0x1cc] ss:$16 sps:$4 sm:$0xff]  }
 0x780   : > { %5784 = vpow2.f32 %v5180_v21  ;;  %v3224_v21 = vpack.c.bf16 %v6997_v54, %v6853_v55  ;;  %v7187_v55 = vld [vmem:[%s6430_s6 + $0x1ec] ss:$16 sps:$4 sm:$0xff]   ;;  %v7190_v54 = vld [vmem:[%s6430_s6 + $0x1e0] ss:$16 sps:$4 sm:$0xff]   ;;  %v7193_v37 = vld [vmem:[%s6430_s6 + $0x1e8] ss:$16 sps:$4 sm:$0xff]  }
 0x781   : > { %5786 = vpow2.f32 %v5181_v34  ;;  %v7200_v6 = vld [vmem:[%s6430_s6 + $0x1c4] ss:$16 sps:$4 sm:$0xff]   ;;  %v7206_v15 = vld [vmem:[%s6430_s6 + $0x1c0] ss:$16 sps:$4 sm:$0xff]   ;;  %v7219_v34 = vld [vmem:[%s6430_s6 + $0x1ac] ss:$16 sps:$4 sm:$0xff]  }
 0x782   : > { %5788 = vtanh.f32 %v2878_v61  ;;  %v7216_v27 = vld [vmem:[%s6430_s6 + $0x1a4] ss:$16 sps:$4 sm:$0xff]   ;;  %v7222_v20 = vld [vmem:[%s6430_s6 + $0x1a0] ss:$16 sps:$4 sm:$0xff]   ;;  %v7225_v61 = vld [vmem:[%s6430_s6 + $0x1a8] ss:$16 sps:$4 sm:$0xff]  }
 0x78b   : > { %v5783_v32 = vpop.eup %5782 }
 0x78c   : > { %v2888_v44 = vadd.f32 1.0, %v5783_v32  ;;  %v7232_v32 = vld [vmem:[%s6430_s6 + $0x184] ss:$16 sps:$4 sm:$0xff]  }
 0x78d   : > { %v5785_v26 = vpop.eup %5784 }
 0x78e   : > { %5790 = vrcp.f32 %v2888_v44  ;;  %v2889_v24 = vadd.f32 1.0, %v5785_v26  ;;  %v5787_v38 = vpop.eup %5786  ;;  %v7235_v44 = vld [vmem:[%s6430_s6 + $0x18c] ss:$16 sps:$4 sm:$0xff]   ;;  %v7238_v26 = vld [vmem:[%s6430_s6 + $0x180] ss:$16 sps:$4 sm:$0xff]  }
 0x78f   : > { %v5789_v39 = vpop.eup %5788  ;;  %v2890_v58 = vadd.f32 1.0, %v5787_v38  ;;  %v7248_v38 = vld [vmem:[%s6430_s6 + $0x164] ss:$16 sps:$4 sm:$0xff]  }
 0x790   : > { %5792 = vrcp.f32 %v2889_v24  ;;  %v7241_v24 = vld [vmem:[%s6430_s6 + $0x188] ss:$16 sps:$4 sm:$0xff]  }
 0x791   : > { %5794 = vrcp.f32 %v2890_v58  ;;  %v7267_v58 = vld [vmem:[%s6430_s6 + $0x14c] ss:$16 sps:$4 sm:$0xff]  }
 0x79b   : > { %v5791_v40 = vpop.eup %5790 }
 0x79c   : > { %v2899_v41 = vmul.f32 %v5791_v40, %v5789_v39  ;;  %v7251_v39 = vld [vmem:[%s6430_s6 + $0x16c] ss:$16 sps:$4 sm:$0xff]   ;;  %v7254_v40 = vld [vmem:[%s6430_s6 + $0x160] ss:$16 sps:$4 sm:$0xff]  }
 0x79d   : > { %v5793_v42 = vpop.eup %5792 }
 0x79e   : > { %v2898_v52 = vmul.f32 %v5793_v42, %v7086_v8  ;;  %v5795_v53 = vpop.eup %5794  ;;  %v5616_v8 = vld [vmem:[%s6423_s11 + $0x164] ss:$16 sps:$4 sm:$0xff]  }
 0x79f   : > { %v7264_v42 = vld [vmem:[%s6430_s6 + $0x144] ss:$16 sps:$4 sm:$0xff]  }
 0x7a0   : > { %v7132_v51 = vadd.f32 %v2899_v41, %v2898_v52  ;;  %v7257_v41 = vld [vmem:[%s6430_s6 + $0x168] ss:$16 sps:$4 sm:$0xff]   ;;  %v7270_v52 = vld [vmem:[%s6430_s6 + $0x140] ss:$16 sps:$4 sm:$0xff]  }
 0x7a2   : > { %5796 = vtanh.f32 %v7132_v51 }
 0x7af   : > { %v5797_v57 = vpop.eup %5796 }
 0x7b0   : > { %v7135_v11 = vmul.f32 %v5797_v57, %v5795_v53  ;;  %v7273_v53 = vld [vmem:[%s6430_s6 + $0x148] ss:$16 sps:$4 sm:$0xff]   ;;  %v7280_v57 = vld [vmem:[%s6430_s6 + $0x124] ss:$16 sps:$4 sm:$0xff]  }
 0x7b2   : > { %v2910_v22 = vpack.c.bf16 %v7135_v11, %v7135_v11 }
 0x7b4   : > { %3136 = vmatmul.mubr.bf16.vlgmr.msra.gmra.mxu0 %v2910_v22  ;;  %3177 = vmatmul.mubr.bf16.vlgmr.msra.gmra.mxu1 %v2910_v22  ;;  %v7289_v22 = vld [vmem:[%s6430_s6 + $0x128] ss:$16 sps:$4 sm:$0xff]  }
 0x7b5   : > { %3444 = vmatpush1.bf16.msra.mxu0 %v5590_v4  ;;  %3517 = vmatpush1.bf16.msra.mxu1 %v5593_v59  ;;  %v7283_v4 = vld [vmem:[%s6430_s6 + $0x12c] ss:$16 sps:$4 sm:$0xff]   ;;  %v7286_v59 = vld [vmem:[%s6430_s6 + $0x120] ss:$16 sps:$4 sm:$0xff]  }
 0x7b6   : > { %3445 = vmatprep.subr.bf16.mxu0 %v5598_v60  ;;  %3518 = vmatprep.subr.bf16.mxu1 %v5601_v62  ;;  %v7292_v60 = vld [vmem:[%s6430_s6 + $0x104] ss:$16 sps:$4 sm:$0xff]   ;;  %v7295_v62 = vld [vmem:[%s6430_s6 + $0x10c] ss:$16 sps:$4 sm:$0xff]  }
 0x7b7   : > { %3475 = vmatprep.mubr.bf16.mxu0 %v7894_v48  ;;  %3548 = vmatprep.mubr.bf16.mxu1 %v7894_v48 }
 0x7b9   : > { %3446 = vmatpush1.bf16.msra.mxu0 %v5596_v1  ;;  %3519 = vmatpush1.bf16.msra.mxu1 %v5599_v2  ;;  %v7302_v1 = vld [vmem:[%s6430_s6 + $0x100] ss:$16 sps:$4 sm:$0xff]   ;;  %v7305_v2 = vld [vmem:[%s6430_s6 + $0x108] ss:$16 sps:$4 sm:$0xff]  }
 0x7ba   : > { %3447 = vmatprep.subr.bf16.mxu0 %v5604_v63  ;;  %3520 = vmatprep.subr.bf16.mxu1 %v5607_v5 }
 0x7bd   : > { %3448 = vmatpush1.bf16.msra.mxu0 %v5602_v7  ;;  %3521 = vmatpush1.bf16.msra.mxu1 %v5605_v46  ;;  %v7912_v7 = vld [vmem:[#allocation37_spill] sm:$0xff] }
 0x7be   : > { %3449 = vmatprep.subr.bf16.mxu0 %v5610_v10  ;;  %3522 = vmatprep.subr.bf16.mxu1 %v5613_v12 }
 0x7c1   : > { %3450 = vmatpush1.bf16.msra.mxu0 %v5608_v13  ;;  %3523 = vmatpush1.bf16.msra.mxu1 %v5611_v43 }
 0x7c2   : > { %3451 = vmatprep.subr.bf16.mxu0 %v5616_v8  ;;  %3524 = vmatprep.subr.bf16.mxu1 %v5619_v56 }
 0x7c5   : > { %3452 = vmatpush1.bf16.msra.mxu0 %v5614_v47  ;;  %3525 = vmatpush1.bf16.msra.mxu1 %v5617_v50 }
 0x7c6   : > { %3453 = vmatprep.subr.bf16.mxu0 %v5622_v17  ;;  %3526 = vmatprep.subr.bf16.mxu1 %v5625_v30  ;;  %v7913_v30 = vld [vmem:[#allocation38_spill] sm:$0xff] }
 0x7c9   : > { %3454 = vmatpush1.bf16.msra.mxu0 %v5620_v19  ;;  %3527 = vmatpush1.bf16.msra.mxu1 %v5623_v33 }
 0x7ca   : > { %3455 = vmatprep.subr.bf16.mxu0 %v5628_v29  ;;  %3528 = vmatprep.subr.bf16.mxu1 %v5631_v16 }
 0x7cd   : > { %3456 = vmatpush1.bf16.msra.mxu0 %v5626_v9  ;;  %3529 = vmatpush1.bf16.msra.mxu1 %v5629_v35 }
 0x7ce   : > { %3457 = vmatprep.subr.bf16.mxu0 %v5634_v28  ;;  %3530 = vmatprep.subr.bf16.mxu1 %v5637_v36 }
 0x7d1   : > { %3458 = vmatpush1.bf16.msra.mxu0 %v5632_v45  ;;  %3531 = vmatpush1.bf16.msra.mxu1 %v5635_v18 }
 0x7d2   : > { %3818 = vmatprep.subr.bf16.mxu0 %v7184_v3  ;;  %3859 = vmatprep.subr.bf16.mxu1 %v7187_v55 }
 0x7d4   : > { %3476 = vmatmul.mubr.bf16.vlgmr.msra.gmra.mxu0 %v3223_v31  ;;  %3549 = vmatmul.mubr.bf16.vlgmr.msra.gmra.mxu1 %v3223_v31 }
 0x7d5   : > { %3485 = vmatprep.mubr.bf16.mxu0 %v7894_v48  ;;  %3558 = vmatprep.mubr.bf16.mxu1 %v7894_v48 }
 0x7d6   : > { %3819 = vmatpush1.bf16.msra.mxu0 %v7190_v54  ;;  %3860 = vmatpush1.bf16.msra.mxu1 %v7193_v37 }
 0x7d7   : > { %3820 = vmatprep.subr.bf16.mxu0 %v7200_v6  ;;  %3861 = vmatprep.subr.bf16.mxu1 %v7203_v49 }
 0x7da   : > { %3821 = vmatpush1.bf16.msra.mxu0 %v7206_v15  ;;  %3862 = vmatpush1.bf16.msra.mxu1 %v7209_v25 }
 0x7db   : > { %3822 = vmatprep.subr.bf16.mxu0 %v7216_v27  ;;  %3863 = vmatprep.subr.bf16.mxu1 %v7219_v34 }
 0x7dc   : > { %3486 = vmatmul.mubr.bf16.gmra.mxu0 %v3224_v21  ;;  %3559 = vmatmul.mubr.bf16.gmra.mxu1 %v3224_v21 }
 0x7dd   : > { %3495 = vmatprep.mubr.bf16.mxu0 %v7894_v48  ;;  %3568 = vmatprep.mubr.bf16.mxu1 %v7894_v48 }
 0x7de   : > { %3823 = vmatpush1.bf16.msra.mxu0 %v7222_v20  ;;  %3864 = vmatpush1.bf16.msra.mxu1 %v7225_v61 }
 0x7df   : > { %3824 = vmatprep.subr.bf16.mxu0 %v7232_v32  ;;  %3865 = vmatprep.subr.bf16.mxu1 %v7235_v44 }
 0x7e2   : > { %3825 = vmatpush1.bf16.msra.mxu0 %v7238_v26  ;;  %3866 = vmatpush1.bf16.msra.mxu1 %v7241_v24 }
 0x7e3   : > { %3826 = vmatprep.subr.bf16.mxu0 %v7248_v38  ;;  %3867 = vmatprep.subr.bf16.mxu1 %v7251_v39 }
 0x7e4   : > { %3496 = vmatmul.mubr.bf16.gmra.mxu0 %v3225_v0  ;;  %3569 = vmatmul.mubr.bf16.gmra.mxu1 %v3225_v0 }
 0x7e5   : > { %3505 = vmatprep.mubr.bf16.mxu0 %v7894_v48  ;;  %3578 = vmatprep.mubr.bf16.mxu1 %v7894_v48 }
 0x7e6   : > { %3827 = vmatpush1.bf16.msra.mxu0 %v7254_v40  ;;  %3868 = vmatpush1.bf16.msra.mxu1 %v7257_v41 }
 0x7e7   : > { %3828 = vmatprep.subr.bf16.mxu0 %v7264_v42  ;;  %3869 = vmatprep.subr.bf16.mxu1 %v7267_v58 }
 0x7ea   : > { %3829 = vmatpush1.bf16.msra.mxu0 %v7270_v52  ;;  %3870 = vmatpush1.bf16.msra.mxu1 %v7273_v53 }
 0x7eb   : > { %3830 = vmatprep.subr.bf16.mxu0 %v7280_v57  ;;  %3871 = vmatprep.subr.bf16.mxu1 %v7283_v4 }
 0x7ee   : > { %3831 = vmatpush1.bf16.msra.mxu0 %v7286_v59  ;;  %3872 = vmatpush1.bf16.msra.mxu1 %v7289_v22 }
 0x7ef   : > { %3832 = vmatprep.subr.bf16.mxu0 %v7292_v60  ;;  %3873 = vmatprep.subr.bf16.mxu1 %v7295_v62 }
 0x7f2   : > { %3833 = vmatpush1.bf16.msra.mxu0 %v7302_v1  ;;  %3874 = vmatpush1.bf16.msra.mxu1 %v7305_v2 }
 0x7f3   : > { %3933 = vmatprep.subr.bf16.mxu0 %v7184_v3  ;;  %3974 = vmatprep.subr.bf16.mxu1 %v7187_v55 }
 0x874   : > { %v3137_v63 = vpop.f32.mrf.mxu0  ;;  %v3178_v5 = vpop.f32.mrf.mxu1 }
 0x875   : > { %v3185_v46 = vadd.f32 %v3137_v63, %v7912_v7  ;;  %v3187_v19 = vadd.f32 %v3178_v5, %v7913_v30 }
 0x876   : > { %v3139_v10 = vpop.f32.mrf.mxu0  ;;  %v3180_v12 = vpop.f32.mrf.mxu1 }
 0x877   : > { %v5214_v13 = vmul.f32 -1.442695, %v3185_v46  ;;  %v3186_v43 = vadd.f32 %v3139_v10, %v6750_v23  ;;  %v5216_v33 = vmul.f32 -1.442695, %v3187_v19  ;;  %v3188_v29 = vadd.f32 %v3180_v12, %v6753_v14 }
 0x878   : > { %v3141_v8 = vpop.f32.mrf.mxu0  ;;  %v3182_v56 = vpop.f32.mrf.mxu1 }
 0x879   : > { %5798 = vpow2.f32 %v5214_v13  ;;  %v5215_v47 = vmul.f32 -1.442695, %v3186_v43 }
 0x87a   : > { %v3142_v50 = vpop.f32.mrf.mxu0  ;;  %v3183_v17 = vpop.f32.mrf.mxu1 }
 0x87b   : > { %5800 = vpow2.f32 %v5215_v47 }
 0x87c   : > { %5802 = vpow2.f32 %v5216_v33 }
 0x87d   : > { %5804 = vtanh.f32 %v3188_v29 }
 0x886   : > { %v5799_v16 = vpop.eup %5798 }
 0x887   : > { %v3198_v9 = vadd.f32 1.0, %v5799_v16 }
 0x888   : > { %v5801_v35 = vpop.eup %5800 }
 0x889   : > { %5806 = vrcp.f32 %v3198_v9  ;;  %v3199_v28 = vadd.f32 1.0, %v5801_v35  ;;  %v5803_v23 = vpop.eup %5802 }
 0x88a   : > { %v5805_v36 = vpop.eup %5804  ;;  %v3200_v21 = vadd.f32 1.0, %v5803_v23 }
 0x88b   : > { %5808 = vrcp.f32 %v3199_v28 }
 0x88c   : > { %5810 = vrcp.f32 %v3200_v21  ;;  %v5249_v21 = vld [vmem:[%s6435_s23 + $0x4] sm:$0xf] }
 0x896   : > { %v5807_v45 = vpop.eup %5806 }
 0x897   : > { %v3209_v18 = vmul.f32 %v5807_v45, %v5805_v36 }
 0x898   : > { %v5809_v31 = vpop.eup %5808 }
 0x899   : > { %v3208_v0 = vmul.f32 %v5809_v31, %v7132_v51  ;;  %v5811_v14 = vpop.eup %5810  ;;  %v3477_v51 = vpop.f32.mrf.mxu0 }
 0x89b   : > { %v3210_v63 = vadd.f32 %v3209_v18, %v3208_v0  ;;  %v3479_v10 = vpop.f32.mrf.mxu0 }
 0x89d   : > { %5812 = vtanh.f32 %v3210_v63  ;;  %v7357_v13 = vpop.f32.mrf.mxu0 }
 0x89f   : > { %v7361_v8 = vpop.f32.mrf.mxu0 }
 0x8a1   : > { %v7365_v47 = vpop.f32.mrf.mxu0 }
 0x8a3   : > { %v7369_v17 = vpop.f32.mrf.mxu0 }
 0x8a5   : > { %v7373_v19 = vpop.f32.mrf.mxu0 }
 0x8a6   : > { %7915 = vst [vmem:[#allocation21_spill] sm:$0xff] %v7373_v19 }
 0x8a7   : > { %v7377_v29 = vpop.f32.mrf.mxu0 }
 0x8a8   : > { %7917 = vst [vmem:[#allocation22_spill] sm:$0xff] %v7377_v29 }
 0x8a9   : > { %v7381_v9 = vpop.f32.mrf.mxu0 }
 0x8aa   : > { %v5813_v5 = vpop.eup %5812  ;;  %7919 = vst [vmem:[#allocation25_spill] sm:$0xff] %v7381_v9 }
 0x8ab   : > { %v3212_v7 = vmul.f32 %v5813_v5, %v5811_v14  ;;  %v7385_v28 = vpop.f32.mrf.mxu0 }
 0x8ac   : > { %7921 = vst [vmem:[#allocation26_spill] sm:$0xff] %v7385_v28 }
 0x8ad   : > { %v3226_v46 = vpack.c.bf16 %v3212_v7, %v7135_v11  ;;  %v3550_v11 = vpop.f32.mrf.mxu1  ;;  %v7389_v36 = vpop.f32.mrf.mxu0  ;;  %v7931_v7 = vld [vmem:[#allocation19_spill] sm:$0xff] }
 0x8ae   : > { %7923 = vst [vmem:[#allocation29_spill] sm:$0xff] %v7389_v36  ;;  %v7938_v19 = vsub.s32 2, %v7931_v7 }
 0x8af   : > { %3506 = vmatmul.mubr.bf16.gmra.mxu0 %v3226_v46  ;;  %3579 = vmatmul.mubr.bf16.gmra.mxu1 %v3226_v46  ;;  %v3552_v12 = vpop.f32.mrf.mxu1  ;;  %v7393_v18 = vpop.f32.mrf.mxu0  ;;  %v7932_v46 = vsub.s32 0, %v7931_v7 }
 0x8b0   : > { %3850 = vmatprep.mubr.bf16.mxu0 %v7894_v48  ;;  %3891 = vmatprep.mubr.bf16.mxu1 %v7894_v48  ;;  %7925 = vst [vmem:[#allocation30_spill] sm:$0xff] %v7393_v18  ;;  %v7935_v18 = vsub.s32 1, %v7931_v7 }
 0x8b1   : > { %v7359_v43 = vpop.f32.mrf.mxu1 }
 0x8b3   : > { %v7363_v56 = vpop.f32.mrf.mxu1 }
 0x8b5   : > { %v7367_v50 = vpop.f32.mrf.mxu1 }
 0x8b7   : > { %3851 = vmatmul.mubr.bf16.vlgmr.msra.gmra.mxu0 %v7894_v48  ;;  %3892 = vmatmul.mubr.bf16.vlgmr.msra.gmra.mxu1 %v7894_v48  ;;  %v7371_v30 = vpop.f32.mrf.mxu1 }
 0x8b8   : > { %3934 = vmatpush1.bf16.msra.mxu0 %v7190_v54  ;;  %3975 = vmatpush1.bf16.msra.mxu1 %v7193_v37  ;;  %7914 = vst [vmem:[#allocation20_spill] sm:$0xff] %v7371_v30 }
 0x8b9   : > { %3935 = vmatprep.subr.bf16.mxu0 %v7200_v6  ;;  %3976 = vmatprep.subr.bf16.mxu1 %v7203_v49  ;;  %v7375_v33 = vpop.f32.mrf.mxu1 }
 0x8ba   : > { %3965 = vmatprep.mubr.bf16.mxu0 %v7894_v48  ;;  %4006 = vmatprep.mubr.bf16.mxu1 %v7894_v48  ;;  %7916 = vst [vmem:[#allocation23_spill] sm:$0xff] %v7375_v33 }
 0x8bb   : > { %v7379_v16 = vpop.f32.mrf.mxu1 }
 0x8bc   : > { %3936 = vmatpush1.bf16.msra.mxu0 %v7206_v15  ;;  %3977 = vmatpush1.bf16.msra.mxu1 %v7209_v25  ;;  %7918 = vst [vmem:[#allocation24_spill] sm:$0xff] %v7379_v16 }
 0x8bd   : > { %3937 = vmatprep.subr.bf16.mxu0 %v7216_v27  ;;  %3978 = vmatprep.subr.bf16.mxu1 %v7219_v34  ;;  %v7383_v35 = vpop.f32.mrf.mxu1 }
 0x8be   : > { %7920 = vst [vmem:[#allocation27_spill] sm:$0xff] %v7383_v35 }
 0x8bf   : > { %v7387_v23 = vpop.f32.mrf.mxu1 }
 0x8c0   : > { %3938 = vmatpush1.bf16.msra.mxu0 %v7222_v20  ;;  %3979 = vmatpush1.bf16.msra.mxu1 %v7225_v61  ;;  %7922 = vst [vmem:[#allocation28_spill] sm:$0xff] %v7387_v23  ;;  %v7408_v23 = vrot.slane %v5249_v21, %v7932_v46 }
 0x8c1   : > { %3939 = vmatprep.subr.bf16.mxu0 %v7232_v32  ;;  %3980 = vmatprep.subr.bf16.mxu1 %v7235_v44  ;;  %v7391_v45 = vpop.f32.mrf.mxu1 }
 0x8c2   : > { %7924 = vst [vmem:[#allocation31_spill] sm:$0xff] %v7391_v45 }
 0x8c3   : > { %v7395_v31 = vpop.f32.mrf.mxu1 }
 0x8c4   : > { %3940 = vmatpush1.bf16.msra.mxu0 %v7238_v26  ;;  %3981 = vmatpush1.bf16.msra.mxu1 %v7241_v24  ;;  %7926 = vst [vmem:[#allocation32_spill] sm:$0xff] %v7395_v31  ;;  %v7416_v31 = vrot.slane %v5249_v21, %v7935_v18 }
 0x8c5   : > { %3941 = vmatprep.subr.bf16.mxu0 %v7248_v38  ;;  %3982 = vmatprep.subr.bf16.mxu1 %v7251_v39 }
 0x8c6   : > { %v3480_v28 = vadd.f32 %v3479_v10, %v7416_v31  ;;  %v7939_v10 = vsub.s32 3, %v7931_v7 }
 0x8c8   : > { %3942 = vmatpush1.bf16.msra.mxu0 %v7254_v40  ;;  %3983 = vmatpush1.bf16.msra.mxu1 %v7257_v41 }
 0x8c9   : > { %3943 = vmatprep.subr.bf16.mxu0 %v7264_v42  ;;  %3984 = vmatprep.subr.bf16.mxu1 %v7267_v58 }
 0x8cc   : > { %3944 = vmatpush1.bf16.msra.mxu0 %v7270_v52  ;;  %3985 = vmatpush1.bf16.msra.mxu1 %v7273_v53 }
 0x8cd   : > { %3945 = vmatprep.subr.bf16.mxu0 %v7280_v57  ;;  %3986 = vmatprep.subr.bf16.mxu1 %v7283_v4 }
 0x8d0   : > { %3946 = vmatpush1.bf16.msra.mxu0 %v7286_v59  ;;  %3987 = vmatpush1.bf16.msra.mxu1 %v7289_v22 }
 0x8d1   : > { %3947 = vmatprep.subr.bf16.mxu0 %v7292_v60  ;;  %3988 = vmatprep.subr.bf16.mxu1 %v7295_v62 }
 0x8d4   : > { %3948 = vmatpush1.bf16.msra.mxu0 %v7302_v1  ;;  %3989 = vmatpush1.bf16.msra.mxu1 %v7305_v2 }
 0x8d5   : > { %4048 = vmatprep.subr.bf16.mxu0 %v7184_v3  ;;  %4089 = vmatprep.subr.bf16.mxu1 %v7187_v55 }
 0x96f   : > { %v7398_v0 = vpop.f32.mrf.mxu0  ;;  %v7400_v63 = vpop.f32.mrf.mxu1 }
 0x970   : > { %7927 = vst [vmem:[#allocation33_spill] sm:$0xff] %v7398_v0  ;;  %7928 = vst [vmem:[#allocation35_spill] sm:$0xff] %v7400_v63  ;;  %v3478_v63 = vadd.f32 %v3477_v51, %v7408_v23 }
 0x971   : > { %v7402_v14 = vpop.f32.mrf.mxu0  ;;  %v7404_v5 = vpop.f32.mrf.mxu1 }
 0x972   : > { %7929 = vst [vmem:[#allocation34_spill] sm:$0xff] %v7402_v14  ;;  %7930 = vst [vmem:[#allocation36_spill] sm:$0xff] %v7404_v5 }
 0x973   : > { %v7410_v36 = vpop.f32.mrf.mxu0  ;;  %v7412_v45 = vpop.f32.mrf.mxu1 }
 0x974   : > { %7933 = vst [vmem:[#allocation37_spill] sm:$0xff] %v7410_v36  ;;  %7934 = vst [vmem:[#allocation38_spill] sm:$0xff] %v7412_v45 }
 0x975   : > { %v7418_v35 = vpop.f32.mrf.mxu0  ;;  %v7420_v0 = vpop.f32.mrf.mxu1 }
 0x976   : > { %7936 = vst [vmem:[#allocation19_spill] sm:$0xff] %v7418_v35  ;;  %7937 = vst [vmem:[#allocation39_spill] sm:$0xff] %v7420_v0  ;;  %v7426_v35 = vrot.slane %v5249_v21, %v7938_v19 }
 0x977   : > { %v3852_v14 = vpop.f32.mrf.mxu0  ;;  %v3893_v5 = vpop.f32.mrf.mxu1 }
 0x978   : > { %v3900_v46 = vadd.f32 %v3852_v14, %v3478_v63  ;;  %v3551_v51 = vadd.f32 %v3550_v11, %v7426_v35  ;;  %v7431_v63 = vrot.slane %v5249_v21, %v7939_v10 }
 0x979   : > { %v3854_v9 = vpop.f32.mrf.mxu0  ;;  %v3895_v16 = vpop.f32.mrf.mxu1 }
 0x97a   : > { %v5346_v36 = vmul.f32 -1.442695, %v3900_v46  ;;  %v3901_v33 = vadd.f32 %v3854_v9, %v3480_v28  ;;  %v3902_v14 = vadd.f32 %v3893_v5, %v3551_v51  ;;  %v3553_v9 = vadd.f32 %v3552_v12, %v7431_v63 }
 0x97b   : > { %v3856_v45 = vpop.f32.mrf.mxu0  ;;  %v3897_v29 = vpop.f32.mrf.mxu1 }
 0x97c   : > { %5814 = vpow2.f32 %v5346_v36  ;;  %v5347_v18 = vmul.f32 -1.442695, %v3901_v33  ;;  %v5348_v28 = vmul.f32 -1.442695, %v3902_v14  ;;  %v3903_v36 = vadd.f32 %v3895_v16, %v3553_v9 }
 0x97d   : > { %v3857_v0 = vpop.f32.mrf.mxu0  ;;  %v3898_v30 = vpop.f32.mrf.mxu1  ;;  %v3482_v14 = vadd.f32 %v7357_v13, %v7408_v23  ;;  %v3555_v13 = vadd.f32 %v7359_v43, %v7426_v35 }
 0x97e   : > { %5816 = vpow2.f32 %v5347_v18 }
 0x97f   : > { %5818 = vpow2.f32 %v5348_v28 }
 0x989   : > { %v5815_v29 = vpop.eup %5814 }
 0x98a   : > { %v3913_v33 = vadd.f32 1.0, %v5815_v29  ;;  %v3484_v29 = vadd.f32 %v7361_v8, %v7416_v31 }
 0x98b   : > { %v5817_v45 = vpop.eup %5816 }
 0x98c   : > { %5820 = vrcp.f32 %v3913_v33  ;;  %v3914_v19 = vadd.f32 1.0, %v5817_v45  ;;  %v5819_v30 = vpop.eup %5818 }
 0x98d   : > { %5822 = vtanh.f32 %v3903_v36  ;;  %v3915_v7 = vadd.f32 1.0, %v5819_v30 }
 0x98e   : > { %5824 = vrcp.f32 %v3914_v19 }
 0x98f   : > { %5826 = vrcp.f32 %v3915_v7 }
 0x999   : > { %v5821_v0 = vpop.eup %5820 }
 0x99a   : > { %v5823_v11 = vpop.eup %5822 }
 0x99b   : > { %v5825_v46 = vpop.eup %5824  ;;  %v3924_v18 = vmul.f32 %v5823_v11, %v5821_v0 }
 0x99c   : > { %v3923_v21 = vmul.f32 0.0, %v5825_v46  ;;  %v5827_v12 = vpop.eup %5826 }
 0x99e   : > { %v7434_v5 = vadd.f32 %v3924_v18, %v3923_v21 }
 0x9a0   : > { %5828 = vtanh.f32 %v7434_v5 }
 0x9ad   : > { %v5829_v16 = vpop.eup %5828 }
 0x9ae   : > { %v3927_v51 = vmul.f32 %v5829_v16, %v5827_v12  ;;  %v3557_v12 = vadd.f32 %v7363_v56, %v7431_v63 }
 0x9b0   : > { %v3932_v10 = vpack.c.bf16 %v3927_v51, %v3927_v51 }
 0x9b2   : > { %3966 = vmatmul.mubr.bf16.vlgmr.msra.gmra.mxu0 %v3932_v10  ;;  %4007 = vmatmul.mubr.bf16.vlgmr.msra.gmra.mxu1 %v3932_v10 }
 0x9b3   : > { %4049 = vmatpush1.bf16.msra.mxu0 %v7190_v54  ;;  %4090 = vmatpush1.bf16.msra.mxu1 %v7193_v37 }
 0x9b4   : > { %4050 = vmatprep.subr.bf16.mxu0 %v7200_v6  ;;  %4091 = vmatprep.subr.bf16.mxu1 %v7203_v49 }
 0x9b5   : > { %4080 = vmatprep.mubr.bf16.mxu0 %v7894_v48  ;;  %4121 = vmatprep.mubr.bf16.mxu1 %v7894_v48 }
 0x9b7   : > { %4051 = vmatpush1.bf16.msra.mxu0 %v7206_v15  ;;  %4092 = vmatpush1.bf16.msra.mxu1 %v7209_v25 }
 0x9b8   : > { %4052 = vmatprep.subr.bf16.mxu0 %v7216_v27  ;;  %4093 = vmatprep.subr.bf16.mxu1 %v7219_v34 }
 0x9bb   : > { %4053 = vmatpush1.bf16.msra.mxu0 %v7222_v20  ;;  %4094 = vmatpush1.bf16.msra.mxu1 %v7225_v61 }
 0x9bc   : > { %4054 = vmatprep.subr.bf16.mxu0 %v7232_v32  ;;  %4095 = vmatprep.subr.bf16.mxu1 %v7235_v44 }
 0x9bf   : > { %4055 = vmatpush1.bf16.msra.mxu0 %v7238_v26  ;;  %4096 = vmatpush1.bf16.msra.mxu1 %v7241_v24 }
 0x9c0   : > { %4056 = vmatprep.subr.bf16.mxu0 %v7248_v38  ;;  %4097 = vmatprep.subr.bf16.mxu1 %v7251_v39 }
 0x9c3   : > { %4057 = vmatpush1.bf16.msra.mxu0 %v7254_v40  ;;  %4098 = vmatpush1.bf16.msra.mxu1 %v7257_v41 }
 0x9c4   : > { %4058 = vmatprep.subr.bf16.mxu0 %v7264_v42  ;;  %4099 = vmatprep.subr.bf16.mxu1 %v7267_v58 }
 0x9c7   : > { %4059 = vmatpush1.bf16.msra.mxu0 %v7270_v52  ;;  %4100 = vmatpush1.bf16.msra.mxu1 %v7273_v53 }
 0x9c8   : > { %4060 = vmatprep.subr.bf16.mxu0 %v7280_v57  ;;  %4101 = vmatprep.subr.bf16.mxu1 %v7283_v4 }
 0x9cb   : > { %4061 = vmatpush1.bf16.msra.mxu0 %v7286_v59  ;;  %4102 = vmatpush1.bf16.msra.mxu1 %v7289_v22 }
 0x9cc   : > { %4062 = vmatprep.subr.bf16.mxu0 %v7292_v60  ;;  %4103 = vmatprep.subr.bf16.mxu1 %v7295_v62 }
 0x9cf   : > { %4063 = vmatpush1.bf16.msra.mxu0 %v7302_v1  ;;  %4104 = vmatpush1.bf16.msra.mxu1 %v7305_v2 }
 0x9d0   : > { %4163 = vmatprep.subr.bf16.mxu0 %v7184_v3  ;;  %4204 = vmatprep.subr.bf16.mxu1 %v7187_v55 }
 0xa72   : > { %v3967_v9 = vpop.f32.mrf.mxu0  ;;  %v4008_v28 = vpop.f32.mrf.mxu1 }
 0xa73   : > { %v4015_v36 = vadd.f32 %v3967_v9, %v3482_v14  ;;  %v4017_v18 = vadd.f32 %v4008_v28, %v3555_v13  ;;  %v3490_v13 = vadd.f32 %v7369_v17, %v7416_v31 }
 0xa74   : > { %v3969_v33 = vpop.f32.mrf.mxu0  ;;  %v4010_v45 = vpop.f32.mrf.mxu1 }
 0xa75   : > { %v5349_v19 = vmul.f32 -1.442695, %v4015_v36  ;;  %v4016_v30 = vadd.f32 %v3969_v33, %v3484_v29  ;;  %v5351_v8 = vmul.f32 -1.442695, %v4017_v18  ;;  %v4018_v16 = vadd.f32 %v4010_v45, %v3557_v12 }
 0xa76   : > { %v3971_v0 = vpop.f32.mrf.mxu0  ;;  %v4012_v11 = vpop.f32.mrf.mxu1 }
 0xa77   : > { %5830 = vpow2.f32 %v5349_v19  ;;  %v5350_v46 = vmul.f32 -1.442695, %v4016_v30 }
 0xa78   : > { %v3972_v7 = vpop.f32.mrf.mxu0  ;;  %v4013_v21 = vpop.f32.mrf.mxu1 }
 0xa79   : > { %5832 = vpow2.f32 %v5350_v46 }
 0xa7a   : > { %5834 = vpow2.f32 %v5351_v8 }
 0xa7b   : > { %5836 = vtanh.f32 %v4018_v16 }
 0xa84   : > { %v5831_v51 = vpop.eup %5830 }
 0xa85   : > { %v4028_v10 = vadd.f32 1.0, %v5831_v51 }
 0xa86   : > { %v5833_v14 = vpop.eup %5832 }
 0xa87   : > { %5838 = vrcp.f32 %v4028_v10  ;;  %v4029_v9 = vadd.f32 1.0, %v5833_v14  ;;  %v5835_v29 = vpop.eup %5834 }
 0xa88   : > { %v5837_v36 = vpop.eup %5836  ;;  %v4030_v43 = vadd.f32 1.0, %v5835_v29 }
 0xa89   : > { %5840 = vrcp.f32 %v4029_v9 }
 0xa8a   : > { %5842 = vrcp.f32 %v4030_v43 }
 0xa94   : > { %v5839_v33 = vpop.eup %5838 }
 0xa95   : > { %v4039_v19 = vmul.f32 %v5839_v33, %v5837_v36 }
 0xa96   : > { %v5841_v30 = vpop.eup %5840 }
 0xa97   : > { %v4038_v28 = vmul.f32 %v5841_v30, %v7434_v5  ;;  %v5843_v56 = vpop.eup %5842  ;;  %v3488_v5 = vadd.f32 %v7365_v47, %v7408_v23  ;;  %v3561_v47 = vadd.f32 %v7367_v50, %v7426_v35 }
 0xa99   : > { %v7480_v0 = vadd.f32 %v4039_v19, %v4038_v28  ;;  %v7940_v19 = vld [vmem:[#allocation20_spill] sm:$0xff] }
 0xa9a   : > { %v3563_v30 = vadd.f32 %v7940_v19, %v7431_v63 }
 0xa9b   : > { %5844 = vtanh.f32 %v7480_v0 }
 0xaa8   : > { %v5845_v45 = vpop.eup %5844 }
 0xaa9   : > { %v4042_v11 = vmul.f32 %v5845_v45, %v5843_v56 }
 0xaab   : > { %v4047_v46 = vpack.c.bf16 %v4042_v11, %v4042_v11 }
 0xaad   : > { %4081 = vmatmul.mubr.bf16.vlgmr.msra.gmra.mxu0 %v4047_v46  ;;  %4122 = vmatmul.mubr.bf16.vlgmr.msra.gmra.mxu1 %v4047_v46 }
 0xaae   : > { %4164 = vmatpush1.bf16.msra.mxu0 %v7190_v54  ;;  %4205 = vmatpush1.bf16.msra.mxu1 %v7193_v37 }
 0xaaf   : > { %4165 = vmatprep.subr.bf16.mxu0 %v7200_v6  ;;  %4206 = vmatprep.subr.bf16.mxu1 %v7203_v49 }
 0xab0   : > { %4195 = vmatprep.mubr.bf16.mxu0 %v7894_v48  ;;  %4236 = vmatprep.mubr.bf16.mxu1 %v7894_v48 }
 0xab2   : > { %4166 = vmatpush1.bf16.msra.mxu0 %v7206_v15  ;;  %4207 = vmatpush1.bf16.msra.mxu1 %v7209_v25 }
 0xab3   : > { %4167 = vmatprep.subr.bf16.mxu0 %v7216_v27  ;;  %4208 = vmatprep.subr.bf16.mxu1 %v7219_v34 }
 0xab6   : > { %4168 = vmatpush1.bf16.msra.mxu0 %v7222_v20  ;;  %4209 = vmatpush1.bf16.msra.mxu1 %v7225_v61 }
 0xab7   : > { %4169 = vmatprep.subr.bf16.mxu0 %v7232_v32  ;;  %4210 = vmatprep.subr.bf16.mxu1 %v7235_v44 }
 0xaba   : > { %4170 = vmatpush1.bf16.msra.mxu0 %v7238_v26  ;;  %4211 = vmatpush1.bf16.msra.mxu1 %v7241_v24 }
 0xabb   : > { %4171 = vmatprep.subr.bf16.mxu0 %v7248_v38  ;;  %4212 = vmatprep.subr.bf16.mxu1 %v7251_v39 }
 0xabe   : > { %4172 = vmatpush1.bf16.msra.mxu0 %v7254_v40  ;;  %4213 = vmatpush1.bf16.msra.mxu1 %v7257_v41 }
 0xabf   : > { %4173 = vmatprep.subr.bf16.mxu0 %v7264_v42  ;;  %4214 = vmatprep.subr.bf16.mxu1 %v7267_v58 }
 0xac2   : > { %4174 = vmatpush1.bf16.msra.mxu0 %v7270_v52  ;;  %4215 = vmatpush1.bf16.msra.mxu1 %v7273_v53 }
 0xac3   : > { %4175 = vmatprep.subr.bf16.mxu0 %v7280_v57  ;;  %4216 = vmatprep.subr.bf16.mxu1 %v7283_v4 }
 0xac6   : > { %4176 = vmatpush1.bf16.msra.mxu0 %v7286_v59  ;;  %4217 = vmatpush1.bf16.msra.mxu1 %v7289_v22 }
 0xac7   : > { %4177 = vmatprep.subr.bf16.mxu0 %v7292_v60  ;;  %4218 = vmatprep.subr.bf16.mxu1 %v7295_v62 }
 0xaca   : > { %4178 = vmatpush1.bf16.msra.mxu0 %v7302_v1  ;;  %4219 = vmatpush1.bf16.msra.mxu1 %v7305_v2 }
 0xacb   : > { %4278 = vmatprep.subr.bf16.mxu0 %v7184_v3  ;;  %4319 = vmatprep.subr.bf16.mxu1 %v7187_v55 }
 0xb6d   : > { %v4082_v7 = vpop.f32.mrf.mxu0  ;;  %v4123_v21 = vpop.f32.mrf.mxu1 }
 0xb6e   : > { %v4130_v18 = vadd.f32 %v4082_v7, %v3488_v5  ;;  %v4132_v33 = vadd.f32 %v4123_v21, %v3561_v47 }
 0xb6f   : > { %v4084_v12 = vpop.f32.mrf.mxu0  ;;  %v4125_v8 = vpop.f32.mrf.mxu1 }
 0xb70   : > { %v5352_v16 = vmul.f32 -1.442695, %v4130_v18  ;;  %v4131_v51 = vadd.f32 %v4084_v12, %v3490_v13  ;;  %v5354_v17 = vmul.f32 -1.442695, %v4132_v33  ;;  %v4133_v43 = vadd.f32 %v4125_v8, %v3563_v30 }
 0xb71   : > { %v4086_v10 = vpop.f32.mrf.mxu0  ;;  %v4127_v14 = vpop.f32.mrf.mxu1 }
 0xb72   : > { %5846 = vpow2.f32 %v5352_v16  ;;  %v5353_v9 = vmul.f32 -1.442695, %v4131_v51 }
 0xb73   : > { %v4087_v29 = vpop.f32.mrf.mxu0  ;;  %v4128_v36 = vpop.f32.mrf.mxu1 }
 0xb74   : > { %5848 = vpow2.f32 %v5353_v9  ;;  %v7942_v36 = vld [vmem:[#allocation22_spill] sm:$0xff] }
 0xb75   : > { %5850 = vpow2.f32 %v5354_v17  ;;  %v3494_v47 = vadd.f32 %v7942_v36, %v7416_v31 }
 0xb76   : > { %5852 = vtanh.f32 %v4133_v43 }
 0xb7f   : > { %v5847_v28 = vpop.eup %5846 }
 0xb80   : > { %v4143_v56 = vadd.f32 1.0, %v5847_v28 }
 0xb81   : > { %v5849_v45 = vpop.eup %5848 }
 0xb82   : > { %5854 = vrcp.f32 %v4143_v56  ;;  %v4144_v11 = vadd.f32 1.0, %v5849_v45  ;;  %v5851_v46 = vpop.eup %5850 }
 0xb83   : > { %v5853_v5 = vpop.eup %5852  ;;  %v4145_v50 = vadd.f32 1.0, %v5851_v46 }
 0xb84   : > { %5856 = vrcp.f32 %v4144_v11 }
 0xb85   : > { %5858 = vrcp.f32 %v4145_v50 }
 0xb8f   : > { %v5855_v7 = vpop.eup %5854 }
 0xb90   : > { %v4154_v13 = vmul.f32 %v5855_v7, %v5853_v5  ;;  %v7943_v5 = vld [vmem:[#allocation23_spill] sm:$0xff] }
 0xb91   : > { %v5857_v18 = vpop.eup %5856  ;;  %v3565_v7 = vadd.f32 %v7943_v5, %v7426_v35 }
 0xb92   : > { %v4153_v21 = vmul.f32 %v5857_v18, %v7480_v0  ;;  %v5859_v8 = vpop.eup %5858  ;;  %v7941_v0 = vld [vmem:[#allocation21_spill] sm:$0xff]  ;;  %v7944_v18 = vld [vmem:[#allocation24_spill] sm:$0xff] }
 0xb93   : > { %v3492_v14 = vadd.f32 %v7941_v0, %v7408_v23  ;;  %v3567_v50 = vadd.f32 %v7944_v18, %v7431_v63  ;;  %v7622_v18 = vld [vmem:[%s6430_s6 + $0x1e0] ss:$16 sps:$4 sm:$0xff]  }
 0xb94   : > { %v7526_v12 = vadd.f32 %v4154_v13, %v4153_v21 }
 0xb96   : > { %5860 = vtanh.f32 %v7526_v12 }
 0xba3   : > { %v5861_v16 = vpop.eup %5860 }
 0xba4   : > { %v4157_v51 = vmul.f32 %v5861_v16, %v5859_v8 }
 0xba6   : > { %v4162_v10 = vpack.c.bf16 %v4157_v51, %v4157_v51 }
 0xba8   : > { %4196 = vmatmul.mubr.bf16.vlgmr.msra.gmra.mxu0 %v4162_v10  ;;  %4237 = vmatmul.mubr.bf16.vlgmr.msra.gmra.mxu1 %v4162_v10 }
 0xba9   : > { %4279 = vmatpush1.bf16.msra.mxu0 %v7190_v54  ;;  %4320 = vmatpush1.bf16.msra.mxu1 %v7193_v37 }
 0xbaa   : > { %4280 = vmatprep.subr.bf16.mxu0 %v7200_v6  ;;  %4321 = vmatprep.subr.bf16.mxu1 %v7203_v49 }
 0xbab   : > { %4310 = vmatprep.mubr.bf16.mxu0 %v7894_v48  ;;  %4351 = vmatprep.mubr.bf16.mxu1 %v7894_v48 }
 0xbad   : > { %4281 = vmatpush1.bf16.msra.mxu0 %v7206_v15  ;;  %4322 = vmatpush1.bf16.msra.mxu1 %v7209_v25 }
 0xbae   : > { %4282 = vmatprep.subr.bf16.mxu0 %v7216_v27  ;;  %4323 = vmatprep.subr.bf16.mxu1 %v7219_v34 }
 0xbb1   : > { %4283 = vmatpush1.bf16.msra.mxu0 %v7222_v20  ;;  %4324 = vmatpush1.bf16.msra.mxu1 %v7225_v61 }
 0xbb2   : > { %4284 = vmatprep.subr.bf16.mxu0 %v7232_v32  ;;  %4325 = vmatprep.subr.bf16.mxu1 %v7235_v44 }
 0xbb5   : > { %4285 = vmatpush1.bf16.msra.mxu0 %v7238_v26  ;;  %4326 = vmatpush1.bf16.msra.mxu1 %v7241_v24 }
 0xbb6   : > { %4286 = vmatprep.subr.bf16.mxu0 %v7248_v38  ;;  %4327 = vmatprep.subr.bf16.mxu1 %v7251_v39 }
 0xbb9   : > { %4287 = vmatpush1.bf16.msra.mxu0 %v7254_v40  ;;  %4328 = vmatpush1.bf16.msra.mxu1 %v7257_v41 }
 0xbba   : > { %4288 = vmatprep.subr.bf16.mxu0 %v7264_v42  ;;  %4329 = vmatprep.subr.bf16.mxu1 %v7267_v58 }
 0xbbd   : > { %4289 = vmatpush1.bf16.msra.mxu0 %v7270_v52  ;;  %4330 = vmatpush1.bf16.msra.mxu1 %v7273_v53 }
 0xbbe   : > { %4290 = vmatprep.subr.bf16.mxu0 %v7280_v57  ;;  %4331 = vmatprep.subr.bf16.mxu1 %v7283_v4 }
 0xbc1   : > { %4291 = vmatpush1.bf16.msra.mxu0 %v7286_v59  ;;  %4332 = vmatpush1.bf16.msra.mxu1 %v7289_v22 }
 0xbc2   : > { %4292 = vmatprep.subr.bf16.mxu0 %v7292_v60  ;;  %4333 = vmatprep.subr.bf16.mxu1 %v7295_v62 }
 0xbc5   : > { %4293 = vmatpush1.bf16.msra.mxu0 %v7302_v1  ;;  %4334 = vmatpush1.bf16.msra.mxu1 %v7305_v2 }
 0xbc6   : > { %4393 = vmatprep.subr.bf16.mxu0 %v7184_v3  ;;  %4434 = vmatprep.subr.bf16.mxu1 %v7187_v55 }
 0xc68   : > { %v4197_v9 = vpop.f32.mrf.mxu0  ;;  %v4238_v29 = vpop.f32.mrf.mxu1 }
 0xc69   : > { %v4245_v33 = vadd.f32 %v4197_v9, %v3492_v14  ;;  %v4247_v13 = vadd.f32 %v4238_v29, %v3565_v7 }
 0xc6a   : > { %v4199_v19 = vpop.f32.mrf.mxu0  ;;  %v4240_v30 = vpop.f32.mrf.mxu1 }
 0xc6b   : > { %v5355_v17 = vmul.f32 -1.442695, %v4245_v33  ;;  %v4246_v43 = vadd.f32 %v4199_v19, %v3494_v47  ;;  %v5357_v21 = vmul.f32 -1.442695, %v4247_v13  ;;  %v4248_v8 = vadd.f32 %v4240_v30, %v3567_v50  ;;  %v7626_v50 = vld [vmem:[%s6430_s6 + $0x1e8] ss:$16 sps:$4 sm:$0xff]  }
 0xc6c   : > { %v4201_v28 = vpop.f32.mrf.mxu0  ;;  %v4242_v56 = vpop.f32.mrf.mxu1 }
 0xc6d   : > { %5862 = vpow2.f32 %v5355_v17  ;;  %v5356_v45 = vmul.f32 -1.442695, %v4246_v43 }
 0xc6e   : > { %v4202_v11 = vpop.f32.mrf.mxu0  ;;  %v4243_v46 = vpop.f32.mrf.mxu1 }
 0xc6f   : > { %5864 = vpow2.f32 %v5356_v45 }
 0xc70   : > { %5866 = vpow2.f32 %v5357_v21  ;;  %v7630_v21 = vld [vmem:[%s6430_s6 + $0x1c4] ss:$16 sps:$4 sm:$0xff]  }
 0xc71   : > { %5868 = vtanh.f32 %v4248_v8  ;;  %v7634_v8 = vld [vmem:[%s6430_s6 + $0x1cc] ss:$16 sps:$4 sm:$0xff]  }
 0xc7a   : > { %v5863_v16 = vpop.eup %5862 }
 0xc7b   : > { %v4258_v51 = vadd.f32 1.0, %v5863_v16  ;;  %v7640_v16 = vld [vmem:[%s6430_s6 + $0x1c0] ss:$16 sps:$4 sm:$0xff]  }
 0xc7c   : > { %v5865_v10 = vpop.eup %5864 }
 0xc7d   : > { %5870 = vrcp.f32 %v4258_v51  ;;  %v4259_v0 = vadd.f32 1.0, %v5865_v10  ;;  %v5867_v14 = vpop.eup %5866  ;;  %v7644_v51 = vld [vmem:[%s6430_s6 + $0x1c8] ss:$16 sps:$4 sm:$0xff]   ;;  %v7648_v10 = vld [vmem:[%s6430_s6 + $0x1a4] ss:$16 sps:$4 sm:$0xff]  }
 0xc7e   : > { %v5869_v9 = vpop.eup %5868  ;;  %v4260_v19 = vadd.f32 1.0, %v5867_v14  ;;  %v7656_v14 = vld [vmem:[%s6430_s6 + $0x1a0] ss:$16 sps:$4 sm:$0xff]  }
 0xc7f   : > { %5872 = vrcp.f32 %v4259_v0  ;;  %v7652_v0 = vld [vmem:[%s6430_s6 + $0x1ac] ss:$16 sps:$4 sm:$0xff]  }
 0xc80   : > { %5874 = vrcp.f32 %v4260_v19  ;;  %v7676_v19 = vld [vmem:[%s6430_s6 + $0x188] ss:$16 sps:$4 sm:$0xff]  }
 0xc8a   : > { %v5871_v36 = vpop.eup %5870 }
 0xc8b   : > { %v4269_v47 = vmul.f32 %v5871_v36, %v5869_v9  ;;  %v7660_v9 = vld [vmem:[%s6430_s6 + $0x1a8] ss:$16 sps:$4 sm:$0xff]   ;;  %v7664_v36 = vld [vmem:[%s6430_s6 + $0x184] ss:$16 sps:$4 sm:$0xff]  }
 0xc8c   : > { %v5873_v33 = vpop.eup %5872 }
 0xc8d   : > { %v4268_v29 = vmul.f32 %v5873_v33, %v7526_v12  ;;  %v5875_v30 = vpop.eup %5874  ;;  %v7672_v33 = vld [vmem:[%s6430_s6 + $0x180] ss:$16 sps:$4 sm:$0xff]  }
 0xc8f   : > { %v7572_v17 = vadd.f32 %v4269_v47, %v4268_v29  ;;  %v7668_v47 = vld [vmem:[%s6430_s6 + $0x18c] ss:$16 sps:$4 sm:$0xff]   ;;  %v7680_v29 = vld [vmem:[%s6430_s6 + $0x164] ss:$16 sps:$4 sm:$0xff]  }
 0xc91   : > { %5876 = vtanh.f32 %v7572_v17 }
 0xc9e   : > { %v5877_v43 = vpop.eup %5876 }
 0xc9f   : > { %v4272_v28 = vmul.f32 %v5877_v43, %v5875_v30  ;;  %v7688_v30 = vld [vmem:[%s6430_s6 + $0x160] ss:$16 sps:$4 sm:$0xff]   ;;  %v7692_v43 = vld [vmem:[%s6430_s6 + $0x168] ss:$16 sps:$4 sm:$0xff]  }
 0xca1   : > { %v4277_v56 = vpack.c.bf16 %v4272_v28, %v4272_v28  ;;  %v7696_v28 = vld [vmem:[%s6430_s6 + $0x144] ss:$16 sps:$4 sm:$0xff]  }
 0xca3   : > { %4311 = vmatmul.mubr.bf16.vlgmr.msra.gmra.mxu0 %v4277_v56  ;;  %4352 = vmatmul.mubr.bf16.vlgmr.msra.gmra.mxu1 %v4277_v56  ;;  %v7700_v56 = vld [vmem:[%s6430_s6 + $0x14c] ss:$16 sps:$4 sm:$0xff]  }
 0xca4   : > { %4394 = vmatpush1.bf16.msra.mxu0 %v7190_v54  ;;  %4435 = vmatpush1.bf16.msra.mxu1 %v7193_v37  ;;  %v7945_v54 = vld [vmem:[#allocation25_spill] sm:$0xff] }
 0xca5   : > { %4395 = vmatprep.subr.bf16.mxu0 %v7200_v6  ;;  %4436 = vmatprep.subr.bf16.mxu1 %v7203_v49  ;;  %v3498_v37 = vadd.f32 %v7945_v54, %v7408_v23  ;;  %v7704_v54 = vld [vmem:[%s6430_s6 + $0x140] ss:$16 sps:$4 sm:$0xff]  }
 0xca6   : > { %4425 = vmatprep.mubr.bf16.mxu0 %v7894_v48  ;;  %4466 = vmatprep.mubr.bf16.mxu1 %v7894_v48 }
 0xca8   : > { %4396 = vmatpush1.bf16.msra.mxu0 %v7206_v15  ;;  %4437 = vmatpush1.bf16.msra.mxu1 %v7209_v25  ;;  %v7946_v15 = vld [vmem:[#allocation26_spill] sm:$0xff] }
 0xca9   : > { %4397 = vmatprep.subr.bf16.mxu0 %v7216_v27  ;;  %4438 = vmatprep.subr.bf16.mxu1 %v7219_v34  ;;  %v3500_v25 = vadd.f32 %v7946_v15, %v7416_v31  ;;  %v7720_v15 = vld [vmem:[%s6430_s6 + $0x120] ss:$16 sps:$4 sm:$0xff]  }
 0xcac   : > { %4398 = vmatpush1.bf16.msra.mxu0 %v7222_v20  ;;  %4439 = vmatpush1.bf16.msra.mxu1 %v7225_v61 }
 0xcad   : > { %4399 = vmatprep.subr.bf16.mxu0 %v7232_v32  ;;  %4440 = vmatprep.subr.bf16.mxu1 %v7235_v44 }
 0xcb0   : > { %4400 = vmatpush1.bf16.msra.mxu0 %v7238_v26  ;;  %4441 = vmatpush1.bf16.msra.mxu1 %v7241_v24 }
 0xcb1   : > { %4401 = vmatprep.subr.bf16.mxu0 %v7248_v38  ;;  %4442 = vmatprep.subr.bf16.mxu1 %v7251_v39 }
 0xcb4   : > { %4402 = vmatpush1.bf16.msra.mxu0 %v7254_v40  ;;  %4443 = vmatpush1.bf16.msra.mxu1 %v7257_v41  ;;  %v7948_v41 = vld [vmem:[#allocation28_spill] sm:$0xff] }
 0xcb5   : > { %4403 = vmatprep.subr.bf16.mxu0 %v7264_v42  ;;  %4444 = vmatprep.subr.bf16.mxu1 %v7267_v58  ;;  %v3573_v42 = vadd.f32 %v7948_v41, %v7431_v63 }
 0xcb8   : > { %4404 = vmatpush1.bf16.msra.mxu0 %v7270_v52  ;;  %4445 = vmatpush1.bf16.msra.mxu1 %v7273_v53 }
 0xcb9   : > { %4405 = vmatprep.subr.bf16.mxu0 %v7280_v57  ;;  %4446 = vmatprep.subr.bf16.mxu1 %v7283_v4 }
 0xcbc   : > { %4406 = vmatpush1.bf16.msra.mxu0 %v7286_v59  ;;  %4447 = vmatpush1.bf16.msra.mxu1 %v7289_v22 }
 0xcbd   : > { %4407 = vmatprep.subr.bf16.mxu0 %v7292_v60  ;;  %4448 = vmatprep.subr.bf16.mxu1 %v7295_v62 }
 0xcc0   : > { %4408 = vmatpush1.bf16.msra.mxu0 %v7302_v1  ;;  %4449 = vmatpush1.bf16.msra.mxu1 %v7305_v2 }
 0xcc1   : > { %4508 = vmatprep.subr.bf16.mxu0 %v7184_v3  ;;  %4549 = vmatprep.subr.bf16.mxu1 %v7187_v55  ;;  %v7947_v55 = vld [vmem:[#allocation27_spill] sm:$0xff] }
 0xcc2   : > { %v3571_v39 = vadd.f32 %v7947_v55, %v7426_v35  ;;  %v7950_v55 = vld [vmem:[#allocation30_spill] sm:$0xff] }
 0xd63   : > { %v4312_v6 = vpop.f32.mrf.mxu0  ;;  %v4353_v49 = vpop.f32.mrf.mxu1 }
 0xd64   : > { %v4360_v27 = vadd.f32 %v4312_v6, %v3498_v37  ;;  %v4362_v40 = vadd.f32 %v4353_v49, %v3571_v39  ;;  %v7708_v37 = vld [vmem:[%s6430_s6 + $0x148] ss:$16 sps:$4 sm:$0xff]   ;;  %v7712_v6 = vld [vmem:[%s6430_s6 + $0x124] ss:$16 sps:$4 sm:$0xff]   ;;  %v7716_v49 = vld [vmem:[%s6430_s6 + $0x12c] ss:$16 sps:$4 sm:$0xff]   ;;  %v3504_v39 = vadd.f32 %v7950_v55, %v7416_v31 }
 0xd65   : > { %v4314_v34 = vpop.f32.mrf.mxu0  ;;  %v4355_v20 = vpop.f32.mrf.mxu1 }
 0xd66   : > { %v5358_v61 = vmul.f32 -1.442695, %v4360_v27  ;;  %v4361_v32 = vadd.f32 %v4314_v34, %v3500_v25  ;;  %v5360_v58 = vmul.f32 -1.442695, %v4362_v40  ;;  %v4363_v52 = vadd.f32 %v4355_v20, %v3573_v42  ;;  %v7724_v25 = vld [vmem:[%s6430_s6 + $0x128] ss:$16 sps:$4 sm:$0xff]  }
 0xd67   : > { %v4316_v44 = vpop.f32.mrf.mxu0  ;;  %v4357_v26 = vpop.f32.mrf.mxu1  ;;  %v7728_v27 = vld [vmem:[%s6430_s6 + $0x104] ss:$16 sps:$4 sm:$0xff]   ;;  %v7732_v34 = vld [vmem:[%s6430_s6 + $0x10c] ss:$16 sps:$4 sm:$0xff]   ;;  %v7736_v20 = vld [vmem:[%s6430_s6 + $0x100] ss:$16 sps:$4 sm:$0xff]  }
 0xd68   : > { %5878 = vpow2.f32 %v5358_v61  ;;  %v5359_v24 = vmul.f32 -1.442695, %v4361_v32  ;;  %v7740_v61 = vld [vmem:[%s6430_s6 + $0x108] ss:$16 sps:$4 sm:$0xff]   ;;  %v5972_v32 = vld [vmem:[%s6430_s6 + $0x1e4] ss:$16 sps:$4 sm:$0xff]  }
 0xd69   : > { %v4317_v3 = vpop.f32.mrf.mxu0  ;;  %v4358_v38 = vpop.f32.mrf.mxu1  ;;  %v5973_v44 = vld [vmem:[%s6430_s6 + $0x1ec] ss:$16 sps:$4 sm:$0xff]   ;;  %v7949_v26 = vld [vmem:[#allocation29_spill] sm:$0xff] }
 0xd6a   : > { %5880 = vpow2.f32 %v5359_v24  ;;  %v3502_v24 = vadd.f32 %v7949_v26, %v7408_v23 }
 0xd6b   : > { %5882 = vpow2.f32 %v5360_v58 }
 0xd6c   : > { %5884 = vtanh.f32 %v4363_v52 }
 0xd75   : > { %v5879_v53 = vpop.eup %5878 }
 0xd76   : > { %v4373_v57 = vadd.f32 1.0, %v5879_v53 }
 0xd77   : > { %v5881_v4 = vpop.eup %5880 }
 0xd78   : > { %5886 = vrcp.f32 %v4373_v57  ;;  %v4374_v59 = vadd.f32 1.0, %v5881_v4  ;;  %v5883_v22 = vpop.eup %5882 }
 0xd79   : > { %v5885_v60 = vpop.eup %5884  ;;  %v4375_v12 = vadd.f32 1.0, %v5883_v22 }
 0xd7a   : > { %5888 = vrcp.f32 %v4374_v59 }
 0xd7b   : > { %5890 = vrcp.f32 %v4375_v12 }
 0xd85   : > { %v5887_v62 = vpop.eup %5886 }
 0xd86   : > { %v4384_v1 = vmul.f32 %v5887_v62, %v5885_v60  ;;  %v7951_v60 = vld [vmem:[#allocation31_spill] sm:$0xff] }
 0xd87   : > { %v5889_v2 = vpop.eup %5888  ;;  %v3575_v62 = vadd.f32 %v7951_v60, %v7426_v35 }
 0xd88   : > { %v4383_v45 = vmul.f32 %v5889_v2, %v7572_v17  ;;  %v5891_v46 = vpop.eup %5890  ;;  %v7684_v17 = vld [vmem:[%s6430_s6 + $0x16c] ss:$16 sps:$4 sm:$0xff]  }
 0xd89   : > { %v7952_v2 = vld [vmem:[#allocation32_spill] sm:$0xff] }
 0xd8a   : > { %v7618_v11 = vadd.f32 %v4384_v1, %v4383_v45  ;;  %v3577_v12 = vadd.f32 %v7952_v2, %v7431_v63 }
 0xd8c   : > { %5892 = vtanh.f32 %v7618_v11 }
 0xd99   : > { %v5893_v5 = vpop.eup %5892 }
 0xd9a   : > { %v4387_v7 = vmul.f32 %v5893_v5, %v5891_v46 }
 0xd9c   : > { %v4392_v13 = vpack.c.bf16 %v4387_v7, %v4387_v7 }
 0xd9e   : > { %4426 = vmatmul.mubr.bf16.vlgmr.msra.gmra.mxu0 %v4392_v13  ;;  %4467 = vmatmul.mubr.bf16.vlgmr.msra.gmra.mxu1 %v4392_v13 }
 0xd9f   : > { %4509 = vmatpush1.bf16.msra.mxu0 %v7622_v18  ;;  %4550 = vmatpush1.bf16.msra.mxu1 %v7626_v50 }
 0xda0   : > { %4510 = vmatprep.subr.bf16.mxu0 %v7630_v21  ;;  %4551 = vmatprep.subr.bf16.mxu1 %v7634_v8 }
 0xda1   : > { %4540 = vmatprep.mubr.bf16.mxu0 %v7894_v48  ;;  %4581 = vmatprep.mubr.bf16.mxu1 %v7894_v48 }
 0xda3   : > { %4511 = vmatpush1.bf16.msra.mxu0 %v7640_v16  ;;  %4552 = vmatpush1.bf16.msra.mxu1 %v7644_v51 }
 0xda4   : > { %4512 = vmatprep.subr.bf16.mxu0 %v7648_v10  ;;  %4553 = vmatprep.subr.bf16.mxu1 %v7652_v0 }
 0xda7   : > { %4513 = vmatpush1.bf16.msra.mxu0 %v7656_v14  ;;  %4554 = vmatpush1.bf16.msra.mxu1 %v7660_v9 }
 0xda8   : > { %4514 = vmatprep.subr.bf16.mxu0 %v7664_v36  ;;  %4555 = vmatprep.subr.bf16.mxu1 %v7668_v47 }
 0xdab   : > { %4515 = vmatpush1.bf16.msra.mxu0 %v7672_v33  ;;  %4556 = vmatpush1.bf16.msra.mxu1 %v7676_v19 }
 0xdac   : > { %4516 = vmatprep.subr.bf16.mxu0 %v7680_v29  ;;  %4557 = vmatprep.subr.bf16.mxu1 %v7684_v17 }
 0xdaf   : > { %4517 = vmatpush1.bf16.msra.mxu0 %v7688_v30  ;;  %4558 = vmatpush1.bf16.msra.mxu1 %v7692_v43 }
 0xdb0   : > { %4518 = vmatprep.subr.bf16.mxu0 %v7696_v28  ;;  %4559 = vmatprep.subr.bf16.mxu1 %v7700_v56 }
 0xdb3   : > { %4519 = vmatpush1.bf16.msra.mxu0 %v7704_v54  ;;  %4560 = vmatpush1.bf16.msra.mxu1 %v7708_v37 }
 0xdb4   : > { %4520 = vmatprep.subr.bf16.mxu0 %v7712_v6  ;;  %4561 = vmatprep.subr.bf16.mxu1 %v7716_v49 }
 0xdb7   : > { %4521 = vmatpush1.bf16.msra.mxu0 %v7720_v15  ;;  %4562 = vmatpush1.bf16.msra.mxu1 %v7724_v25 }
 0xdb8   : > { %4522 = vmatprep.subr.bf16.mxu0 %v7728_v27  ;;  %4563 = vmatprep.subr.bf16.mxu1 %v7732_v34 }
 0xdbb   : > { %4523 = vmatpush1.bf16.msra.mxu0 %v7736_v20  ;;  %4564 = vmatpush1.bf16.msra.mxu1 %v7740_v61 }
 0xdbc   : > { %4623 = vmatprep.subr.bf16.mxu0 %v5972_v32  ;;  %4664 = vmatprep.subr.bf16.mxu1 %v5973_v44 }
 0xe5e   : > { %v4427_v3 = vpop.f32.mrf.mxu0  ;;  %v4468_v38 = vpop.f32.mrf.mxu1 }
 0xe5f   : > { %v4475_v40 = vadd.f32 %v4427_v3, %v3502_v24  ;;  %v4477_v1 = vadd.f32 %v4468_v38, %v3575_v62 }
 0xe60   : > { %v4429_v41 = vpop.f32.mrf.mxu0  ;;  %v4470_v42 = vpop.f32.mrf.mxu1 }
 0xe61   : > { %v5361_v58 = vmul.f32 -1.442695, %v4475_v40  ;;  %v4476_v52 = vadd.f32 %v4429_v41, %v3504_v39  ;;  %v5363_v45 = vmul.f32 -1.442695, %v4477_v1  ;;  %v4478_v5 = vadd.f32 %v4470_v42, %v3577_v12  ;;  %v7957_v1 = vld [vmem:[#allocation37_spill] sm:$0xff] }
 0xe62   : > { %v4431_v53 = vpop.f32.mrf.mxu0  ;;  %v4472_v57 = vpop.f32.mrf.mxu1  ;;  %v3512_v2 = vadd.f32 %v7957_v1, %v7408_v23 }
 0xe63   : > { %5894 = vpow2.f32 %v5361_v58  ;;  %v5362_v4 = vmul.f32 -1.442695, %v4476_v52 }
 0xe64   : > { %v4432_v59 = vpop.f32.mrf.mxu0  ;;  %v4473_v22 = vpop.f32.mrf.mxu1 }
 0xe65   : > { %5896 = vpow2.f32 %v5362_v4 }
 0xe66   : > { %5898 = vpow2.f32 %v5363_v45 }
 0xe70   : > { %v5895_v46 = vpop.eup %5894 }
 0xe71   : > { %v4488_v7 = vadd.f32 1.0, %v5895_v46  ;;  %v7958_v46 = vld [vmem:[#allocation19_spill] sm:$0xff] }
 0xe72   : > { %v5897_v13 = vpop.eup %5896 }
 0xe73   : > { %5900 = vrcp.f32 %v4488_v7  ;;  %v4489_v32 = vadd.f32 1.0, %v5897_v13  ;;  %v5899_v44 = vpop.eup %5898 }
 0xe74   : > { %5902 = vtanh.f32 %v4478_v5  ;;  %v4490_v55 = vadd.f32 1.0, %v5899_v44  ;;  %v3514_v5 = vadd.f32 %v7958_v46, %v7416_v31 }
 0xe75   : > { %5904 = vrcp.f32 %v4489_v32 }
 0xe76   : > { %5906 = vrcp.f32 %v4490_v55 }
 0xe80   : > { %v5901_v26 = vpop.eup %5900 }
 0xe81   : > { %v5903_v24 = vpop.eup %5902 }
 0xe82   : > { %v5905_v3 = vpop.eup %5904  ;;  %v4499_v39 = vmul.f32 %v5903_v24, %v5901_v26 }
 0xe83   : > { %v4498_v38 = vmul.f32 %v5905_v3, %v7618_v11  ;;  %v5907_v41 = vpop.eup %5906 }
 0xe85   : > { %v7754_v40 = vadd.f32 %v4499_v39, %v4498_v38 }
 0xe87   : > { %5908 = vtanh.f32 %v7754_v40 }
 0xe94   : > { %v5909_v42 = vpop.eup %5908 }
 0xe95   : > { %v4502_v58 = vmul.f32 %v5909_v42, %v5907_v41  ;;  %v7960_v42 = vld [vmem:[#allocation39_spill] sm:$0xff] }
 0xe97   : > { %v4507_v52 = vpack.c.bf16 %v4502_v58, %v4502_v58  ;;  %v3587_v58 = vadd.f32 %v7960_v42, %v7431_v63 }
 0xe99   : > { %4541 = vmatmul.mubr.bf16.vlgmr.msra.gmra.mxu0 %v4507_v52  ;;  %4582 = vmatmul.mubr.bf16.vlgmr.msra.gmra.mxu1 %v4507_v52 }
 0xe9a   : > { %4624 = vmatpush1.bf16.msra.mxu0 %v7622_v18  ;;  %4665 = vmatpush1.bf16.msra.mxu1 %v7626_v50 }
 0xe9b   : > { %4625 = vmatprep.subr.bf16.mxu0 %v7630_v21  ;;  %4666 = vmatprep.subr.bf16.mxu1 %v7634_v8  ;;  %v7954_v21 = vld [vmem:[#allocation34_spill] sm:$0xff] }
 0xe9c   : > { %4655 = vmatprep.mubr.bf16.mxu0 %v7894_v48  ;;  %4696 = vmatprep.mubr.bf16.mxu1 %v7894_v48  ;;  %v7953_v48 = vld [vmem:[#allocation33_spill] sm:$0xff]  ;;  %v3510_v8 = vadd.f32 %v7954_v21, %v7416_v31 }
 0xe9d   : > { %v3508_v11 = vadd.f32 %v7953_v48, %v7408_v23 }
 0xe9e   : > { %4626 = vmatpush1.bf16.msra.mxu0 %v7640_v16  ;;  %4667 = vmatpush1.bf16.msra.mxu1 %v7644_v51 }
 0xe9f   : > { %4627 = vmatprep.subr.bf16.mxu0 %v7648_v10  ;;  %4668 = vmatprep.subr.bf16.mxu1 %v7652_v0 }
 0xea2   : > { %4628 = vmatpush1.bf16.msra.mxu0 %v7656_v14  ;;  %4669 = vmatpush1.bf16.msra.mxu1 %v7660_v9 }
 0xea3   : > { %4629 = vmatprep.subr.bf16.mxu0 %v7664_v36  ;;  %4670 = vmatprep.subr.bf16.mxu1 %v7668_v47 }
 0xea6   : > { %4630 = vmatpush1.bf16.msra.mxu0 %v7672_v33  ;;  %4671 = vmatpush1.bf16.msra.mxu1 %v7676_v19 }
 0xea7   : > { %4631 = vmatprep.subr.bf16.mxu0 %v7680_v29  ;;  %4672 = vmatprep.subr.bf16.mxu1 %v7684_v17  ;;  %v7955_v29 = vld [vmem:[#allocation35_spill] sm:$0xff] }
 0xea8   : > { %v3581_v17 = vadd.f32 %v7955_v29, %v7426_v35 }
 0xeaa   : > { %4632 = vmatpush1.bf16.msra.mxu0 %v7688_v30  ;;  %4673 = vmatpush1.bf16.msra.mxu1 %v7692_v43  ;;  %v7956_v43 = vld [vmem:[#allocation36_spill] sm:$0xff] }
 0xeab   : > { %4633 = vmatprep.subr.bf16.mxu0 %v7696_v28  ;;  %4674 = vmatprep.subr.bf16.mxu1 %v7700_v56  ;;  %v3583_v28 = vadd.f32 %v7956_v43, %v7431_v63 }
 0xeae   : > { %4634 = vmatpush1.bf16.msra.mxu0 %v7704_v54  ;;  %4675 = vmatpush1.bf16.msra.mxu1 %v7708_v37 }
 0xeaf   : > { %4635 = vmatprep.subr.bf16.mxu0 %v7712_v6  ;;  %4676 = vmatprep.subr.bf16.mxu1 %v7716_v49 }
 0xeb2   : > { %4636 = vmatpush1.bf16.msra.mxu0 %v7720_v15  ;;  %4677 = vmatpush1.bf16.msra.mxu1 %v7724_v25 }
 0xeb3   : > { %4637 = vmatprep.subr.bf16.mxu0 %v7728_v27  ;;  %4678 = vmatprep.subr.bf16.mxu1 %v7732_v34 }
 0xeb6   : > { %4638 = vmatpush1.bf16.msra.mxu0 %v7736_v20  ;;  %4679 = vmatpush1.bf16.msra.mxu1 %v7740_v61 }
 0xf59   : > { %v4542_v18 = vpop.f32.mrf.mxu0  ;;  %v4583_v50 = vpop.f32.mrf.mxu1 }
 0xf5a   : > { %v4590_v16 = vadd.f32 %v4542_v18, %v3508_v11  ;;  %v4592_v30 = vadd.f32 %v4583_v50, %v3581_v17 }
 0xf5b   : > { %v4544_v51 = vpop.f32.mrf.mxu0  ;;  %v4585_v10 = vpop.f32.mrf.mxu1 }
 0xf5c   : > { %v5364_v0 = vmul.f32 -1.442695, %v4590_v16  ;;  %v4591_v14 = vadd.f32 %v4544_v51, %v3510_v8  ;;  %v5366_v56 = vmul.f32 -1.442695, %v4592_v30  ;;  %v4593_v54 = vadd.f32 %v4585_v10, %v3583_v28 }
 0xf5d   : > { %v4546_v9 = vpop.f32.mrf.mxu0  ;;  %v4587_v36 = vpop.f32.mrf.mxu1 }
 0xf5e   : > { %5910 = vpow2.f32 %v5364_v0  ;;  %v5365_v47 = vmul.f32 -1.442695, %v4591_v14 }
 0xf5f   : > { %v4547_v33 = vpop.f32.mrf.mxu0  ;;  %v4588_v19 = vpop.f32.mrf.mxu1 }
 0xf60   : > { %5912 = vpow2.f32 %v5365_v47 }
 0xf61   : > { %5914 = vpow2.f32 %v5366_v56 }
 0xf62   : > { %5916 = vtanh.f32 %v4593_v54 }
 0xf6b   : > { %v5911_v37 = vpop.eup %5910 }
 0xf6c   : > { %v4603_v6 = vadd.f32 1.0, %v5911_v37 }
 0xf6d   : > { %v5913_v49 = vpop.eup %5912 }
 0xf6e   : > { %5918 = vrcp.f32 %v4603_v6  ;;  %v4604_v15 = vadd.f32 1.0, %v5913_v49  ;;  %v5915_v25 = vpop.eup %5914 }
 0xf6f   : > { %v5917_v27 = vpop.eup %5916  ;;  %v4605_v53 = vadd.f32 1.0, %v5915_v25 }
 0xf70   : > { %5920 = vrcp.f32 %v4604_v15 }
 0xf71   : > { %5922 = vrcp.f32 %v4605_v53 }
 0xf7b   : > { %v5919_v34 = vpop.eup %5918 }
 0xf7c   : > { %v4614_v20 = vmul.f32 %v5919_v34, %v5917_v27 }
 0xf7d   : > { %v5921_v61 = vpop.eup %5920 }
 0xf7e   : > { %v4613_v57 = vmul.f32 %v5921_v61, %v7754_v40  ;;  %v5923_v59 = vpop.eup %5922  ;;  %v7959_v40 = vld [vmem:[#allocation38_spill] sm:$0xff] }
 0xf7f   : > { %v3585_v23 = vadd.f32 %v7959_v40, %v7426_v35 }
 0xf80   : > { %v4615_v4 = vadd.f32 %v4614_v20, %v4613_v57 }
 0xf82   : > { %5924 = vtanh.f32 %v4615_v4 }
 0xf8f   : > { %v5925_v22 = vpop.eup %5924 }
 0xf90   : > { %v4617_v60 = vmul.f32 %v5925_v22, %v5923_v59 }
 0xf92   : > { %v4622_v62 = vpack.c.bf16 %v4617_v60, %v4617_v60 }
 0xf94   : > { %4656 = vmatmul.mubr.bf16.vlgmr.msra.gmra.mxu0 %v4622_v62  ;;  %4697 = vmatmul.mubr.bf16.vlgmr.msra.gmra.mxu1 %v4622_v62 }
0x1054   : > { %v4657_v12 = vpop.f32.mrf.mxu0  ;;  %v4698_v45 = vpop.f32.mrf.mxu1 }
0x1055   : > { %v4705_v7 = vadd.f32 %v4657_v12, %v3512_v2  ;;  %v4707_v41 = vadd.f32 %v4698_v45, %v3585_v23 }
0x1056   : > { %v4659_v13 = vpop.f32.mrf.mxu0  ;;  %v4700_v32 = vpop.f32.mrf.mxu1 }
0x1057   : > { %v5367_v44 = vmul.f32 -1.442695, %v4705_v7  ;;  %v4706_v26 = vadd.f32 %v4659_v13, %v3514_v5  ;;  %v5369_v31 = vmul.f32 -1.442695, %v4707_v41  ;;  %v4708_v52 = vadd.f32 %v4700_v32, %v3587_v58 }
0x1058   : > { %v4661_v24 = vpop.f32.mrf.mxu0  ;;  %v4702_v3 = vpop.f32.mrf.mxu1 }
0x1059   : > { %5926 = vpow2.f32 %v5367_v44  ;;  %v5368_v55 = vmul.f32 -1.442695, %v4706_v26 }
0x105a   : > { %v4662_v38 = vpop.f32.mrf.mxu0  ;;  %v4703_v39 = vpop.f32.mrf.mxu1 }
0x105b   : > { %5928 = vpow2.f32 %v5368_v55 }
0x105c   : > { %5930 = vpow2.f32 %v5369_v31 }
0x105d   : > { %5932 = vtanh.f32 %v4708_v52 }
0x1066   : > { %v5927_v48 = vpop.eup %5926 }
0x1067   : > { %v4718_v11 = vadd.f32 1.0, %v5927_v48 }
0x1068   : > { %v5929_v18 = vpop.eup %5928 }
0x1069   : > { %5934 = vrcp.f32 %v4718_v11  ;;  %v4719_v50 = vadd.f32 1.0, %v5929_v18  ;;  %v5931_v21 = vpop.eup %5930 }
0x106a   : > { %v5933_v8 = vpop.eup %5932  ;;  %v4720_v10 = vadd.f32 1.0, %v5931_v21 }
0x106b   : > { %5936 = vrcp.f32 %v4719_v50 }
0x106c   : > { %5938 = vrcp.f32 %v4720_v10 }
0x1076   : > { %v5935_v16 = vpop.eup %5934 }
0x1077   : > { %v4729_v35 = vmul.f32 %v5935_v16, %v5933_v8 }
0x1078   : > { %v5937_v51 = vpop.eup %5936 }
0x1079   : > { %v4728_v63 = vmul.f32 %v5937_v51, %v4615_v4  ;;  %v5939_v14 = vpop.eup %5938 }
0x107b   : > { %v4730_v0 = vadd.f32 %v4729_v35, %v4728_v63 }
0x107d   : > { %5940 = vtanh.f32 %v4730_v0 }
0x108a   : > { %v5941_v9 = vpop.eup %5940 }
0x108b   : > { %v4732_v36 = vmul.f32 %v5941_v9, %v5939_v14 }
0x108d   : > { %4733 = vst [vmem:[%s332_s17] sm:$0xff] %v4732_v36 }
0x108e   : > { %6099 = shalt.err (!%p6096_p3)
}
0x108f   : > { %s6100_s30 = scalar_lea.hbm %s4746_s1, 128  ;;  %s6104_s28 = scalar_lea.hbm %s7846_s4, 384 }
0x1090   : > { %p6101_p4 = scmp.ne.s32.totalorder %s4746_s1, %s6100_s30  ;;  %p6105_p11 = scmp.lt.s32.totalorder %s4746_s1, %s7846_s4 }
0x1091   : > { %p6106_p0 = scmp.lt.s32.totalorder %s6104_s28, %s6100_s30 }
0x1092   : > { %p6102_p5 = pnand %p6101_p4, %p7961_p9 }
0x1093   : > { %p6107_p8 = por %p6106_p0, %p6105_p11 }
0x1094   : > { %p6103_p7 = pneg %p6102_p5 }
0x1096   : > { %p6108_p12 = pnand %p6107_p8, %p6103_p7 }
0x1098   : > { %6111 = shalt.err (!%p6108_p12)
}
0x1099   : > { %5386 = dma.vmem_to_hbm [thread:$0]  (%p7961_p9), %s4749_s5, 128, %s4746_s1, %s4735_s22  }
0x109a PF: > { %p5406_p13 = scmp.ge.s32.totalorder %s6158_s18, 2  ;;  %s4760_s7 = sand.u32 1, %s6146_s15  }
0x109b   : > { %p7962_p1 = scmp.ne.s32.totalorder %s7865_s27, 0  ;;  %s4761_s6 = scalar_lea.sflag [#allocation6], %s4760_s7 }
0x109d   : > { %p5402_p6 = pnand %p5406_p13, %p7962_p1 }
0x109f   : > { %p5403_p10 = pneg %p5402_p6 }
0x10a1   : > { %6141 = dma.done.wait (%p5403_p10), %s4761_s6, 128  }
0x10a2   : > { %6143 = vsyncadd (%p5403_p10), %s4761_s6, 4294967168  ;;  %s7963_s20 = sld [smem:[#allocation17_spill]]  ;;  %p23_p2 = scmp.ge.s32.totalorder %s6222_s21, 5  }
0x10a3   : > { %s7964_s17 = sld [smem:[#allocation18_spill]]  ;;  %s7965_s15 = smov %s6150_s16 }
0x10a4   : > { %s7967_s18 = smov %s6222_s21  ;;  %25 = sbr.rel (!%p23_p2) target bundleno = 11 (0xb), region = 135 }
0x10a8   : > { %s7966_s16 = smov %s7963_s20 }
0x10a9   :  { %4766 = vsyncpa [#allocation5], 1 }
0x10aa   :  { %4768 = vsyncpa [#allocation5 + $0x1], 1 }
0x10ab   :  { %4769 = vsyncpa [#allocation8], 1 }
0x10ac   :  { %4771 = vsyncpa [#allocation8 + $0x1], 1 }
0x10ad   :  { %4772 = vsyncpa [#allocation11], 1 }
0x10ae   :  { %4774 = vsyncpa [#allocation11 + $0x1], 1 }
0x10af   :  { %4775 = vsyncpa [#allocation6], 1 }
0x10b0   :  { %4777 = vsyncpa [#allocation6 + $0x1], 1 }

</bundles_post_ra>
